<compile_context>
chip_gen: v5e
topology: v5e:2x2
jax: 0.10.0
libtpu: 0.0.40
codegen_flags: <defaults>
</compile_context>

<pallas_src>
import functools

import jax
import jax.numpy as jnp
from jax.experimental import pallas as pl
from jax.experimental.pallas import tpu as pltpu


def _attn_net_kernel(x_ref, w1_ref, b1_ref, w2_ref, b2_ref, out_ref):
    # x tile arrives f32 straight from HBM (no wrapper-side cast pass); cast to
    # bf16 on the VPU right before the MXU matmul. W1 is bf16, VMEM-resident.
    x_bf = x_ref[...].astype(jnp.bfloat16)                    # [TN, L] bf16
    a = jnp.tanh(
        jnp.dot(x_bf, w1_ref[...], preferred_element_type=jnp.float32)
        + b1_ref[...])                                         # [TN, D] f32

    if out_ref.shape[-1] == 1:
        # D -> 1 projection on VPU (mul) + XLU (lane reduce); w2 is lane-major
        # [1, D]. Avoids an almost-empty MXU pass per tile (keeps MXU free on
        # v5e where the first matmul is near the compute roofline).
        out = jnp.sum(a * w2_ref[...], axis=-1, keepdims=True) + b2_ref[...]
    else:
        out = (jnp.dot(a, w2_ref[...], preferred_element_type=jnp.float32)
               + b2_ref[...])

    out_ref[...] = out.astype(out_ref.dtype)


def _round_up(v: int, m: int) -> int:
    return ((v + m - 1) // m) * m


def _effective_tile_n(n_rows: int, tile_n: int) -> int:
    """Row-tile selection: as big as requested (HBM roofline likes >=512-row
    tiles), but capped so the parallel grid keeps >=2 (ideally 4) steps so both
    v7x TensorCores are fed. Always a multiple of 128, never (much) beyond N."""
    cap = _round_up(max(256, pl.cdiv(n_rows, 4)), 128)
    tn = max(128, min(_round_up(tile_n, 128), cap))
    return min(tn, _round_up(n_rows, 128))


@functools.partial(jax.jit, static_argnames=("tile_n",))
def attn_net(x, w1, b1, w2, b2, *, tile_n=512):
    """Attn_Net forward.

    x: [N, L]; w1: [L, D]; b1: [1, D] or [D]; w2: [D, C]; b2: [1, C] or [C].
    Returns (A, x) with A: [N, C] float32 — matching torch's
    `return self.module(x), x`.
    """
    N, L = x.shape
    D = w1.shape[1]
    C = w2.shape[1]

    tn = _effective_tile_n(N, tile_n)
    num_tiles = pl.cdiv(N, tn)          # ragged last block handled by Pallas

    # x stays f32 in HBM (cast happens inside the kernel); W1 bf16 is tiny and
    # converted once; W2/biases stay f32.
    x_in = x.astype(jnp.float32)
    w1_in = w1.astype(jnp.bfloat16)
    b1_in = b1.astype(jnp.float32).reshape(1, D)
    b2_in = b2.astype(jnp.float32).reshape(1, C)
    if C == 1:
        w2_in = w2.astype(jnp.float32).reshape(1, D)   # lane-major row
    else:
        w2_in = w2.astype(jnp.float32)

    # Per-core VMEM budget (resident operands are replicated per TensorCore on
    # v7x): x double-buffer + bf16 W1 + f32 activations + out double-buffer,
    # plus headroom. Clamped to [16 MiB, 48 MiB] (v7x physical VMEM is 64 MiB).
    vmem_bytes = (2 * tn * L * 4        # x tile double-buffer (f32)
                  + L * D * 2           # resident bf16 W1
                  + 3 * tn * D * 4      # f32 activations / temporaries
                  + 2 * tn * C * 4      # output double-buffer
                  + (4 << 20))          # headroom
    vmem_limit = int(min(max(vmem_bytes, 16 << 20), 48 << 20))

    const = lambda shape: pl.BlockSpec(shape, lambda i: (0,) * len(shape))

    a_out = pl.pallas_call(
        _attn_net_kernel,
        # Output is allocated at a tile multiple (tiny: C columns) so every
        # output block is fully in-bounds; padded rows are sliced off below.
        out_shape=jax.ShapeDtypeStruct((num_tiles * tn, C), jnp.float32),
        grid=(num_tiles,),
        in_specs=[
            pl.BlockSpec((tn, L), lambda i: (i, 0)),   # x: pipelined tiles
            const((L, D)),                             # W1 (VMEM-resident)
            const((1, D)),                             # b1
            const(w2_in.shape),                        # W2
            const((1, C)),                             # b2
        ],
        out_specs=pl.BlockSpec((tn, C), lambda i: (i, 0)),
        compiler_params=pltpu.CompilerParams(
            dimension_semantics=("parallel",),
            vmem_limit_bytes=vmem_limit,
        ),
    )(x_in, w1_in, b1_in, w2_in, b2_in)

    return a_out[:N], x


def reference(x, w1, b1, w2, b2):
    hp = jax.lax.Precision.HIGHEST
    a = jnp.tanh(jnp.dot(x, w1, precision=hp) + b1)
    return jnp.dot(a, w2, precision=hp) + b2, x


if __name__ == "__main__":
    # Module defaults: L=1024, D=256, n_classes=1; forward implies x: [N, L].
    # N is deliberately NOT tile-aligned so the ragged last-block path runs.
    N, L, D, n_classes = 300, 1024, 256, 1

    key = jax.random.PRNGKey(0)
    k_x, k_w1, k_b1, k_w2, k_b2 = jax.random.split(key, 5)

    x = jax.random.normal(k_x, (N, L), dtype=jnp.float32)

    # Deterministic parameter init (uniform, torch Linear default scale).
    def lin_init(kw, kb, fan_in, fan_out):
        bound = 1.0 / (fan_in ** 0.5)
        w = jax.random.uniform(kw, (fan_in, fan_out), jnp.float32, -bound, bound)
        b = jax.random.uniform(kb, (1, fan_out), jnp.float32, -bound, bound)
        return w, b

    w1, b1 = lin_init(k_w1, k_b1, L, D)            # Linear(L, D)
    w2, b2 = lin_init(k_w2, k_b2, D, n_classes)    # Linear(D, n_classes)

    a_out, x_out = attn_net(x, w1, b1, w2, b2, tile_n=512)
    a_out = jax.block_until_ready(a_out)

    # The kernel quantizes x and W1 to bf16 (f32 accumulation); the reference
    # uses the same quantized inputs so only accumulation order differs.
    x_q = x.astype(jnp.bfloat16).astype(jnp.float32)
    w1_q = w1.astype(jnp.bfloat16).astype(jnp.float32)
    a_ref, _ = reference(x_q, w1_q, b1, w2, b2)

    assert a_out.shape == (N, n_classes)
    assert x_out.shape == (N, L)
    assert jnp.allclose(x_out, x)
    assert jnp.allclose(a_out, a_ref, atol=2e-3, rtol=2e-3), float(
        jnp.max(jnp.abs(a_out - a_ref)))

    print("KERNEL_OK")
</pallas_src>

<mosaic_0001>
module attributes {stable_mosaic.version = 11 : i64} {
  func.func @_attn_net_kernel(%arg0: i32, %arg1: memref<256x1024xf32, #tpu.memory_space<vmem>>, %arg2: memref<1024x256xbf16, #tpu.memory_space<vmem>>, %arg3: memref<1x256xf32, #tpu.memory_space<vmem>>, %arg4: memref<1x256xf32, #tpu.memory_space<vmem>>, %arg5: memref<1x1xf32, #tpu.memory_space<vmem>>, %arg6: memref<256x1xf32, #tpu.memory_space<vmem>>) attributes {dimension_semantics = [#tpu.dimension_semantics<parallel>], iteration_bounds = array<i64: 2>, scalar_prefetch = 0 : i64, scratch_operands = 0 : i64, tpu.core_type = #tpu.core_type<tc>, window_params = [{transform_indices = @transform_0, window_bounds = array<i64: 256, 1024>}, {pipeline_mode = #tpu.pipeline_mode<synchronous>, transform_indices = @transform_1, window_bounds = array<i64: 1024, 256>}, {pipeline_mode = #tpu.pipeline_mode<synchronous>, transform_indices = @transform_2, window_bounds = array<i64: 1, 256>}, {pipeline_mode = #tpu.pipeline_mode<synchronous>, transform_indices = @transform_3, window_bounds = array<i64: 1, 256>}, {pipeline_mode = #tpu.pipeline_mode<synchronous>, transform_indices = @transform_4, window_bounds = array<i64: 1, 1>}, {transform_indices = @transform_5, window_bounds = array<i64: 256, 1>}]} {
    %c0 = arith.constant 0 : index
    %c0_0 = arith.constant 0 : index
    %0 = vector.load %arg1[%c0, %c0_0] : memref<256x1024xf32, #tpu.memory_space<vmem>>, vector<256x1024xf32>
    %1 = arith.truncf %0 : vector<256x1024xf32> to vector<256x1024xbf16>
    %c0_1 = arith.constant 0 : index
    %c0_2 = arith.constant 0 : index
    %2 = vector.load %arg2[%c0_1, %c0_2] : memref<1024x256xbf16, #tpu.memory_space<vmem>>, vector<1024x256xbf16>
    %cst = arith.constant dense<0.000000e+00> : vector<256x256xf32>
    %3 = tpu.matmul %1, %2, %cst {dimension_numbers = #tpu.dot_dimension_numbers<[1], [0], [0], [1], [0, 0, 1, 1], [], []>} : vector<256x1024xbf16>, vector<1024x256xbf16>, vector<256x256xf32> -> vector<256x256xf32>
    %c0_3 = arith.constant 0 : index
    %c0_4 = arith.constant 0 : index
    %4 = vector.load %arg3[%c0_3, %c0_4] : memref<1x256xf32, #tpu.memory_space<vmem>>, vector<1x256xf32>
    %5 = vector.broadcast %4 : vector<1x256xf32> to vector<256x256xf32>
    %6 = arith.addf %3, %5 : vector<256x256xf32>
    %7 = math.tanh %6 : vector<256x256xf32>
    %c0_5 = arith.constant 0 : index
    %c0_6 = arith.constant 0 : index
    %8 = vector.load %arg4[%c0_5, %c0_6] : memref<1x256xf32, #tpu.memory_space<vmem>>, vector<1x256xf32>
    %9 = vector.broadcast %8 : vector<1x256xf32> to vector<256x256xf32>
    %10 = arith.mulf %7, %9 : vector<256x256xf32>
    %cst_7 = arith.constant dense<0.000000e+00> : vector<256xf32>
    %11 = vector.multi_reduction <add>, %10, %cst_7 [1] : vector<256x256xf32> to vector<256xf32>
    %12 = vector.shape_cast %11 : vector<256xf32> to vector<256x1xf32>
    %c0_8 = arith.constant 0 : index
    %c0_9 = arith.constant 0 : index
    %13 = vector.load %arg5[%c0_8, %c0_9] : memref<1x1xf32, #tpu.memory_space<vmem>>, vector<1x1xf32>
    %14 = vector.broadcast %13 : vector<1x1xf32> to vector<256x1xf32>
    %15 = arith.addf %12, %14 : vector<256x1xf32>
    %c0_10 = arith.constant 0 : index
    %c0_11 = arith.constant 0 : index
    %16 = vector.load %arg6[%c0_10, %c0_11] : memref<256x1xf32, #tpu.memory_space<vmem>>, vector<256x1xf32>
    tpu.vector_store %arg6[%c0_10, %c0_11], %15 {strides = array<i32>} : memref<256x1xf32, #tpu.memory_space<vmem>>, vector<256x1xf32>,
    return
  }
  func.func @transform_0(%arg0: i32) -> (i32, i32) {
    %c0_i32 = arith.constant 0 : i32
    %c0_i32_0 = arith.constant 0 : i32
    return %arg0, %c0_i32 : i32, i32
  }
  func.func @transform_1(%arg0: i32) -> (i32, i32) {
    %c0_i32 = arith.constant 0 : i32
    %c0_i32_0 = arith.constant 0 : i32
    %c0_i32_1 = arith.constant 0 : i32
    return %c0_i32, %c0_i32_0 : i32, i32
  }
  func.func @transform_2(%arg0: i32) -> (i32, i32) {
    %c0_i32 = arith.constant 0 : i32
    %c0_i32_0 = arith.constant 0 : i32
    %c0_i32_1 = arith.constant 0 : i32
    return %c0_i32, %c0_i32_0 : i32, i32
  }
  func.func @transform_3(%arg0: i32) -> (i32, i32) {
    %c0_i32 = arith.constant 0 : i32
    %c0_i32_0 = arith.constant 0 : i32
    %c0_i32_1 = arith.constant 0 : i32
    return %c0_i32, %c0_i32_0 : i32, i32
  }
  func.func @transform_4(%arg0: i32) -> (i32, i32) {
    %c0_i32 = arith.constant 0 : i32
    %c0_i32_0 = arith.constant 0 : i32
    %c0_i32_1 = arith.constant 0 : i32
    return %c0_i32, %c0_i32_0 : i32, i32
  }
  func.func @transform_5(%arg0: i32) -> (i32, i32) {
    %c0_i32 = arith.constant 0 : i32
    %c0_i32_0 = arith.constant 0 : i32
    return %arg0, %c0_i32 : i32, i32
  }
}

</mosaic_0001>

<bundles_post_ra>
// kernel: attn_net.1
= control target key start
LH: loop header
LB: loop body
LE: loop exit
PB: predicated region body
PF: predicated region fallthrough
CT: control target
= control target key end

     0   :  { %s4027_s20 = smov 0   ;;  %s6123_s0 = inlined_call_operand.vmem [shape: f32[300,1024], index: 0, kind: input, shape index: {}]   ;;  %s6124_s1 = inlined_call_operand.vmem [shape: bf16[1024,256], index: 1, kind: input, shape index: {}]   ;;  %s6125_s2 = inlined_call_operand.vmem [shape: f32[1,256], index: 2, kind: input, shape index: {}]   ;;  %s6126_s3 = inlined_call_operand.vmem [shape: f32[1,256], index: 3, kind: input, shape index: {}]   ;;  %s6127_s4 = inlined_call_operand.<no memory space> [shape: f32[1,1], index: 4, kind: input, shape index: {}]   ;;  %s6128_s5 = inlined_call_operand.vmem [shape: f32[512,1], index: 5, kind: output, shape index: {}]  }
   0x1   :  { %v10_v0 = vstv %s6127_s4 }
   0x2   :  { %11 = vst [vmem:[#allocation2] sm:$0x1] %v10_v0 }
   0x3 LB: > { %s3195_s21 = sadd.s32 4294967295, %s3992_s20   ;;  %p3199_p0 = scmp.ge.s32.totalorder %s3992_s20, 1  ;;  %s3992_s20 = sphi %s4027_s20, %s17_s20  }
   0x4   : > { %p201_p1 = scmp.lt.s32.totalorder %s3992_s20, 3 }
   0x6   : > { %p202_p2 = pnand %p3199_p0, %p201_p1 }
   0x8   : > { %205 = sbr.rel (%p202_p2) target bundleno = 1331 (0x533), region = 40 }
   0xd   : > { %v3263_v1 = vld [vmem:[%s6124_s1 + $0x70] sm:$0xf]  ;;  %v3735_v2 = vld [vmem:[%s6124_s1 + $0x74] sm:$0xf0]  ;;  %v3255_v12 = vld [vmem:[%s6124_s1 + $0x60] sm:$0xf] }
   0xe   : > { %v3327_v3 = vld [vmem:[%s6124_s1 + $0xf0] sm:$0xf]  ;;  %v3264_v4 = vor.u32 %v3735_v2, %v3263_v1  ;;  %v3751_v5 = vld [vmem:[%s6124_s1 + $0xf4] sm:$0xf0]  ;;  %v3733_v14 = vld [vmem:[%s6124_s1 + $0x64] sm:$0xf0] }
   0xf   : > { %v3391_v6 = vld [vmem:[%s6124_s1 + $0x170] sm:$0xf]  ;;  %v3767_v7 = vld [vmem:[%s6124_s1 + $0x174] sm:$0xf0]  ;;  %v3328_v8 = vor.u32 %v3751_v5, %v3327_v3  ;;  %v3319_v15 = vld [vmem:[%s6124_s1 + $0xe0] sm:$0xf]  ;;  %v3256_v17 = vor.u32 %v3733_v14, %v3255_v12 }
  0x10   : > { %v3392_v9 = vor.u32 %v3767_v7, %v3391_v6  ;;  %v3455_v10 = vld [vmem:[%s6124_s1 + $0x1f0] sm:$0xf]  ;;  %v3783_v11 = vld [vmem:[%s6124_s1 + $0x1f4] sm:$0xf0]  ;;  %1416 = vmatpush.bf16.msra.mxu0 %v3264_v4  ;;  %v3749_v16 = vld [vmem:[%s6124_s1 + $0xe4] sm:$0xf0] }
  0x11   : > { %v3456_v13 = vor.u32 %v3783_v11, %v3455_v10  ;;  %1505 = vmatpush.bf16.msra.mxu1 %v3328_v8  ;;  %v3320_v18 = vor.u32 %v3749_v16, %v3319_v15  ;;  %v3383_v19 = vld [vmem:[%s6124_s1 + $0x160] sm:$0xf]  ;;  %v3765_v20 = vld [vmem:[%s6124_s1 + $0x164] sm:$0xf0]  ;;  %v3247_v24 = vld [vmem:[%s6124_s1 + $0x50] sm:$0xf] }
  0x12   : > { %1594 = vmatpush.bf16.msra.mxu2 %v3392_v9  ;;  %v3447_v21 = vld [vmem:[%s6124_s1 + $0x1e0] sm:$0xf]  ;;  %v3384_v22 = vor.u32 %v3765_v20, %v3383_v19  ;;  %v3781_v23 = vld [vmem:[%s6124_s1 + $0x1e4] sm:$0xf0]  ;;  %v3731_v25 = vld [vmem:[%s6124_s1 + $0x54] sm:$0xf0] }
  0x13   : > { %1683 = vmatpush.bf16.msra.mxu3 %v3456_v13  ;;  %v3448_v26 = vor.u32 %v3781_v23, %v3447_v21  ;;  %v3311_v27 = vld [vmem:[%s6124_s1 + $0xd0] sm:$0xf]  ;;  %v3747_v28 = vld [vmem:[%s6124_s1 + $0xd4] sm:$0xf0]  ;;  %v3248_v30 = vor.u32 %v3731_v25, %v3247_v24  ;;  %v3239_v36 = vld [vmem:[%s6124_s1 + $0x40] sm:$0xf] }
  0x14   : > { %v3375_v29 = vld [vmem:[%s6124_s1 + $0x150] sm:$0xf]  ;;  %1417 = vmatpush.bf16.msra.mxu0 %v3256_v17  ;;  %v3763_v31 = vld [vmem:[%s6124_s1 + $0x154] sm:$0xf0]  ;;  %v3312_v34 = vor.u32 %v3747_v28, %v3311_v27  ;;  %v3729_v37 = vld [vmem:[%s6124_s1 + $0x44] sm:$0xf0] }
  0x15   : > { %v3439_v32 = vld [vmem:[%s6124_s1 + $0x1d0] sm:$0xf]  ;;  %v3779_v33 = vld [vmem:[%s6124_s1 + $0x1d4] sm:$0xf0]  ;;  %1506 = vmatpush.bf16.msra.mxu1 %v3320_v18  ;;  %v3376_v35 = vor.u32 %v3763_v31, %v3375_v29  ;;  %v3303_v38 = vld [vmem:[%s6124_s1 + $0xc0] sm:$0xf]  ;;  %v3240_v45 = vor.u32 %v3729_v37, %v3239_v36 }
  0x16   : > { %1595 = vmatpush.bf16.msra.mxu2 %v3384_v22  ;;  %v3440_v39 = vor.u32 %v3779_v33, %v3439_v32  ;;  %v3745_v40 = vld [vmem:[%s6124_s1 + $0xc4] sm:$0xf0]  ;;  %v3367_v41 = vld [vmem:[%s6124_s1 + $0x140] sm:$0xf]  ;;  %v3231_v48 = vld [vmem:[%s6124_s1 + $0x30] sm:$0xf] }
  0x17   : > { %1684 = vmatpush.bf16.msra.mxu3 %v3448_v26  ;;  %v3761_v42 = vld [vmem:[%s6124_s1 + $0x144] sm:$0xf0]  ;;  %v3431_v43 = vld [vmem:[%s6124_s1 + $0x1c0] sm:$0xf]  ;;  %v3304_v46 = vor.u32 %v3745_v40, %v3303_v38  ;;  %v3727_v49 = vld [vmem:[%s6124_s1 + $0x34] sm:$0xf0] }
  0x18   : > { %v3777_v44 = vld [vmem:[%s6124_s1 + $0x1c4] sm:$0xf0]  ;;  %1418 = vmatpush.bf16.msra.mxu0 %v3248_v30  ;;  %v3368_v47 = vor.u32 %v3761_v42, %v3367_v41  ;;  %v3295_v50 = vld [vmem:[%s6124_s1 + $0xb0] sm:$0xf]  ;;  %v3743_v52 = vld [vmem:[%s6124_s1 + $0xb4] sm:$0xf0]  ;;  %v3232_v57 = vor.u32 %v3727_v49, %v3231_v48 }
  0x19   : > { %1507 = vmatpush.bf16.msra.mxu1 %v3312_v34  ;;  %v3432_v51 = vor.u32 %v3777_v44, %v3431_v43  ;;  %v3359_v53 = vld [vmem:[%s6124_s1 + $0x130] sm:$0xf]  ;;  %v3759_v54 = vld [vmem:[%s6124_s1 + $0x134] sm:$0xf0]  ;;  %v3296_v58 = vor.u32 %v3743_v52, %v3295_v50  ;;  %v3223_v60 = vld [vmem:[%s6124_s1 + $0x20] sm:$0xf] }
  0x1a   : > { %1596 = vmatpush.bf16.msra.mxu2 %v3376_v35  ;;  %v3423_v55 = vld [vmem:[%s6124_s1 + $0x1b0] sm:$0xf]  ;;  %v3775_v56 = vld [vmem:[%s6124_s1 + $0x1b4] sm:$0xf0]  ;;  %v3360_v59 = vor.u32 %v3759_v54, %v3359_v53  ;;  %v3725_v61 = vld [vmem:[%s6124_s1 + $0x24] sm:$0xf0] }
  0x1b   : > { %1685 = vmatpush.bf16.msra.mxu3 %v3440_v39  ;;  %v3287_v62 = vld [vmem:[%s6124_s1 + $0xa0] sm:$0xf]  ;;  %v3424_v63 = vor.u32 %v3775_v56, %v3423_v55  ;;  %v3741_v0 = vld [vmem:[%s6124_s1 + $0xa4] sm:$0xf0]  ;;  %v3224_v5 = vor.u32 %v3725_v61, %v3223_v60  ;;  %v3215_v6 = vld [vmem:[%s6124_s1 + $0x10] sm:$0xf] }
  0x1c   : > { %1419 = vmatpush.bf16.msra.mxu0 %v3240_v45  ;;  %v3351_v1 = vld [vmem:[%s6124_s1 + $0x120] sm:$0xf]  ;;  %v3757_v2 = vld [vmem:[%s6124_s1 + $0x124] sm:$0xf0]  ;;  %v3723_v7 = vld [vmem:[%s6124_s1 + $0x14] sm:$0xf0]  ;;  %v3288_v8 = vor.u32 %v3741_v0, %v3287_v62 }
  0x1d   : > { %1508 = vmatpush.bf16.msra.mxu1 %v3304_v46  ;;  %v3415_v3 = vld [vmem:[%s6124_s1 + $0x1a0] sm:$0xf]  ;;  %v3773_v4 = vld [vmem:[%s6124_s1 + $0x1a4] sm:$0xf0]  ;;  %v3352_v9 = vor.u32 %v3757_v2, %v3351_v1  ;;  %v3279_v10 = vld [vmem:[%s6124_s1 + $0x90] sm:$0xf]  ;;  %v3216_v18 = vor.u32 %v3723_v7, %v3215_v6 }
  0x1e   : > { %1597 = vmatpush.bf16.msra.mxu2 %v3368_v47  ;;  %v3739_v11 = vld [vmem:[%s6124_s1 + $0x94] sm:$0xf0]  ;;  %v3343_v12 = vld [vmem:[%s6124_s1 + $0x110] sm:$0xf]  ;;  %v3416_v13 = vor.u32 %v3773_v4, %v3415_v3  ;;  %s4202_s10 = sshll.u32 %s3195_s21, 5  ;;  %vm3106_vm0 = vcmask 7168  }
  0x1f   : > { %1686 = vmatpush.bf16.msra.mxu3 %v3432_v51  ;;  %v3755_v14 = vld [vmem:[%s6124_s1 + $0x114] sm:$0xf0]  ;;  %v3407_v15 = vld [vmem:[%s6124_s1 + $0x190] sm:$0xf]  ;;  %v3207_v17 = vld [vmem:[%s6124_s1] sm:$0xf]  ;;  %v3280_v22 = vor.u32 %v3739_v11, %v3279_v10 }
  0x20   : > { %1420 = vmatpush.bf16.msra.mxu0 %v3232_v57  ;;  %v3771_v16 = vld [vmem:[%s6124_s1 + $0x194] sm:$0xf0]  ;;  %p241_p3 = scmp.lt.s32.totalorder %s4202_s10, 37  ;;  %v3721_v19 = vld [vmem:[%s6124_s1 + $0x4] sm:$0xf0]  ;;  %v3344_v23 = vor.u32 %v3755_v14, %v3343_v12  ;;  %p253_p4 = scmp.lt.s32.totalorder %s4202_s10, 63 }
  0x21   : > { %1509 = vmatpush.bf16.msra.mxu1 %v3296_v58  ;;  %v3271_v20 = vld [vmem:[%s6124_s1 + $0x80] sm:$0xf]  ;;  %v3737_v21 = vld [vmem:[%s6124_s1 + $0x84] sm:$0xf0]  ;;  %v3408_v26 = vor.u32 %v3771_v16, %v3407_v15  ;;  %v3647_v29 = vld [vmem:[%s6124_s1 + $0x370] sm:$0xf]  ;;  %v3208_v31 = vor.u32 %v3721_v19, %v3207_v17 }
  0x22   : > { %1598 = vmatpush.bf16.msra.mxu2 %v3360_v59  ;;  %v3335_v24 = vld [vmem:[%s6124_s1 + $0x100] sm:$0xf]  ;;  %v3753_v25 = vld [vmem:[%s6124_s1 + $0x104] sm:$0xf0]  ;;  %s242_s25 = scalar_select %p241_p3, %s4202_s10, 37  ;;  %v3272_v36 = vor.u32 %v3737_v21, %v3271_v20 }
  0x23   : > { %1687 = vmatpush.bf16.msra.mxu3 %v3424_v63  ;;  %v3399_v27 = vld [vmem:[%s6124_s1 + $0x180] sm:$0xf]  ;;  %v3769_v28 = vld [vmem:[%s6124_s1 + $0x184] sm:$0xf0]  ;;  %v3831_v30 = vld [vmem:[%s6124_s1 + $0x374] sm:$0xf0]  ;;  %v3336_v37 = vor.u32 %v3753_v25, %v3335_v24 }
  0x24   : > { %1421 = vmatpush.bf16.msra.mxu0 %v3224_v5  ;;  %s3719_s30 = sshll.u32 %s242_s25, 6  ;;  %v3519_v32 = vld [vmem:[%s6124_s1 + $0x270] sm:$0xf]  ;;  %v3799_v33 = vld [vmem:[%s6124_s1 + $0x274] sm:$0xf0]  ;;  %v3400_v42 = vor.u32 %v3769_v28, %v3399_v27  ;;  %v3648_v46 = vor.u32 %v3831_v30, %v3647_v29  ;;  %s6499_s10 = smov (!%p253_p4, %s4202_s10), 63 }
  0x25   : > { %1510 = vmatpush.bf16.msra.mxu1 %v3288_v8  ;;  %s4242_s13 = scalar_lea.vmem %s6123_s0, %s3719_s30  ;;  %v3711_v34 = vld [vmem:[%s6124_s1 + $0x3f0] sm:$0xf]  ;;  %v3847_v35 = vld [vmem:[%s6124_s1 + $0x3f4] sm:$0xf0]  ;;  %v3520_v55 = vor.u32 %v3799_v33, %v3519_v32  ;;  %v3639_v57 = vld [vmem:[%s6124_s1 + $0x360] sm:$0xf] }
  0x26   : > { %1599 = vmatpush.bf16.msra.mxu2 %v3352_v9  ;;  %v258_v38 = vld [vmem:[%s4242_s13] sm:$0xff]  ;;  %v259_v40 = vld [vmem:[%s4242_s13 + $0x8] sm:$0xff]  ;;  %v3583_v41 = vld [vmem:[%s6124_s1 + $0x2f0] sm:$0xf]  ;;  %v3712_v50 = vor.u32 %v3847_v35, %v3711_v34  ;;  %s3204_s27 = sshll.u32 %s6499_s10, 3 }
  0x27   : > { %1688 = vmatpush.bf16.msra.mxu3 %v3416_v13  ;;  %v266_v39 = vld [vmem:[%s4242_s13 + $0x40] sm:$0xff]  ;;  %v267_v43 = vld [vmem:[%s4242_s13 + $0x48] sm:$0xff]  ;;  %v260_v44 = vld [vmem:[%s4242_s13 + $0x10] sm:$0xff]  ;;  %s5959_s30 = scalar_lea.vmem %s6128_s5, %s3204_s27 }
  0x28   : > { %1422 = vmatpush.bf16.msra.mxu0 %v3216_v18  ;;  %v268_v45 = vld [vmem:[%s4242_s13 + $0x50] sm:$0xff]  ;;  %v4265_v47 = vpack.c.bf16 %v266_v39, %v258_v38  ;;  %v261_v48 = vld [vmem:[%s4242_s13 + $0x18] sm:$0xff]  ;;  %v4272_v52 = vpack.c.bf16 %v267_v43, %v259_v40  ;;  %v3829_v58 = vld [vmem:[%s6124_s1 + $0x364] sm:$0xf0] }
  0x29   : > { %1511 = vmatpush.bf16.msra.mxu1 %v3280_v22  ;;  %v269_v49 = vld [vmem:[%s4242_s13 + $0x58] sm:$0xff]  ;;  %v4274_v53 = vpack.c.bf16 %v268_v45, %v260_v44  ;;  %v3511_v59 = vld [vmem:[%s6124_s1 + $0x260] sm:$0xf]  ;;  %v3640_v60 = vor.u32 %v3829_v58, %v3639_v57  ;;  %v3797_v61 = vld [vmem:[%s6124_s1 + $0x264] sm:$0xf0] }
  0x2a   : > { %1600 = vmatpush.bf16.msra.mxu2 %v3344_v23  ;;  %v3815_v51 = vld [vmem:[%s6124_s1 + $0x2f4] sm:$0xf0]  ;;  %v4276_v54 = vpack.c.bf16 %v269_v49, %v261_v48  ;;  %v3703_v62 = vld [vmem:[%s6124_s1 + $0x3e0] sm:$0xf]  ;;  %v3845_v63 = vld [vmem:[%s6124_s1 + $0x3e4] sm:$0xf0]  ;;  %v3512_v0 = vor.u32 %v3797_v61, %v3511_v59 }
  0x2b   : > { %1689 = vmatpush.bf16.msra.mxu3 %v3408_v26  ;;  %v3584_v56 = vor.u32 %v3815_v51, %v3583_v41  ;;  %v3704_v1 = vor.u32 %v3845_v63, %v3703_v62  ;;  %v3575_v2 = vld [vmem:[%s6124_s1 + $0x2e0] sm:$0xf]  ;;  %v3813_v3 = vld [vmem:[%s6124_s1 + $0x2e4] sm:$0xf0]  ;;  %v276_v9 = vld [vmem:[%s4242_s13 + $0x90] sm:$0xff] }
  0x2c   : > { %1423 = vmatpush.bf16.msra.mxu0 %v3208_v31  ;;  %v3576_v4 = vor.u32 %v3813_v3, %v3575_v2  ;;  %v274_v5 = vld [vmem:[%s4242_s13 + $0x80] sm:$0xff]  ;;  %v275_v7 = vld [vmem:[%s4242_s13 + $0x88] sm:$0xff]  ;;  %v284_v10 = vld [vmem:[%s4242_s13 + $0xd0] sm:$0xff] }
  0x2d   : > { %1512 = vmatpush.bf16.msra.mxu1 %v3272_v36  ;;  %v282_v6 = vld [vmem:[%s4242_s13 + $0xc0] sm:$0xff]  ;;  %v283_v8 = vld [vmem:[%s4242_s13 + $0xc8] sm:$0xff]  ;;  %v277_v11 = vld [vmem:[%s4242_s13 + $0x98] sm:$0xff]  ;;  %v4318_v15 = vpack.c.bf16 %v284_v10, %v276_v9 }
  0x2e   : > { %1601 = vmatpush.bf16.msra.mxu2 %v3336_v37  ;;  %v285_v12 = vld [vmem:[%s4242_s13 + $0xd8] sm:$0xff]  ;;  %v4314_v13 = vpack.c.bf16 %v282_v6, %v274_v5  ;;  %v4316_v14 = vpack.c.bf16 %v283_v8, %v275_v7  ;;  %v290_v17 = vld [vmem:[%s4242_s13 + $0x100] sm:$0xff]  ;;  %v291_v19 = vld [vmem:[%s4242_s13 + $0x108] sm:$0xff] }
  0x2f   : > { %1690 = vmatpush.bf16.msra.mxu3 %v3400_v42  ;;  %1424 = vmatmul.bf16.vlgmr.msra.gmra.mxu0 %v4265_v47  ;;  %v4320_v16 = vpack.c.bf16 %v285_v12, %v277_v11  ;;  %v298_v18 = vld [vmem:[%s4242_s13 + $0x140] sm:$0xff]  ;;  %v299_v20 = vld [vmem:[%s4242_s13 + $0x148] sm:$0xff]  ;;  %v292_v21 = vld [vmem:[%s4242_s13 + $0x110] sm:$0xff] }
  0x30   : > { %1513 = vmatmul.bf16.vlgmr.msra.gmra.mxu1 %v4272_v52  ;;  %1772 = vmatpush.bf16.msrb.mxu0 %v3520_v55  ;;  %v300_v22 = vld [vmem:[%s4242_s13 + $0x150] sm:$0xff]  ;;  %v293_v23 = vld [vmem:[%s4242_s13 + $0x118] sm:$0xff]  ;;  %v4334_v25 = vpack.c.bf16 %v298_v18, %v290_v17  ;;  %v4336_v26 = vpack.c.bf16 %v299_v20, %v291_v19  ;;  %v306_v41 = vld [vmem:[%s4242_s13 + $0x180] sm:$0xff] }
  0x31   : > { %1602 = vmatmul.bf16.vlgmr.msra.gmra.mxu2 %v4274_v53  ;;  %1861 = vmatpush.bf16.msrb.mxu1 %v3584_v56  ;;  %v301_v24 = vld [vmem:[%s4242_s13 + $0x158] sm:$0xff]  ;;  %v4338_v27 = vpack.c.bf16 %v300_v22, %v292_v21  ;;  %v3631_v29 = vld [vmem:[%s6124_s1 + $0x350] sm:$0xf]  ;;  %v314_v42 = vld [vmem:[%s4242_s13 + $0x1c0] sm:$0xff] }
  0x32   : > { %1950 = vmatpush.bf16.msrb.mxu2 %v3648_v46  ;;  %1691 = vmatmul.bf16.vlgmr.msra.gmra.mxu3 %v4276_v54  ;;  %v4340_v28 = vpack.c.bf16 %v301_v24, %v293_v23  ;;  %v3827_v30 = vld [vmem:[%s6124_s1 + $0x354] sm:$0xf0]  ;;  %v3503_v31 = vld [vmem:[%s6124_s1 + $0x250] sm:$0xf]  ;;  %v307_v43 = vld [vmem:[%s4242_s13 + $0x188] sm:$0xff] }
  0x33   : > { %2039 = vmatpush.bf16.msrb.mxu3 %v3712_v50  ;;  %v3632_v32 = vor.u32 %v3827_v30, %v3631_v29  ;;  %v3795_v33 = vld [vmem:[%s6124_s1 + $0x254] sm:$0xf0]  ;;  %v3695_v34 = vld [vmem:[%s6124_s1 + $0x3d0] sm:$0xf]  ;;  %v315_v44 = vld [vmem:[%s4242_s13 + $0x1c8] sm:$0xff]  ;;  %v4378_v50 = vpack.c.bf16 %v314_v42, %v306_v41 }
  0x34   : > { %1773 = vmatpush.bf16.msrb.mxu0 %v3512_v0  ;;  %v3843_v35 = vld [vmem:[%s6124_s1 + $0x3d4] sm:$0xf0]  ;;  %v3504_v36 = vor.u32 %v3795_v33, %v3503_v31  ;;  %v3567_v38 = vld [vmem:[%s6124_s1 + $0x2d0] sm:$0xf]  ;;  %v4380_v51 = vpack.c.bf16 %v315_v44, %v307_v43  ;;  %v322_v57 = vld [vmem:[%s4242_s13 + $0x200] sm:$0xff] }
  0x35   : > { %1862 = vmatpush.bf16.msrb.mxu1 %v3576_v4  ;;  %v3696_v37 = vor.u32 %v3843_v35, %v3695_v34  ;;  %v3811_v39 = vld [vmem:[%s6124_s1 + $0x2d4] sm:$0xf0]  ;;  %v308_v45 = vld [vmem:[%s4242_s13 + $0x190] sm:$0xff]  ;;  %v330_v58 = vld [vmem:[%s4242_s13 + $0x240] sm:$0xff] }
  0x36   : > { %1951 = vmatpush.bf16.msrb.mxu2 %v3640_v60  ;;  %v3568_v40 = vor.u32 %v3811_v39, %v3567_v38  ;;  %v316_v46 = vld [vmem:[%s4242_s13 + $0x1d0] sm:$0xff]  ;;  %v309_v48 = vld [vmem:[%s4242_s13 + $0x198] sm:$0xff]  ;;  %v323_v59 = vld [vmem:[%s4242_s13 + $0x208] sm:$0xff] }
  0x37   : > { %2040 = vmatpush.bf16.msrb.mxu3 %v3704_v1  ;;  %v317_v49 = vld [vmem:[%s4242_s13 + $0x1d8] sm:$0xff]  ;;  %v4382_v55 = vpack.c.bf16 %v316_v46, %v308_v45  ;;  %v331_v60 = vld [vmem:[%s4242_s13 + $0x248] sm:$0xff]  ;;  %v324_v61 = vld [vmem:[%s4242_s13 + $0x210] sm:$0xff]  ;;  %v4398_v1 = vpack.c.bf16 %v330_v58, %v322_v57 }
  0x38   : > { %1774 = vmatpush.bf16.msrb.mxu0 %v3504_v36  ;;  %v4384_v56 = vpack.c.bf16 %v317_v49, %v309_v48  ;;  %v332_v62 = vld [vmem:[%s4242_s13 + $0x250] sm:$0xff]  ;;  %v325_v63 = vld [vmem:[%s4242_s13 + $0x218] sm:$0xff]  ;;  %v4400_v2 = vpack.c.bf16 %v331_v60, %v323_v59  ;;  %v3623_v5 = vld [vmem:[%s6124_s1 + $0x340] sm:$0xf] }
  0x39   : > { %1863 = vmatpush.bf16.msrb.mxu1 %v3568_v40  ;;  %v333_v0 = vld [vmem:[%s4242_s13 + $0x258] sm:$0xff]  ;;  %6234 = vst [vmem:[#allocation3_spill] sm:$0xff] %v4398_v1  ;;  %v4402_v3 = vpack.c.bf16 %v332_v62, %v324_v61  ;;  %v3825_v6 = vld [vmem:[%s6124_s1 + $0x344] sm:$0xf0]  ;;  %v3495_v7 = vld [vmem:[%s6124_s1 + $0x240] sm:$0xf] }
  0x3a   : > { %1952 = vmatpush.bf16.msrb.mxu2 %v3632_v32  ;;  %6235 = vst [vmem:[#allocation4_spill] sm:$0xff] %v4400_v2  ;;  %v4404_v4 = vpack.c.bf16 %v333_v0, %v325_v63  ;;  %v3624_v8 = vor.u32 %v3825_v6, %v3623_v5  ;;  %v3793_v9 = vld [vmem:[%s6124_s1 + $0x244] sm:$0xf0]  ;;  %v3687_v10 = vld [vmem:[%s6124_s1 + $0x3c0] sm:$0xf]  ;;  %v340_v29 = vld [vmem:[%s4242_s13 + $0x290] sm:$0xff] }
  0x3b   : > { %2041 = vmatpush.bf16.msrb.mxu3 %v3696_v37  ;;  %6236 = vst [vmem:[#allocation5_spill] sm:$0xff] %v4402_v3  ;;  %v3841_v11 = vld [vmem:[%s6124_s1 + $0x3c4] sm:$0xf0]  ;;  %v3496_v12 = vor.u32 %v3793_v9, %v3495_v7  ;;  %v3559_v18 = vld [vmem:[%s6124_s1 + $0x2c0] sm:$0xf]  ;;  %v348_v30 = vld [vmem:[%s4242_s13 + $0x2d0] sm:$0xff] }
  0x3c   : > { %6237 = vst [vmem:[#allocation6_spill] sm:$0xff] %v4404_v4  ;;  %v3688_v17 = vor.u32 %v3841_v11, %v3687_v10  ;;  %v3809_v19 = vld [vmem:[%s6124_s1 + $0x2c4] sm:$0xf0]  ;;  %v338_v21 = vld [vmem:[%s4242_s13 + $0x280] sm:$0xff]  ;;  %v341_v31 = vld [vmem:[%s4242_s13 + $0x298] sm:$0xff]  ;;  %v4446_v35 = vpack.c.bf16 %v348_v30, %v340_v29 }
  0x3d   : > { %v3560_v20 = vor.u32 %v3809_v19, %v3559_v18  ;;  %1775 = vmatpush.bf16.msrb.mxu0 %v3496_v12  ;;  %v346_v22 = vld [vmem:[%s4242_s13 + $0x2c0] sm:$0xff]  ;;  %v339_v23 = vld [vmem:[%s4242_s13 + $0x288] sm:$0xff]  ;;  %v349_v32 = vld [vmem:[%s4242_s13 + $0x2d8] sm:$0xff] }
  0x3e   : > { %1953 = vmatpush.bf16.msrb.mxu2 %v3624_v8  ;;  %v347_v24 = vld [vmem:[%s4242_s13 + $0x2c8] sm:$0xff]  ;;  %v4442_v33 = vpack.c.bf16 %v346_v22, %v338_v21  ;;  %6240 = vst [vmem:[#allocation9_spill] sm:$0xff] %v4446_v35  ;;  %v4448_v36 = vpack.c.bf16 %v349_v32, %v341_v31  ;;  %v354_v37 = vld [vmem:[%s4242_s13 + $0x300] sm:$0xff]  ;;  %v356_v41 = vld [vmem:[%s4242_s13 + $0x310] sm:$0xff] }
  0x3f   : > { %1429 = vmatmul.bf16.gmra.mxu0 %v4314_v13  ;;  %2042 = vmatpush.bf16.msrb.mxu3 %v3688_v17  ;;  %v4444_v34 = vpack.c.bf16 %v347_v24, %v339_v23  ;;  %v362_v38 = vld [vmem:[%s4242_s13 + $0x340] sm:$0xff]  ;;  %v355_v39 = vld [vmem:[%s4242_s13 + $0x308] sm:$0xff]  ;;  %v364_v42 = vld [vmem:[%s4242_s13 + $0x350] sm:$0xff] }
  0x40   : > { %1518 = vmatmul.bf16.gmra.mxu1 %v4316_v14  ;;  %6238 = vst [vmem:[#allocation7_spill] sm:$0xff] %v4442_v33  ;;  %v363_v40 = vld [vmem:[%s4242_s13 + $0x348] sm:$0xff]  ;;  %v357_v43 = vld [vmem:[%s4242_s13 + $0x318] sm:$0xff]  ;;  %v4462_v45 = vpack.c.bf16 %v362_v38, %v354_v37  ;;  %v4466_v48 = vpack.c.bf16 %v364_v42, %v356_v41  ;;  %v3615_v57 = vld [vmem:[%s6124_s1 + $0x330] sm:$0xf] }
  0x41   : > { %1607 = vmatmul.bf16.gmra.mxu2 %v4318_v15  ;;  %1864 = vmatpush.bf16.msrb.mxu1 %v3560_v20  ;;  %6239 = vst [vmem:[#allocation8_spill] sm:$0xff] %v4444_v34  ;;  %v365_v44 = vld [vmem:[%s4242_s13 + $0x358] sm:$0xff]  ;;  %v4464_v46 = vpack.c.bf16 %v363_v40, %v355_v39  ;;  %v3487_v59 = vld [vmem:[%s6124_s1 + $0x230] sm:$0xf]  ;;  %v370_v9 = vld [vmem:[%s4242_s13 + $0x380] sm:$0xff] }
  0x42   : > { %1696 = vmatmul.bf16.gmra.mxu3 %v4320_v16  ;;  %6241 = vst [vmem:[#allocation10_spill] sm:$0xff] %v4448_v36  ;;  %v4468_v49 = vpack.c.bf16 %v365_v44, %v357_v43  ;;  %v3823_v58 = vld [vmem:[%s6124_s1 + $0x334] sm:$0xf0]  ;;  %v3679_v62 = vld [vmem:[%s6124_s1 + $0x3b0] sm:$0xf]  ;;  %v378_v10 = vld [vmem:[%s4242_s13 + $0x3c0] sm:$0xff] }
  0x43   : > { %6242 = vst [vmem:[#allocation11_spill] sm:$0xff] %v4462_v45  ;;  %v3616_v60 = vor.u32 %v3823_v58, %v3615_v57  ;;  %v3791_v61 = vld [vmem:[%s6124_s1 + $0x234] sm:$0xf0]  ;;  %v3551_v6 = vld [vmem:[%s6124_s1 + $0x2b0] sm:$0xf]  ;;  %v371_v11 = vld [vmem:[%s4242_s13 + $0x388] sm:$0xff]  ;;  %v4506_v21 = vpack.c.bf16 %v378_v10, %v370_v9 }
  0x44   : > { %6243 = vst [vmem:[#allocation12_spill] sm:$0xff] %v4464_v46  ;;  %v3839_v63 = vld [vmem:[%s6124_s1 + $0x3b4] sm:$0xf0]  ;;  %v3488_v0 = vor.u32 %v3791_v61, %v3487_v59  ;;  %v379_v12 = vld [vmem:[%s4242_s13 + $0x3c8] sm:$0xff]  ;;  %v372_v17 = vld [vmem:[%s4242_s13 + $0x390] sm:$0xff] }
  0x45   : > { %6244 = vst [vmem:[#allocation13_spill] sm:$0xff] %v4466_v48  ;;  %v3680_v5 = vor.u32 %v3839_v63, %v3679_v62  ;;  %1954 = vmatpush.bf16.msrb.mxu2 %v3616_v60  ;;  %v3807_v7 = vld [vmem:[%s6124_s1 + $0x2b4] sm:$0xf0]  ;;  %v380_v18 = vld [vmem:[%s4242_s13 + $0x3d0] sm:$0xff]  ;;  %v4508_v22 = vpack.c.bf16 %v379_v12, %v371_v11  ;;  %v770_v29 = vld [vmem:[%s6125_s2] sm:$0x3] }
  0x46   : > { %6245 = vst [vmem:[#allocation14_spill] sm:$0xff] %v4468_v49  ;;  %1776 = vmatpush.bf16.msrb.mxu0 %v3488_v0  ;;  %v3552_v8 = vor.u32 %v3807_v7, %v3551_v6  ;;  %v373_v19 = vld [vmem:[%s4242_s13 + $0x398] sm:$0xff]  ;;  %v4510_v23 = vpack.c.bf16 %v380_v18, %v372_v17  ;;  %v386_v30 = vld [vmem:[%s4242_s13 + $0x400] sm:$0xff]  ;;  %v387_v32 = vld [vmem:[%s4242_s13 + $0x408] sm:$0xff]  ;;  %v4524_v37 = vperm.slane %v770_v29, 0 }
  0x47   : > { %2043 = vmatpush.bf16.msrb.mxu3 %v3680_v5  ;;  %v381_v20 = vld [vmem:[%s4242_s13 + $0x3d8] sm:$0xff]  ;;  %6246 = vst [vmem:[#allocation15_spill] sm:$0xff] %v4506_v21  ;;  %v394_v31 = vld [vmem:[%s4242_s13 + $0x440] sm:$0xff]  ;;  %v395_v38 = vld [vmem:[%s4242_s13 + $0x448] sm:$0xff] }
  0x48   : > { %1865 = vmatpush.bf16.msrb.mxu1 %v3552_v8  ;;  %6247 = vst [vmem:[#allocation16_spill] sm:$0xff] %v4508_v22  ;;  %v4512_v24 = vpack.c.bf16 %v381_v20, %v373_v19  ;;  %v388_v39 = vld [vmem:[%s4242_s13 + $0x410] sm:$0xff]  ;;  %v389_v41 = vld [vmem:[%s4242_s13 + $0x418] sm:$0xff]  ;;  %v4531_v43 = vpack.c.bf16 %v394_v31, %v386_v30  ;;  %v4533_v57 = vpack.c.bf16 %v395_v38, %v387_v32  ;;  %v3607_v63 = vld [vmem:[%s6124_s1 + $0x320] sm:$0xf] }
  0x49   : > { %6248 = vst [vmem:[#allocation17_spill] sm:$0xff] %v4510_v23  ;;  %v396_v40 = vld [vmem:[%s4242_s13 + $0x450] sm:$0xff]  ;;  %v397_v42 = vld [vmem:[%s4242_s13 + $0x458] sm:$0xff]  ;;  %v3821_v0 = vld [vmem:[%s6124_s1 + $0x324] sm:$0xf0] }
  0x4a   : > { %6249 = vst [vmem:[#allocation18_spill] sm:$0xff] %v4512_v24  ;;  %v4535_v58 = vpack.c.bf16 %v396_v40, %v388_v39  ;;  %v4538_v61 = vpack.c.bf16 %v397_v42, %v389_v41  ;;  %v3479_v5 = vld [vmem:[%s6124_s1 + $0x220] sm:$0xf]  ;;  %v3608_v6 = vor.u32 %v3821_v0, %v3607_v63  ;;  %v3789_v7 = vld [vmem:[%s6124_s1 + $0x224] sm:$0xf0]  ;;  %v413_v63 = vld [vmem:[%s4242_s13 + $0x4d8] sm:$0xff] }
  0x4b   : > { %6250 = vst [vmem:[#allocation19_spill] sm:$0xff] %v4531_v43  ;;  %v3671_v8 = vld [vmem:[%s6124_s1 + $0x3a0] sm:$0xf]  ;;  %v3837_v9 = vld [vmem:[%s6124_s1 + $0x3a4] sm:$0xf0]  ;;  %v3480_v11 = vor.u32 %v3789_v7, %v3479_v5 }
  0x4c   : > { %6251 = vst [vmem:[#allocation20_spill] sm:$0xff] %v4533_v57  ;;  %v3672_v12 = vor.u32 %v3837_v9, %v3671_v8  ;;  %1955 = vmatpush.bf16.msrb.mxu2 %v3608_v6  ;;  %v3543_v31 = vld [vmem:[%s6124_s1 + $0x2a0] sm:$0xf]  ;;  %v3805_v32 = vld [vmem:[%s6124_s1 + $0x2a4] sm:$0xf0] }
  0x4d   : > { %6252 = vst [vmem:[#allocation21_spill] sm:$0xff] %v4535_v58  ;;  %1777 = vmatpush.bf16.msrb.mxu0 %v3480_v11  ;;  %v3544_v39 = vor.u32 %v3805_v32, %v3543_v31  ;;  %v402_v40 = vld [vmem:[%s4242_s13 + $0x480] sm:$0xff]  ;;  %v403_v42 = vld [vmem:[%s4242_s13 + $0x488] sm:$0xff] }
  0x4e   : > { %6253 = vst [vmem:[#allocation22_spill] sm:$0xff] %v4538_v61  ;;  %2044 = vmatpush.bf16.msrb.mxu3 %v3672_v12  ;;  %v410_v41 = vld [vmem:[%s4242_s13 + $0x4c0] sm:$0xff] }
  0x4f   : > { %1434 = vmatmul.bf16.gmra.mxu0 %v4334_v25  ;;  %1866 = vmatpush.bf16.msrb.mxu1 %v3544_v39  ;;  %v4579_v5 = vpack.c.bf16 %v410_v41, %v402_v40 }
  0x50   : > { %1523 = vmatmul.bf16.gmra.mxu1 %v4336_v26 }
  0x51   : > { %1612 = vmatmul.bf16.gmra.mxu2 %v4338_v27  ;;  %6254 = vst [vmem:[#allocation23_spill] sm:$0xff] %v4579_v5 }
  0x52   : > { %1701 = vmatmul.bf16.gmra.mxu3 %v4340_v28 }
  0x5f   : > { %1439 = vmatmul.bf16.gmra.mxu0 %v4378_v50 }
  0x60   : > { %1528 = vmatmul.bf16.gmra.mxu1 %v4380_v51 }
  0x61   : > { %1617 = vmatmul.bf16.gmra.mxu2 %v4382_v55 }
  0x62   : > { %1706 = vmatmul.bf16.gmra.mxu3 %v4384_v56 }
  0x6f   : > { %1444 = vmatmul.bf16.gmra.mxu0 %v4398_v1 }
  0x70   : > { %1533 = vmatmul.bf16.gmra.mxu1 %v4400_v2 }
  0x71   : > { %1622 = vmatmul.bf16.gmra.mxu2 %v4402_v3 }
  0x72   : > { %1711 = vmatmul.bf16.gmra.mxu3 %v4404_v4 }
  0x7f   : > { %1449 = vmatmul.bf16.gmra.mxu0 %v4442_v33 }
  0x80   : > { %1538 = vmatmul.bf16.gmra.mxu1 %v4444_v34 }
  0x81   : > { %1627 = vmatmul.bf16.gmra.mxu2 %v4446_v35 }
  0x82   : > { %1716 = vmatmul.bf16.gmra.mxu3 %v4448_v36 }
  0x8f   : > { %1454 = vmatmul.bf16.gmra.mxu0 %v4462_v45 }
  0x90   : > { %1543 = vmatmul.bf16.gmra.mxu1 %v4464_v46 }
  0x91   : > { %1632 = vmatmul.bf16.gmra.mxu2 %v4466_v48 }
  0x92   : > { %1721 = vmatmul.bf16.gmra.mxu3 %v4468_v49 }
  0x9f   : > { %1459 = vmatmul.bf16.gmra.mxu0 %v4506_v21 }
  0xa0   : > { %1548 = vmatmul.bf16.gmra.mxu1 %v4508_v22 }
  0xa1   : > { %1637 = vmatmul.bf16.gmra.mxu2 %v4510_v23 }
  0xa2   : > { %1726 = vmatmul.bf16.gmra.mxu3 %v4512_v24 }
  0xac   : > { %v1425_v44 = vpop.f32.mrf.mxu0 }
  0xad   : > { %v1426_v59 = vadd.f32 %v1425_v44, %v4524_v37  ;;  %v1514_v60 = vpop.f32.mrf.mxu1  ;;  %v411_v44 = vld [vmem:[%s4242_s13 + $0x4c8] sm:$0xff] }
  0xae   : > { %v4581_v9 = vpack.c.bf16 %v411_v44, %v403_v42  ;;  %v418_v42 = vld [vmem:[%s4242_s13 + $0x500] sm:$0xff] }
  0xaf   : > { %v1515_v62 = vadd.f32 %v1514_v60, %v1426_v59  ;;  %1464 = vmatmul.bf16.gmra.mxu0 %v4531_v43  ;;  %v404_v59 = vld [vmem:[%s4242_s13 + $0x490] sm:$0xff]  ;;  %v426_v44 = vld [vmem:[%s4242_s13 + $0x540] sm:$0xff] }
  0xb0   : > { %1553 = vmatmul.bf16.gmra.mxu1 %v4533_v57  ;;  %v412_v60 = vld [vmem:[%s4242_s13 + $0x4d0] sm:$0xff]  ;;  %6255 = vst [vmem:[#allocation24_spill] sm:$0xff] %v4581_v9 }
  0xb1   : > { %1642 = vmatmul.bf16.gmra.mxu2 %v4535_v58 }
  0xb2   : > { %1731 = vmatmul.bf16.gmra.mxu3 %v4538_v61 }
  0xb4   : > { %v1603_v10 = vpop.f32.mrf.mxu2  ;;  %v1427_v19 = vpop.f32.mrf.mxu0 }
  0xb5   : > { %v1604_v17 = vadd.f32 %v1603_v10, %v1515_v62  ;;  %v1692_v18 = vpop.f32.mrf.mxu3  ;;  %v1428_v20 = vadd.f32 %v1427_v19, %v4524_v37  ;;  %v1516_v29 = vpop.f32.mrf.mxu1  ;;  %v405_v62 = vld [vmem:[%s4242_s13 + $0x498] sm:$0xff]  ;;  %v4583_v10 = vpack.c.bf16 %v412_v60, %v404_v59  ;;  %v419_v59 = vld [vmem:[%s4242_s13 + $0x508] sm:$0xff] }
  0xb6   : > { %v427_v60 = vld [vmem:[%s4242_s13 + $0x548] sm:$0xff] }
  0xb7   : > { %v4563_v30 = vadd.f32 %v1692_v18, %v1604_v17  ;;  %v1517_v38 = vadd.f32 %v1516_v29, %v1428_v20  ;;  %6256 = vst [vmem:[#allocation25_spill] sm:$0xff] %v4583_v10  ;;  %v4586_v17 = vpack.c.bf16 %v413_v63, %v405_v62  ;;  %v420_v62 = vld [vmem:[%s4242_s13 + $0x510] sm:$0xff] }
  0xb8   : > { %v428_v63 = vld [vmem:[%s4242_s13 + $0x550] sm:$0xff] }
  0xb9   : > { %6257 = vst [vmem:[#allocation26_spill] sm:$0xff] %v4586_v17 }
  0xbc   : > { %v1605_v0 = vpop.f32.mrf.mxu2  ;;  %v1430_v8 = vpop.f32.mrf.mxu0 }
  0xbd   : > { %v1606_v6 = vadd.f32 %v1605_v0, %v1517_v38  ;;  %v1694_v7 = vpop.f32.mrf.mxu3  ;;  %v1431_v11 = vadd.f32 %v1430_v8, %v4524_v37  ;;  %v1519_v12 = vpop.f32.mrf.mxu1  ;;  %v421_v0 = vld [vmem:[%s4242_s13 + $0x518] sm:$0xff]  ;;  %v4605_v8 = vpack.c.bf16 %v426_v44, %v418_v42  ;;  %v3471_v44 = vld [vmem:[%s6124_s1 + $0x210] sm:$0xf] }
  0xbe   : > { %v3819_v42 = vld [vmem:[%s6124_s1 + $0x314] sm:$0xf0] }
  0xbf   : > { %v4588_v18 = vadd.f32 %v1694_v7, %v1606_v6  ;;  %v1520_v19 = vadd.f32 %v1519_v12, %v1431_v11  ;;  %1469 = vmatmul.bf16.gmra.mxu0 %v4579_v5  ;;  %v429_v6 = vld [vmem:[%s4242_s13 + $0x558] sm:$0xff]  ;;  %6258 = vst [vmem:[#allocation27_spill] sm:$0xff] %v4605_v8 }
  0xc0   : > { %1558 = vmatmul.bf16.gmra.mxu1 %v4581_v9 }
  0xc1   : > { %1647 = vmatmul.bf16.gmra.mxu2 %v4583_v10 }
  0xc2   : > { %1736 = vmatmul.bf16.gmra.mxu3 %v4586_v17 }
  0xc4   : > { %v1608_v20 = vpop.f32.mrf.mxu2  ;;  %v1432_v32 = vpop.f32.mrf.mxu0 }
  0xc5   : > { %v1609_v29 = vadd.f32 %v1608_v20, %v1520_v19  ;;  %v1697_v31 = vpop.f32.mrf.mxu3  ;;  %v1433_v38 = vadd.f32 %v1432_v32, %v4524_v37  ;;  %v1521_v39 = vpop.f32.mrf.mxu1  ;;  %v4607_v20 = vpack.c.bf16 %v427_v60, %v419_v59  ;;  %v4609_v32 = vpack.c.bf16 %v428_v63, %v420_v62  ;;  %v3787_v60 = vld [vmem:[%s6124_s1 + $0x214] sm:$0xf0]  ;;  %v3663_v62 = vld [vmem:[%s6124_s1 + $0x390] sm:$0xf] }
  0xc6   : > { %v3835_v63 = vld [vmem:[%s6124_s1 + $0x394] sm:$0xf0] }
  0xc7   : > { %v4595_v40 = vadd.f32 %v1697_v31, %v1609_v29  ;;  %v1522_v41 = vadd.f32 %v1521_v39, %v1433_v38  ;;  %6259 = vst [vmem:[#allocation28_spill] sm:$0xff] %v4607_v20  ;;  %v4612_v38 = vpack.c.bf16 %v429_v6, %v421_v0  ;;  %v3472_v6 = vor.u32 %v3787_v60, %v3471_v44 }
  0xc8   : > { %6260 = vst [vmem:[#allocation29_spill] sm:$0xff] %v4609_v32 }
  0xc9   : > { %6261 = vst [vmem:[#allocation30_spill] sm:$0xff] %v4612_v38  ;;  %1778 = vmatpush.bf16.msrb.mxu0 %v3472_v6  ;;  %v437_v6 = vld [vmem:[%s4242_s13 + $0x598] sm:$0xff] }
  0xcc   : > { %v1610_v7 = vpop.f32.mrf.mxu2  ;;  %v1435_v19 = vpop.f32.mrf.mxu0 }
  0xcd   : > { %v1611_v11 = vadd.f32 %v1610_v7, %v1522_v41  ;;  %v1699_v12 = vpop.f32.mrf.mxu3  ;;  %v1436_v29 = vadd.f32 %v1435_v19, %v4524_v37  ;;  %v1524_v31 = vpop.f32.mrf.mxu1  ;;  %v3599_v41 = vld [vmem:[%s6124_s1 + $0x310] sm:$0xf]  ;;  %v3664_v7 = vor.u32 %v3835_v63, %v3663_v62  ;;  %v442_v62 = vld [vmem:[%s4242_s13 + $0x5c0] sm:$0xff]  ;;  %v435_v63 = vld [vmem:[%s4242_s13 + $0x588] sm:$0xff] }
  0xce   : > { %v3600_v59 = vor.u32 %v3819_v42, %v3599_v41  ;;  %v3535_v42 = vld [vmem:[%s6124_s1 + $0x290] sm:$0xf] }
  0xcf   : > { %v4614_v39 = vadd.f32 %v1699_v12, %v1611_v11  ;;  %v1525_v17 = vadd.f32 %v1524_v31, %v1436_v29  ;;  %1474 = vmatmul.bf16.gmra.mxu0 %v4605_v8  ;;  %2045 = vmatpush.bf16.msrb.mxu3 %v3664_v7  ;;  %v445_v7 = vld [vmem:[%s4242_s13 + $0x5d8] sm:$0xff] }
  0xd0   : > { %1563 = vmatmul.bf16.gmra.mxu1 %v4607_v20  ;;  %1956 = vmatpush.bf16.msrb.mxu2 %v3600_v59  ;;  %v434_v59 = vld [vmem:[%s4242_s13 + $0x580] sm:$0xff] }
  0xd1   : > { %1652 = vmatmul.bf16.gmra.mxu2 %v4609_v32 }
  0xd2   : > { %1741 = vmatmul.bf16.gmra.mxu3 %v4612_v38  ;;  %v444_v38 = vld [vmem:[%s4242_s13 + $0x5d0] sm:$0xff] }
  0xd4   : > { %v1613_v0 = vpop.f32.mrf.mxu2  ;;  %v1437_v19 = vpop.f32.mrf.mxu0 }
  0xd5   : > { %v1614_v11 = vadd.f32 %v1613_v0, %v1525_v17  ;;  %v1702_v12 = vpop.f32.mrf.mxu3  ;;  %v1438_v29 = vadd.f32 %v1437_v19, %v4524_v37  ;;  %v1526_v31 = vpop.f32.mrf.mxu1  ;;  %v3803_v17 = vld [vmem:[%s6124_s1 + $0x294] sm:$0xf0]  ;;  %v443_v0 = vld [vmem:[%s4242_s13 + $0x5c8] sm:$0xff]  ;;  %v436_v19 = vld [vmem:[%s4242_s13 + $0x590] sm:$0xff] }
  0xd6   : > { %v3536_v60 = vor.u32 %v3803_v17, %v3535_v42  ;;  %v4657_v10 = vpack.c.bf16 %v443_v0, %v435_v63  ;;  %v4659_v9 = vpack.c.bf16 %v444_v38, %v436_v19  ;;  %v4662_v42 = vpack.c.bf16 %v445_v7, %v437_v6  ;;  %v450_v0 = vld [vmem:[%s4242_s13 + $0x600] sm:$0xff]  ;;  %v451_v6 = vld [vmem:[%s4242_s13 + $0x608] sm:$0xff] }
  0xd7   : > { %v4639_v41 = vadd.f32 %v1702_v12, %v1614_v11  ;;  %v1527_v44 = vadd.f32 %v1526_v31, %v1438_v29  ;;  %v4655_v12 = vpack.c.bf16 %v442_v62, %v434_v59  ;;  %v458_v19 = vld [vmem:[%s4242_s13 + $0x640] sm:$0xff]  ;;  %v459_v7 = vld [vmem:[%s4242_s13 + $0x648] sm:$0xff] }
  0xd8   : > { %1867 = vmatpush.bf16.msrb.mxu1 %v3536_v60  ;;  %6263 = vst [vmem:[#allocation32_spill] sm:$0xff] %v4657_v10  ;;  %v4683_v5 = vpack.c.bf16 %v459_v7, %v451_v6  ;;  %v3833_v6 = vld [vmem:[%s6124_s1 + $0x384] sm:$0xf0] }
  0xd9   : > { %6262 = vst [vmem:[#allocation31_spill] sm:$0xff] %v4655_v12 }
  0xda   : > { %6264 = vst [vmem:[#allocation33_spill] sm:$0xff] %v4659_v9 }
  0xdb   : > { %6265 = vst [vmem:[#allocation34_spill] sm:$0xff] %v4662_v42 }
  0xdc   : > { %v1615_v11 = vpop.f32.mrf.mxu2  ;;  %v1440_v8 = vpop.f32.mrf.mxu0  ;;  %6267 = vst [vmem:[#allocation36_spill] sm:$0xff] %v4683_v5 }
  0xdd   : > { %v1616_v32 = vadd.f32 %v1615_v11, %v1527_v44  ;;  %v1704_v20 = vpop.f32.mrf.mxu3  ;;  %v1441_v29 = vadd.f32 %v1440_v8, %v4524_v37  ;;  %v1529_v31 = vpop.f32.mrf.mxu1  ;;  %v452_v11 = vld [vmem:[%s4242_s13 + $0x610] sm:$0xff] }
  0xdf   : > { %v4664_v17 = vadd.f32 %v1704_v20, %v1616_v32  ;;  %v1530_v60 = vadd.f32 %v1529_v31, %v1441_v29  ;;  %1479 = vmatmul.bf16.gmra.mxu0 %v4655_v12  ;;  %v460_v29 = vld [vmem:[%s4242_s13 + $0x650] sm:$0xff]  ;;  %v453_v31 = vld [vmem:[%s4242_s13 + $0x618] sm:$0xff] }
  0xe0   : > { %1568 = vmatmul.bf16.gmra.mxu1 %v4657_v10  ;;  %v4681_v10 = vpack.c.bf16 %v458_v19, %v450_v0  ;;  %v3785_v0 = vld [vmem:[%s6124_s1 + $0x204] sm:$0xf0]  ;;  %v3655_v19 = vld [vmem:[%s6124_s1 + $0x380] sm:$0xf] }
  0xe1   : > { %1657 = vmatmul.bf16.gmra.mxu2 %v4659_v9  ;;  %v461_v9 = vld [vmem:[%s4242_s13 + $0x658] sm:$0xff] }
  0xe2   : > { %1746 = vmatmul.bf16.gmra.mxu3 %v4662_v42  ;;  %6266 = vst [vmem:[#allocation35_spill] sm:$0xff] %v4681_v10 }
  0xe4   : > { %v1618_v8 = vpop.f32.mrf.mxu2  ;;  %v1442_v20 = vpop.f32.mrf.mxu0 }
  0xe5   : > { %v1619_v38 = vadd.f32 %v1618_v8, %v1530_v60  ;;  %v1707_v44 = vpop.f32.mrf.mxu3  ;;  %v1443_v32 = vadd.f32 %v1442_v20, %v4524_v37  ;;  %v1531_v59 = vpop.f32.mrf.mxu1  ;;  %v4685_v20 = vpack.c.bf16 %v460_v29, %v452_v11  ;;  %v3656_v29 = vor.u32 %v3833_v6, %v3655_v19  ;;  %v474_v19 = vld [vmem:[%s4242_s13 + $0x6c0] sm:$0xff]  ;;  %v467_v6 = vld [vmem:[%s4242_s13 + $0x688] sm:$0xff] }
  0xe7   : > { %v4671_v62 = vadd.f32 %v1707_v44, %v1619_v38  ;;  %v1532_v63 = vadd.f32 %v1531_v59, %v1443_v32  ;;  %6268 = vst [vmem:[#allocation37_spill] sm:$0xff] %v4685_v20  ;;  %v4688_v32 = vpack.c.bf16 %v461_v9, %v453_v31  ;;  %v3817_v9 = vld [vmem:[%s6124_s1 + $0x304] sm:$0xf0]  ;;  %2046 = vmatpush.bf16.msrb.mxu3 %v3656_v29  ;;  %v477_v29 = vld [vmem:[%s4242_s13 + $0x6d8] sm:$0xff] }
  0xe9   : > { %6269 = vst [vmem:[#allocation38_spill] sm:$0xff] %v4688_v32 }
  0xec   : > { %v1620_v42 = vpop.f32.mrf.mxu2  ;;  %v1445_v12 = vpop.f32.mrf.mxu0 }
  0xed   : > { %v1621_v60 = vadd.f32 %v1620_v42, %v1532_v63  ;;  %v1709_v8 = vpop.f32.mrf.mxu3  ;;  %v1446_v38 = vadd.f32 %v1445_v12, %v4524_v37  ;;  %v1534_v44 = vpop.f32.mrf.mxu1  ;;  %v3591_v42 = vld [vmem:[%s6124_s1 + $0x300] sm:$0xf] }
  0xee   : > { %v3463_v12 = vld [vmem:[%s6124_s1 + $0x200] sm:$0xf]  ;;  %v3592_v63 = vor.u32 %v3817_v9, %v3591_v42 }
  0xef   : > { %v4690_v59 = vadd.f32 %v1709_v8, %v1621_v60  ;;  %v1535_v61 = vadd.f32 %v1534_v44, %v1446_v38  ;;  %1484 = vmatmul.bf16.gmra.mxu0 %v4681_v10  ;;  %v3464_v11 = vor.u32 %v3785_v0, %v3463_v12  ;;  %v3527_v9 = vld [vmem:[%s6124_s1 + $0x280] sm:$0xf] }
  0xf0   : > { %1573 = vmatmul.bf16.gmra.mxu1 %v4683_v5  ;;  %1957 = vmatpush.bf16.msrb.mxu2 %v3592_v63  ;;  %v466_v63 = vld [vmem:[%s4242_s13 + $0x680] sm:$0xff] }
  0xf1   : > { %1662 = vmatmul.bf16.gmra.mxu2 %v4685_v20  ;;  %1779 = vmatpush.bf16.msrb.mxu0 %v3464_v11  ;;  %v469_v11 = vld [vmem:[%s4242_s13 + $0x698] sm:$0xff] }
  0xf2   : > { %1751 = vmatmul.bf16.gmra.mxu3 %v4688_v32  ;;  %v476_v32 = vld [vmem:[%s4242_s13 + $0x6d0] sm:$0xff] }
  0xf4   : > { %v1623_v7 = vpop.f32.mrf.mxu2  ;;  %v1447_v8 = vpop.f32.mrf.mxu0 }
  0xf5   : > { %v1624_v31 = vadd.f32 %v1623_v7, %v1535_v61  ;;  %v1712_v60 = vpop.f32.mrf.mxu3  ;;  %v1448_v38 = vadd.f32 %v1447_v8, %v4524_v37  ;;  %v1536_v44 = vpop.f32.mrf.mxu1  ;;  %v3801_v61 = vld [vmem:[%s6124_s1 + $0x284] sm:$0xf0]  ;;  %v468_v8 = vld [vmem:[%s4242_s13 + $0x690] sm:$0xff] }
  0xf6   : > { %v3528_v0 = vor.u32 %v3801_v61, %v3527_v9  ;;  %v475_v7 = vld [vmem:[%s4242_s13 + $0x6c8] sm:$0xff]  ;;  %v4735_v57 = vpack.c.bf16 %v476_v32, %v468_v8  ;;  %v4738_v9 = vpack.c.bf16 %v477_v29, %v469_v11  ;;  %v490_v8 = vld [vmem:[%s4242_s13 + $0x740] sm:$0xff] }
  0xf7   : > { %v4715_v42 = vadd.f32 %v1712_v60, %v1624_v31  ;;  %v1537_v12 = vadd.f32 %v1536_v44, %v1448_v38  ;;  %v4731_v60 = vpack.c.bf16 %v474_v19, %v466_v63  ;;  %v4733_v58 = vpack.c.bf16 %v475_v7, %v467_v6  ;;  %v482_v7 = vld [vmem:[%s4242_s13 + $0x700] sm:$0xff]  ;;  %v483_v11 = vld [vmem:[%s4242_s13 + $0x708] sm:$0xff] }
  0xf8   : > { %1868 = vmatpush.bf16.msrb.mxu1 %v3528_v0  ;;  %6272 = vst [vmem:[#allocation41_spill] sm:$0xff] %v4735_v57  ;;  %v491_v29 = vld [vmem:[%s4242_s13 + $0x748] sm:$0xff] }
  0xf9   : > { %6270 = vst [vmem:[#allocation39_spill] sm:$0xff] %v4731_v60  ;;  %v4759_v43 = vpack.c.bf16 %v491_v29, %v483_v11  ;;  %v3457_v11 = vld [vmem:[%s6124_s1 + $0x1f8] sm:$0xf0] }
  0xfa   : > { %6271 = vst [vmem:[#allocation40_spill] sm:$0xff] %v4733_v58 }
  0xfb   : > { %6273 = vst [vmem:[#allocation42_spill] sm:$0xff] %v4738_v9 }
  0xfc   : > { %v1625_v31 = vpop.f32.mrf.mxu2  ;;  %v1450_v10 = vpop.f32.mrf.mxu0  ;;  %6275 = vst [vmem:[#allocation44_spill] sm:$0xff] %v4759_v43 }
  0xfd   : > { %v1626_v20 = vadd.f32 %v1625_v31, %v1537_v12  ;;  %v1714_v5 = vpop.f32.mrf.mxu3  ;;  %v1451_v38 = vadd.f32 %v1450_v10, %v4524_v37  ;;  %v1539_v44 = vpop.f32.mrf.mxu1  ;;  %v484_v31 = vld [vmem:[%s4242_s13 + $0x710] sm:$0xff] }
  0xff   : > { %v4740_v61 = vadd.f32 %v1714_v5, %v1626_v20  ;;  %v1540_v0 = vadd.f32 %v1539_v44, %v1451_v38  ;;  %1489 = vmatmul.bf16.gmra.mxu0 %v4731_v60  ;;  %v492_v38 = vld [vmem:[%s4242_s13 + $0x750] sm:$0xff]  ;;  %v485_v44 = vld [vmem:[%s4242_s13 + $0x718] sm:$0xff] }
 0x100   : > { %1578 = vmatmul.bf16.gmra.mxu1 %v4733_v58  ;;  %v4757_v58 = vpack.c.bf16 %v490_v8, %v482_v7  ;;  %v3265_v7 = vld [vmem:[%s6124_s1 + $0x78] sm:$0xf0]  ;;  %v3782_v8 = vld [vmem:[%s6124_s1 + $0x1f4] sm:$0xf] }
 0x101   : > { %1667 = vmatmul.bf16.gmra.mxu2 %v4735_v57  ;;  %v493_v57 = vld [vmem:[%s4242_s13 + $0x758] sm:$0xff] }
 0x102   : > { %1756 = vmatmul.bf16.gmra.mxu3 %v4738_v9  ;;  %6274 = vst [vmem:[#allocation43_spill] sm:$0xff] %v4757_v58 }
 0x104   : > { %v1628_v10 = vpop.f32.mrf.mxu2  ;;  %v1452_v5 = vpop.f32.mrf.mxu0 }
 0x105   : > { %v1629_v32 = vadd.f32 %v1628_v10, %v1540_v0  ;;  %v1717_v12 = vpop.f32.mrf.mxu3  ;;  %v1453_v20 = vadd.f32 %v1452_v5, %v4524_v37  ;;  %v1541_v63 = vpop.f32.mrf.mxu1  ;;  %v4761_v5 = vpack.c.bf16 %v492_v38, %v484_v31  ;;  %v3460_v38 = vor.u32 %v3782_v8, %v3457_v11  ;;  %v506_v8 = vld [vmem:[%s4242_s13 + $0x7c0] sm:$0xff]  ;;  %v499_v11 = vld [vmem:[%s4242_s13 + $0x788] sm:$0xff] }
 0x107   : > { %v4747_v19 = vadd.f32 %v1717_v12, %v1629_v32  ;;  %v1542_v6 = vadd.f32 %v1541_v63, %v1453_v20  ;;  %6276 = vst [vmem:[#allocation45_spill] sm:$0xff] %v4761_v5  ;;  %v4764_v20 = vpack.c.bf16 %v493_v57, %v485_v44  ;;  %v3393_v57 = vld [vmem:[%s6124_s1 + $0x178] sm:$0xf0]  ;;  %2395 = vmatpush.bf16.msra.mxu3 %v3460_v38 }
 0x108   : > { %v509_v38 = vld [vmem:[%s4242_s13 + $0x7d8] sm:$0xff] }
 0x109   : > { %6277 = vst [vmem:[#allocation46_spill] sm:$0xff] %v4764_v20 }
 0x10c   : > { %v1630_v9 = vpop.f32.mrf.mxu2  ;;  %v1455_v60 = vpop.f32.mrf.mxu0 }
 0x10d   : > { %v1631_v0 = vadd.f32 %v1630_v9, %v1542_v6  ;;  %v1719_v10 = vpop.f32.mrf.mxu3  ;;  %v1456_v32 = vadd.f32 %v1455_v60, %v4524_v37  ;;  %v1544_v12 = vpop.f32.mrf.mxu1  ;;  %v3766_v9 = vld [vmem:[%s6124_s1 + $0x174] sm:$0xf] }
 0x10e   : > { %v3734_v60 = vld [vmem:[%s6124_s1 + $0x74] sm:$0xf]  ;;  %v3396_v6 = vor.u32 %v3766_v9, %v3393_v57 }
 0x10f   : > { %v4766_v63 = vadd.f32 %v1719_v10, %v1631_v0  ;;  %v1545_v24 = vadd.f32 %v1544_v12, %v1456_v32  ;;  %1494 = vmatmul.bf16.gmra.mxu0 %v4757_v58  ;;  %v3268_v31 = vor.u32 %v3734_v60, %v3265_v7  ;;  %v3750_v57 = vld [vmem:[%s6124_s1 + $0xf4] sm:$0xf] }
 0x110   : > { %1583 = vmatmul.bf16.gmra.mxu1 %v4759_v43  ;;  %2306 = vmatpush.bf16.msra.mxu2 %v3396_v6  ;;  %v498_v6 = vld [vmem:[%s4242_s13 + $0x780] sm:$0xff] }
 0x111   : > { %1672 = vmatmul.bf16.gmra.mxu2 %v4761_v5  ;;  %2128 = vmatpush.bf16.msra.mxu0 %v3268_v31  ;;  %v501_v31 = vld [vmem:[%s4242_s13 + $0x798] sm:$0xff] }
 0x112   : > { %1761 = vmatmul.bf16.gmra.mxu3 %v4764_v20  ;;  %v508_v20 = vld [vmem:[%s4242_s13 + $0x7d0] sm:$0xff] }
 0x114   : > { %v1633_v29 = vpop.f32.mrf.mxu2  ;;  %v1457_v10 = vpop.f32.mrf.mxu0 }
 0x115   : > { %v1634_v44 = vadd.f32 %v1633_v29, %v1545_v24  ;;  %v1722_v0 = vpop.f32.mrf.mxu3  ;;  %v1458_v32 = vadd.f32 %v1457_v10, %v4524_v37  ;;  %v1546_v12 = vpop.f32.mrf.mxu1  ;;  %v3329_v24 = vld [vmem:[%s6124_s1 + $0xf8] sm:$0xf0]  ;;  %v507_v29 = vld [vmem:[%s4242_s13 + $0x7c8] sm:$0xff]  ;;  %v500_v10 = vld [vmem:[%s4242_s13 + $0x790] sm:$0xff] }
 0x116   : > { %v3332_v7 = vor.u32 %v3750_v57, %v3329_v24  ;;  %v4809_v23 = vpack.c.bf16 %v507_v29, %v499_v11  ;;  %v4811_v22 = vpack.c.bf16 %v508_v20, %v500_v10  ;;  %v4814_v57 = vpack.c.bf16 %v509_v38, %v501_v31  ;;  %v262_v29 = vld [vmem:[%s4242_s13 + $0x20] sm:$0xff]  ;;  %v263_v31 = vld [vmem:[%s4242_s13 + $0x28] sm:$0xff] }
 0x117   : > { %v4791_v9 = vadd.f32 %v1722_v0, %v1634_v44  ;;  %v1547_v60 = vadd.f32 %v1546_v12, %v1458_v32  ;;  %v4807_v0 = vpack.c.bf16 %v506_v8, %v498_v6  ;;  %v270_v10 = vld [vmem:[%s4242_s13 + $0x60] sm:$0xff]  ;;  %v271_v38 = vld [vmem:[%s4242_s13 + $0x68] sm:$0xff] }
 0x118   : > { %2217 = vmatpush.bf16.msra.mxu1 %v3332_v7  ;;  %6279 = vst [vmem:[#allocation48_spill] sm:$0xff] %v4809_v23  ;;  %v4835_v21 = vpack.c.bf16 %v271_v38, %v263_v31  ;;  %v3449_v31 = vld [vmem:[%s6124_s1 + $0x1e8] sm:$0xf0] }
 0x119   : > { %6278 = vst [vmem:[#allocation47_spill] sm:$0xff] %v4807_v0 }
 0x11a   : > { %6280 = vst [vmem:[#allocation49_spill] sm:$0xff] %v4811_v22 }
 0x11b   : > { %6281 = vst [vmem:[#allocation50_spill] sm:$0xff] %v4814_v57 }
 0x11c   : > { %v1635_v44 = vpop.f32.mrf.mxu2  ;;  %v1460_v58 = vpop.f32.mrf.mxu0  ;;  %6283 = vst [vmem:[#allocation52_spill] sm:$0xff] %v4835_v21 }
 0x11d   : > { %v1636_v5 = vadd.f32 %v1635_v44, %v1547_v60  ;;  %v1724_v43 = vpop.f32.mrf.mxu3  ;;  %v1461_v32 = vadd.f32 %v1460_v58, %v4524_v37  ;;  %v1549_v12 = vpop.f32.mrf.mxu1  ;;  %v264_v44 = vld [vmem:[%s4242_s13 + $0x30] sm:$0xff] }
 0x11f   : > { %v4816_v24 = vadd.f32 %v1724_v43, %v1636_v5  ;;  %v1550_v7 = vadd.f32 %v1549_v12, %v1461_v32  ;;  %1499 = vmatmul.bf16.gmra.mxu0 %v4807_v0  ;;  %v272_v32 = vld [vmem:[%s4242_s13 + $0x70] sm:$0xff]  ;;  %v265_v12 = vld [vmem:[%s4242_s13 + $0x38] sm:$0xff] }
 0x120   : > { %1588 = vmatmul.bf16.gmra.mxu1 %v4809_v23  ;;  %v4833_v23 = vpack.c.bf16 %v270_v10, %v262_v29  ;;  %v3257_v29 = vld [vmem:[%s6124_s1 + $0x68] sm:$0xf0]  ;;  %v3780_v10 = vld [vmem:[%s6124_s1 + $0x1e4] sm:$0xf] }
 0x121   : > { %1677 = vmatmul.bf16.gmra.mxu2 %v4811_v22  ;;  %v273_v22 = vld [vmem:[%s4242_s13 + $0x78] sm:$0xff] }
 0x122   : > { %1766 = vmatmul.bf16.gmra.mxu3 %v4814_v57  ;;  %6282 = vst [vmem:[#allocation51_spill] sm:$0xff] %v4833_v23 }
 0x124   : > { %v1638_v58 = vpop.f32.mrf.mxu2  ;;  %v1462_v43 = vpop.f32.mrf.mxu0 }
 0x125   : > { %v1639_v20 = vadd.f32 %v1638_v58, %v1550_v7  ;;  %v1727_v60 = vpop.f32.mrf.mxu3  ;;  %v1463_v5 = vadd.f32 %v1462_v43, %v4524_v37  ;;  %v1551_v6 = vpop.f32.mrf.mxu1  ;;  %v4837_v43 = vpack.c.bf16 %v272_v32, %v264_v44  ;;  %v3452_v32 = vor.u32 %v3780_v10, %v3449_v31  ;;  %v286_v10 = vld [vmem:[%s4242_s13 + $0xe0] sm:$0xff]  ;;  %v279_v31 = vld [vmem:[%s4242_s13 + $0xa8] sm:$0xff] }
 0x127   : > { %v4823_v8 = vadd.f32 %v1727_v60, %v1639_v20  ;;  %v1552_v11 = vadd.f32 %v1551_v6, %v1463_v5  ;;  %6284 = vst [vmem:[#allocation53_spill] sm:$0xff] %v4837_v43  ;;  %v4840_v5 = vpack.c.bf16 %v273_v22, %v265_v12  ;;  %v3385_v22 = vld [vmem:[%s6124_s1 + $0x168] sm:$0xf0]  ;;  %2396 = vmatpush.bf16.msra.mxu3 %v3452_v32  ;;  %v289_v32 = vld [vmem:[%s4242_s13 + $0xf8] sm:$0xff] }
 0x129   : > { %6285 = vst [vmem:[#allocation54_spill] sm:$0xff] %v4840_v5 }
 0x12c   : > { %v1640_v57 = vpop.f32.mrf.mxu2  ;;  %v1465_v0 = vpop.f32.mrf.mxu0 }
 0x12d   : > { %v1641_v7 = vadd.f32 %v1640_v57, %v1552_v11  ;;  %v1729_v58 = vpop.f32.mrf.mxu3  ;;  %v1466_v20 = vadd.f32 %v1465_v0, %v4524_v37  ;;  %v1554_v60 = vpop.f32.mrf.mxu1  ;;  %v3764_v57 = vld [vmem:[%s6124_s1 + $0x164] sm:$0xf] }
 0x12e   : > { %v3732_v0 = vld [vmem:[%s6124_s1 + $0x64] sm:$0xf]  ;;  %v3388_v11 = vor.u32 %v3764_v57, %v3385_v22 }
 0x12f   : > { %v4842_v6 = vadd.f32 %v1729_v58, %v1641_v7  ;;  %v1555_v49 = vadd.f32 %v1554_v60, %v1466_v20  ;;  %1780 = vmatmul.bf16.vlgmr.msrb.gmra.mxu0 %v4833_v23  ;;  %v3260_v44 = vor.u32 %v3732_v0, %v3257_v29  ;;  %v3748_v22 = vld [vmem:[%s6124_s1 + $0xe4] sm:$0xf] }
 0x130   : > { %1869 = vmatmul.bf16.vlgmr.msrb.gmra.mxu1 %v4835_v21  ;;  %2307 = vmatpush.bf16.msra.mxu2 %v3388_v11  ;;  %v278_v11 = vld [vmem:[%s4242_s13 + $0xa0] sm:$0xff] }
 0x131   : > { %1958 = vmatmul.bf16.vlgmr.msrb.gmra.mxu2 %v4837_v43  ;;  %2129 = vmatpush.bf16.msra.mxu0 %v3260_v44  ;;  %v281_v44 = vld [vmem:[%s4242_s13 + $0xb8] sm:$0xff] }
 0x132   : > { %2047 = vmatmul.bf16.vlgmr.msrb.gmra.mxu3 %v4840_v5  ;;  %v288_v5 = vld [vmem:[%s4242_s13 + $0xf0] sm:$0xff] }
 0x134   : > { %v1643_v38 = vpop.f32.mrf.mxu2  ;;  %v1467_v58 = vpop.f32.mrf.mxu0 }
 0x135   : > { %v1644_v12 = vadd.f32 %v1643_v38, %v1555_v49  ;;  %v1732_v7 = vpop.f32.mrf.mxu3  ;;  %v1468_v20 = vadd.f32 %v1467_v58, %v4524_v37  ;;  %v1556_v60 = vpop.f32.mrf.mxu1  ;;  %v3321_v49 = vld [vmem:[%s6124_s1 + $0xe8] sm:$0xf0]  ;;  %v280_v58 = vld [vmem:[%s4242_s13 + $0xb0] sm:$0xff] }
 0x136   : > { %v3324_v29 = vor.u32 %v3748_v22, %v3321_v49  ;;  %v287_v38 = vld [vmem:[%s4242_s13 + $0xe8] sm:$0xff]  ;;  %v4887_v46 = vpack.c.bf16 %v288_v5, %v280_v58  ;;  %v4890_v22 = vpack.c.bf16 %v289_v32, %v281_v44  ;;  %v302_v58 = vld [vmem:[%s4242_s13 + $0x160] sm:$0xff] }
 0x137   : > { %v4867_v57 = vadd.f32 %v1732_v7, %v1644_v12  ;;  %v1557_v0 = vadd.f32 %v1556_v60, %v1468_v20  ;;  %v4883_v7 = vpack.c.bf16 %v286_v10, %v278_v11  ;;  %v4885_v48 = vpack.c.bf16 %v287_v38, %v279_v31  ;;  %v294_v38 = vld [vmem:[%s4242_s13 + $0x120] sm:$0xff]  ;;  %v295_v44 = vld [vmem:[%s4242_s13 + $0x128] sm:$0xff] }
 0x138   : > { %2218 = vmatpush.bf16.msra.mxu1 %v3324_v29  ;;  %6288 = vst [vmem:[#allocation57_spill] sm:$0xff] %v4887_v46  ;;  %v303_v32 = vld [vmem:[%s4242_s13 + $0x168] sm:$0xff] }
 0x139   : > { %6286 = vst [vmem:[#allocation55_spill] sm:$0xff] %v4883_v7  ;;  %v4911_v45 = vpack.c.bf16 %v303_v32, %v295_v44  ;;  %v3441_v44 = vld [vmem:[%s6124_s1 + $0x1d8] sm:$0xf0] }
 0x13a   : > { %6287 = vst [vmem:[#allocation56_spill] sm:$0xff] %v4885_v48 }
 0x13b   : > { %6289 = vst [vmem:[#allocation58_spill] sm:$0xff] %v4890_v22 }
 0x13c   : > { %v1645_v12 = vpop.f32.mrf.mxu2  ;;  %v1470_v23 = vpop.f32.mrf.mxu0  ;;  %6291 = vst [vmem:[#allocation60_spill] sm:$0xff] %v4911_v45 }
 0x13d   : > { %v1646_v43 = vadd.f32 %v1645_v12, %v1557_v0  ;;  %v1734_v21 = vpop.f32.mrf.mxu3  ;;  %v1471_v20 = vadd.f32 %v1470_v23, %v4524_v37  ;;  %v1559_v60 = vpop.f32.mrf.mxu1  ;;  %v296_v12 = vld [vmem:[%s4242_s13 + $0x130] sm:$0xff] }
 0x13f   : > { %v4892_v49 = vadd.f32 %v1734_v21, %v1646_v43  ;;  %v1560_v29 = vadd.f32 %v1559_v60, %v1471_v20  ;;  %1785 = vmatmul.bf16.gmra.mxu0 %v4883_v7  ;;  %v304_v20 = vld [vmem:[%s4242_s13 + $0x170] sm:$0xff]  ;;  %v297_v60 = vld [vmem:[%s4242_s13 + $0x138] sm:$0xff] }
 0x140   : > { %1874 = vmatmul.bf16.gmra.mxu1 %v4885_v48  ;;  %v4909_v48 = vpack.c.bf16 %v302_v58, %v294_v38  ;;  %v3249_v38 = vld [vmem:[%s6124_s1 + $0x58] sm:$0xf0]  ;;  %v3778_v58 = vld [vmem:[%s6124_s1 + $0x1d4] sm:$0xf] }
 0x141   : > { %1963 = vmatmul.bf16.gmra.mxu2 %v4887_v46  ;;  %v305_v46 = vld [vmem:[%s4242_s13 + $0x178] sm:$0xff] }
 0x142   : > { %2052 = vmatmul.bf16.gmra.mxu3 %v4890_v22  ;;  %6290 = vst [vmem:[#allocation59_spill] sm:$0xff] %v4909_v48 }
 0x144   : > { %v1648_v23 = vpop.f32.mrf.mxu2  ;;  %v1472_v21 = vpop.f32.mrf.mxu0 }
 0x145   : > { %v1649_v5 = vadd.f32 %v1648_v23, %v1560_v29  ;;  %v1737_v0 = vpop.f32.mrf.mxu3  ;;  %v1473_v43 = vadd.f32 %v1472_v21, %v4524_v37  ;;  %v1561_v11 = vpop.f32.mrf.mxu1  ;;  %v4913_v21 = vpack.c.bf16 %v304_v20, %v296_v12  ;;  %v3444_v20 = vor.u32 %v3778_v58, %v3441_v44  ;;  %v318_v58 = vld [vmem:[%s4242_s13 + $0x1e0] sm:$0xff]  ;;  %v311_v44 = vld [vmem:[%s4242_s13 + $0x1a8] sm:$0xff] }
 0x147   : > { %v4899_v10 = vadd.f32 %v1737_v0, %v1649_v5  ;;  %v1562_v31 = vadd.f32 %v1561_v11, %v1473_v43  ;;  %6292 = vst [vmem:[#allocation61_spill] sm:$0xff] %v4913_v21  ;;  %v4916_v43 = vpack.c.bf16 %v305_v46, %v297_v60  ;;  %v3377_v46 = vld [vmem:[%s6124_s1 + $0x158] sm:$0xf0]  ;;  %2397 = vmatpush.bf16.msra.mxu3 %v3444_v20 }
 0x148   : > { %v321_v20 = vld [vmem:[%s4242_s13 + $0x1f8] sm:$0xff] }
 0x149   : > { %6293 = vst [vmem:[#allocation62_spill] sm:$0xff] %v4916_v43 }
 0x14c   : > { %v1650_v22 = vpop.f32.mrf.mxu2  ;;  %v1475_v7 = vpop.f32.mrf.mxu0 }
 0x14d   : > { %v1651_v29 = vadd.f32 %v1650_v22, %v1562_v31  ;;  %v1739_v23 = vpop.f32.mrf.mxu3  ;;  %v1476_v5 = vadd.f32 %v1475_v7, %v4524_v37  ;;  %v1564_v0 = vpop.f32.mrf.mxu1  ;;  %v3762_v22 = vld [vmem:[%s6124_s1 + $0x154] sm:$0xf] }
 0x14e   : > { %v3730_v7 = vld [vmem:[%s6124_s1 + $0x54] sm:$0xf]  ;;  %v3380_v31 = vor.u32 %v3762_v22, %v3377_v46 }
 0x14f   : > { %v4918_v11 = vadd.f32 %v1739_v23, %v1651_v29  ;;  %v1565_v36 = vadd.f32 %v1564_v0, %v1476_v5  ;;  %1790 = vmatmul.bf16.gmra.mxu0 %v4909_v48  ;;  %v3252_v12 = vor.u32 %v3730_v7, %v3249_v38  ;;  %v3746_v46 = vld [vmem:[%s6124_s1 + $0xd4] sm:$0xf] }
 0x150   : > { %1879 = vmatmul.bf16.gmra.mxu1 %v4911_v45  ;;  %2308 = vmatpush.bf16.msra.mxu2 %v3380_v31  ;;  %v310_v31 = vld [vmem:[%s4242_s13 + $0x1a0] sm:$0xff] }
 0x151   : > { %1968 = vmatmul.bf16.gmra.mxu2 %v4913_v21  ;;  %2130 = vmatpush.bf16.msra.mxu0 %v3252_v12  ;;  %v313_v12 = vld [vmem:[%s4242_s13 + $0x1b8] sm:$0xff] }
 0x152   : > { %2057 = vmatmul.bf16.gmra.mxu3 %v4916_v43  ;;  %v320_v43 = vld [vmem:[%s4242_s13 + $0x1f0] sm:$0xff] }
 0x154   : > { %v1653_v32 = vpop.f32.mrf.mxu2  ;;  %v1477_v23 = vpop.f32.mrf.mxu0 }
 0x155   : > { %v1654_v60 = vadd.f32 %v1653_v32, %v1565_v36  ;;  %v1742_v29 = vpop.f32.mrf.mxu3  ;;  %v1478_v5 = vadd.f32 %v1477_v23, %v4524_v37  ;;  %v1566_v0 = vpop.f32.mrf.mxu1  ;;  %v3313_v36 = vld [vmem:[%s6124_s1 + $0xd8] sm:$0xf0]  ;;  %v319_v32 = vld [vmem:[%s4242_s13 + $0x1e8] sm:$0xff]  ;;  %v312_v23 = vld [vmem:[%s4242_s13 + $0x1b0] sm:$0xff] }
 0x156   : > { %v3316_v38 = vor.u32 %v3746_v46, %v3313_v36  ;;  %v4961_v35 = vpack.c.bf16 %v319_v32, %v311_v44  ;;  %v4963_v34 = vpack.c.bf16 %v320_v43, %v312_v23  ;;  %v4966_v46 = vpack.c.bf16 %v321_v20, %v313_v12  ;;  %v326_v32 = vld [vmem:[%s4242_s13 + $0x220] sm:$0xff]  ;;  %v327_v12 = vld [vmem:[%s4242_s13 + $0x228] sm:$0xff] }
 0x157   : > { %v4943_v22 = vadd.f32 %v1742_v29, %v1654_v60  ;;  %v1567_v7 = vadd.f32 %v1566_v0, %v1478_v5  ;;  %v4959_v29 = vpack.c.bf16 %v318_v58, %v310_v31  ;;  %v334_v23 = vld [vmem:[%s4242_s13 + $0x260] sm:$0xff]  ;;  %v335_v20 = vld [vmem:[%s4242_s13 + $0x268] sm:$0xff] }
 0x158   : > { %2219 = vmatpush.bf16.msra.mxu1 %v3316_v38  ;;  %6295 = vst [vmem:[#allocation64_spill] sm:$0xff] %v4961_v35  ;;  %v4987_v33 = vpack.c.bf16 %v335_v20, %v327_v12  ;;  %v3433_v12 = vld [vmem:[%s6124_s1 + $0x1c8] sm:$0xf0] }
 0x159   : > { %6294 = vst [vmem:[#allocation63_spill] sm:$0xff] %v4959_v29 }
 0x15a   : > { %6296 = vst [vmem:[#allocation65_spill] sm:$0xff] %v4963_v34 }
 0x15b   : > { %6297 = vst [vmem:[#allocation66_spill] sm:$0xff] %v4966_v46 }
 0x15c   : > { %v1655_v60 = vpop.f32.mrf.mxu2  ;;  %v1480_v48 = vpop.f32.mrf.mxu0  ;;  %6299 = vst [vmem:[#allocation68_spill] sm:$0xff] %v4987_v33 }
 0x15d   : > { %v1656_v21 = vadd.f32 %v1655_v60, %v1567_v7  ;;  %v1744_v45 = vpop.f32.mrf.mxu3  ;;  %v1481_v5 = vadd.f32 %v1480_v48, %v4524_v37  ;;  %v1569_v0 = vpop.f32.mrf.mxu1  ;;  %v328_v60 = vld [vmem:[%s4242_s13 + $0x230] sm:$0xff] }
 0x15f   : > { %v4968_v36 = vadd.f32 %v1744_v45, %v1656_v21  ;;  %v1570_v38 = vadd.f32 %v1569_v0, %v1481_v5  ;;  %1795 = vmatmul.bf16.gmra.mxu0 %v4959_v29  ;;  %v336_v5 = vld [vmem:[%s4242_s13 + $0x270] sm:$0xff]  ;;  %v329_v0 = vld [vmem:[%s4242_s13 + $0x238] sm:$0xff] }
 0x160   : > { %1884 = vmatmul.bf16.gmra.mxu1 %v4961_v35  ;;  %v4985_v35 = vpack.c.bf16 %v334_v23, %v326_v32  ;;  %v3241_v32 = vld [vmem:[%s6124_s1 + $0x48] sm:$0xf0]  ;;  %v3776_v23 = vld [vmem:[%s6124_s1 + $0x1c4] sm:$0xf] }
 0x161   : > { %1973 = vmatmul.bf16.gmra.mxu2 %v4963_v34  ;;  %v337_v34 = vld [vmem:[%s4242_s13 + $0x278] sm:$0xff] }
 0x162   : > { %2062 = vmatmul.bf16.gmra.mxu3 %v4966_v46  ;;  %6298 = vst [vmem:[#allocation67_spill] sm:$0xff] %v4985_v35 }
 0x164   : > { %v1658_v48 = vpop.f32.mrf.mxu2  ;;  %v1482_v45 = vpop.f32.mrf.mxu0 }
 0x165   : > { %v1659_v43 = vadd.f32 %v1658_v48, %v1570_v38  ;;  %v1747_v7 = vpop.f32.mrf.mxu3  ;;  %v1483_v21 = vadd.f32 %v1482_v45, %v4524_v37  ;;  %v1571_v31 = vpop.f32.mrf.mxu1  ;;  %v4989_v45 = vpack.c.bf16 %v336_v5, %v328_v60  ;;  %v3436_v5 = vor.u32 %v3776_v23, %v3433_v12  ;;  %v350_v23 = vld [vmem:[%s4242_s13 + $0x2e0] sm:$0xff]  ;;  %v343_v12 = vld [vmem:[%s4242_s13 + $0x2a8] sm:$0xff] }
 0x167   : > { %v4975_v58 = vadd.f32 %v1747_v7, %v1659_v43  ;;  %v1572_v44 = vadd.f32 %v1571_v31, %v1483_v21  ;;  %6300 = vst [vmem:[#allocation69_spill] sm:$0xff] %v4989_v45  ;;  %v4992_v21 = vpack.c.bf16 %v337_v34, %v329_v0  ;;  %v3369_v34 = vld [vmem:[%s6124_s1 + $0x148] sm:$0xf0]  ;;  %2398 = vmatpush.bf16.msra.mxu3 %v3436_v5  ;;  %v353_v5 = vld [vmem:[%s4242_s13 + $0x2f8] sm:$0xff] }
 0x169   : > { %6301 = vst [vmem:[#allocation70_spill] sm:$0xff] %v4992_v21 }
 0x16c   : > { %v1660_v46 = vpop.f32.mrf.mxu2  ;;  %v1485_v29 = vpop.f32.mrf.mxu0 }
 0x16d   : > { %v1661_v38 = vadd.f32 %v1660_v46, %v1572_v44  ;;  %v1749_v48 = vpop.f32.mrf.mxu3  ;;  %v1486_v43 = vadd.f32 %v1485_v29, %v4524_v37  ;;  %v1574_v7 = vpop.f32.mrf.mxu1  ;;  %v3760_v46 = vld [vmem:[%s6124_s1 + $0x144] sm:$0xf] }
 0x16e   : > { %v3728_v29 = vld [vmem:[%s6124_s1 + $0x44] sm:$0xf]  ;;  %v3372_v44 = vor.u32 %v3760_v46, %v3369_v34 }
 0x16f   : > { %v4994_v31 = vadd.f32 %v1749_v48, %v1661_v38  ;;  %v1575_v4 = vadd.f32 %v1574_v7, %v1486_v43  ;;  %1800 = vmatmul.bf16.gmra.mxu0 %v4985_v35  ;;  %v3244_v60 = vor.u32 %v3728_v29, %v3241_v32  ;;  %v3744_v34 = vld [vmem:[%s6124_s1 + $0xc4] sm:$0xf] }
 0x170   : > { %1889 = vmatmul.bf16.gmra.mxu1 %v4987_v33  ;;  %2309 = vmatpush.bf16.msra.mxu2 %v3372_v44  ;;  %v342_v44 = vld [vmem:[%s4242_s13 + $0x2a0] sm:$0xff] }
 0x171   : > { %1978 = vmatmul.bf16.gmra.mxu2 %v4989_v45  ;;  %2131 = vmatpush.bf16.msra.mxu0 %v3244_v60  ;;  %v345_v60 = vld [vmem:[%s4242_s13 + $0x2b8] sm:$0xff] }
 0x172   : > { %2067 = vmatmul.bf16.gmra.mxu3 %v4992_v21  ;;  %v352_v21 = vld [vmem:[%s4242_s13 + $0x2f0] sm:$0xff] }
 0x174   : > { %v1663_v20 = vpop.f32.mrf.mxu2  ;;  %v1487_v48 = vpop.f32.mrf.mxu0 }
 0x175   : > { %v1664_v0 = vadd.f32 %v1663_v20, %v1575_v4  ;;  %v1752_v38 = vpop.f32.mrf.mxu3  ;;  %v1488_v43 = vadd.f32 %v1487_v48, %v4524_v37  ;;  %v1576_v7 = vpop.f32.mrf.mxu1  ;;  %v3305_v4 = vld [vmem:[%s6124_s1 + $0xc8] sm:$0xf0]  ;;  %v344_v48 = vld [vmem:[%s4242_s13 + $0x2b0] sm:$0xff] }
 0x176   : > { %v3308_v32 = vor.u32 %v3744_v34, %v3305_v4  ;;  %v351_v20 = vld [vmem:[%s4242_s13 + $0x2e8] sm:$0xff]  ;;  %v5039_v2 = vpack.c.bf16 %v352_v21, %v344_v48  ;;  %v5042_v34 = vpack.c.bf16 %v353_v5, %v345_v60  ;;  %v366_v48 = vld [vmem:[%s4242_s13 + $0x360] sm:$0xff] }
 0x177   : > { %v5019_v46 = vadd.f32 %v1752_v38, %v1664_v0  ;;  %v1577_v29 = vadd.f32 %v1576_v7, %v1488_v43  ;;  %v5035_v38 = vpack.c.bf16 %v350_v23, %v342_v44  ;;  %v5037_v3 = vpack.c.bf16 %v351_v20, %v343_v12  ;;  %v358_v20 = vld [vmem:[%s4242_s13 + $0x320] sm:$0xff]  ;;  %v359_v60 = vld [vmem:[%s4242_s13 + $0x328] sm:$0xff] }
 0x178   : > { %2220 = vmatpush.bf16.msra.mxu1 %v3308_v32  ;;  %6304 = vst [vmem:[#allocation73_spill] sm:$0xff] %v5039_v2  ;;  %v367_v5 = vld [vmem:[%s4242_s13 + $0x368] sm:$0xff] }
 0x179   : > { %6302 = vst [vmem:[#allocation71_spill] sm:$0xff] %v5035_v38 }
 0x17a   : > { %6303 = vst [vmem:[#allocation72_spill] sm:$0xff] %v5037_v3 }
 0x17b   : > { %6305 = vst [vmem:[#allocation74_spill] sm:$0xff] %v5042_v34 }
 0x17c   : > { %v1665_v0 = vpop.f32.mrf.mxu2  ;;  %v1490_v35 = vpop.f32.mrf.mxu0 }
 0x17d   : > { %v1666_v45 = vadd.f32 %v1665_v0, %v1577_v29  ;;  %v1754_v33 = vpop.f32.mrf.mxu3  ;;  %v1491_v43 = vadd.f32 %v1490_v35, %v4524_v37  ;;  %v1579_v7 = vpop.f32.mrf.mxu1  ;;  %v360_v0 = vld [vmem:[%s4242_s13 + $0x330] sm:$0xff] }
 0x17f   : > { %v5044_v4 = vadd.f32 %v1754_v33, %v1666_v45  ;;  %v1580_v32 = vadd.f32 %v1579_v7, %v1491_v43  ;;  %1805 = vmatmul.bf16.gmra.mxu0 %v5035_v38  ;;  %v368_v43 = vld [vmem:[%s4242_s13 + $0x370] sm:$0xff]  ;;  %v361_v7 = vld [vmem:[%s4242_s13 + $0x338] sm:$0xff] }
 0x180   : > { %1894 = vmatmul.bf16.gmra.mxu1 %v5037_v3  ;;  %v5061_v3 = vpack.c.bf16 %v366_v48, %v358_v20  ;;  %v3233_v20 = vld [vmem:[%s6124_s1 + $0x38] sm:$0xf0]  ;;  %v3774_v48 = vld [vmem:[%s6124_s1 + $0x1b4] sm:$0xf] }
 0x181   : > { %6306 = vst [vmem:[#allocation75_spill] sm:$0xff] %v5044_v4  ;;  %1983 = vmatmul.bf16.gmra.mxu2 %v5039_v2  ;;  %v369_v2 = vld [vmem:[%s4242_s13 + $0x378] sm:$0xff]  ;;  %v5063_v4 = vpack.c.bf16 %v367_v5, %v359_v60 }
 0x182   : > { %2072 = vmatmul.bf16.gmra.mxu3 %v5042_v34  ;;  %6308 = vst [vmem:[#allocation77_spill] sm:$0xff] %v5061_v3  ;;  %v3425_v60 = vld [vmem:[%s6124_s1 + $0x1b8] sm:$0xf0] }
 0x183   : > { %6309 = vst [vmem:[#allocation78_spill] sm:$0xff] %v5063_v4 }
 0x184   : > { %v1668_v35 = vpop.f32.mrf.mxu2  ;;  %v1492_v33 = vpop.f32.mrf.mxu0 }
 0x185   : > { %v1669_v21 = vadd.f32 %v1668_v35, %v1580_v32  ;;  %v1757_v29 = vpop.f32.mrf.mxu3  ;;  %v1493_v45 = vadd.f32 %v1492_v33, %v4524_v37  ;;  %v1581_v44 = vpop.f32.mrf.mxu1  ;;  %v5065_v33 = vpack.c.bf16 %v368_v43, %v360_v0  ;;  %v3428_v43 = vor.u32 %v3774_v48, %v3425_v60  ;;  %v383_v48 = vld [vmem:[%s4242_s13 + $0x3e8] sm:$0xff]  ;;  %v376_v60 = vld [vmem:[%s4242_s13 + $0x3b0] sm:$0xff] }
 0x187   : > { %v5051_v23 = vadd.f32 %v1757_v29, %v1669_v21  ;;  %v1582_v12 = vadd.f32 %v1581_v44, %v1493_v45  ;;  %6310 = vst [vmem:[#allocation79_spill] sm:$0xff] %v5065_v33  ;;  %v5068_v45 = vpack.c.bf16 %v369_v2, %v361_v7  ;;  %v3361_v2 = vld [vmem:[%s6124_s1 + $0x138] sm:$0xf0]  ;;  %2399 = vmatpush.bf16.msra.mxu3 %v3428_v43 }
 0x188   : > { %v385_v43 = vld [vmem:[%s4242_s13 + $0x3f8] sm:$0xff] }
 0x189   : > { %6307 = vst [vmem:[#allocation76_spill] sm:$0xff] %v5051_v23 }
 0x18a   : > { %6311 = vst [vmem:[#allocation80_spill] sm:$0xff] %v5068_v45 }
 0x18c   : > { %v1670_v34 = vpop.f32.mrf.mxu2  ;;  %v1495_v38 = vpop.f32.mrf.mxu0 }
 0x18d   : > { %v1671_v32 = vadd.f32 %v1670_v34, %v1582_v12  ;;  %v1759_v35 = vpop.f32.mrf.mxu3  ;;  %v1496_v21 = vadd.f32 %v1495_v38, %v4524_v37  ;;  %v1584_v29 = vpop.f32.mrf.mxu1  ;;  %v3758_v34 = vld [vmem:[%s6124_s1 + $0x134] sm:$0xf] }
 0x18e   : > { %v3726_v38 = vld [vmem:[%s6124_s1 + $0x34] sm:$0xf]  ;;  %v3364_v12 = vor.u32 %v3758_v34, %v3361_v2 }
 0x18f   : > { %v5070_v44 = vadd.f32 %v1759_v35, %v1671_v32  ;;  %v1585_v23 = vadd.f32 %v1584_v29, %v1496_v21  ;;  %1810 = vmatmul.bf16.gmra.mxu0 %v5061_v3  ;;  %v3236_v0 = vor.u32 %v3726_v38, %v3233_v20  ;;  %v382_v38 = vld [vmem:[%s4242_s13 + $0x3e0] sm:$0xff]  ;;  %v375_v20 = vld [vmem:[%s4242_s13 + $0x3a8] sm:$0xff] }
 0x190   : > { %1899 = vmatmul.bf16.gmra.mxu1 %v5063_v4  ;;  %2310 = vmatpush.bf16.msra.mxu2 %v3364_v12  ;;  %v3297_v12 = vld [vmem:[%s6124_s1 + $0xb8] sm:$0xf0]  ;;  %v5113_v4 = vpack.c.bf16 %v383_v48, %v375_v20 }
 0x191   : > { %6312 = vst [vmem:[#allocation81_spill] sm:$0xff] %v5070_v44  ;;  %1988 = vmatmul.bf16.gmra.mxu2 %v5065_v33  ;;  %2132 = vmatpush.bf16.msra.mxu0 %v3236_v0  ;;  %v377_v0 = vld [vmem:[%s4242_s13 + $0x3b8] sm:$0xff] }
 0x192   : > { %2077 = vmatmul.bf16.gmra.mxu3 %v5068_v45  ;;  %v374_v45 = vld [vmem:[%s4242_s13 + $0x3a0] sm:$0xff]  ;;  %6315 = vst [vmem:[#allocation84_spill] sm:$0xff] %v5113_v4  ;;  %v5118_v1 = vpack.c.bf16 %v385_v43, %v377_v0  ;;  %v399_v0 = vld [vmem:[%s4242_s13 + $0x468] sm:$0xff]  ;;  %v392_v43 = vld [vmem:[%s4242_s13 + $0x430] sm:$0xff] }
 0x194   : > { %v1673_v5 = vpop.f32.mrf.mxu2  ;;  %v1497_v35 = vpop.f32.mrf.mxu0  ;;  %6317 = vst [vmem:[#allocation86_spill] sm:$0xff] %v5118_v1 }
 0x195   : > { %v1674_v7 = vadd.f32 %v1673_v5, %v1585_v23  ;;  %v1762_v32 = vpop.f32.mrf.mxu3  ;;  %v1498_v21 = vadd.f32 %v1497_v35, %v4524_v37  ;;  %v1586_v29 = vpop.f32.mrf.mxu1  ;;  %v3742_v23 = vld [vmem:[%s6124_s1 + $0xb4] sm:$0xf] }
 0x196   : > { %v384_v5 = vld [vmem:[%s4242_s13 + $0x3f0] sm:$0xff]  ;;  %v3300_v35 = vor.u32 %v3742_v23, %v3297_v12 }
 0x197   : > { %v5095_v34 = vadd.f32 %v1762_v32, %v1674_v7  ;;  %v1587_v2 = vadd.f32 %v1586_v29, %v1498_v21  ;;  %v5111_v32 = vpack.c.bf16 %v382_v38, %v374_v45  ;;  %v5115_v3 = vpack.c.bf16 %v384_v5, %v376_v60  ;;  %v390_v60 = vld [vmem:[%s4242_s13 + $0x420] sm:$0xff] }
 0x198   : > { %2221 = vmatpush.bf16.msra.mxu1 %v3300_v35  ;;  %v398_v5 = vld [vmem:[%s4242_s13 + $0x460] sm:$0xff]  ;;  %v391_v35 = vld [vmem:[%s4242_s13 + $0x428] sm:$0xff] }
 0x199   : > { %6313 = vst [vmem:[#allocation82_spill] sm:$0xff] %v5095_v34 }
 0x19a   : > { %6314 = vst [vmem:[#allocation83_spill] sm:$0xff] %v5111_v32 }
 0x19b   : > { %6316 = vst [vmem:[#allocation85_spill] sm:$0xff] %v5115_v3 }
 0x19c   : > { %v1675_v7 = vpop.f32.mrf.mxu2  ;;  %v1500_v33 = vpop.f32.mrf.mxu0 }
 0x19d   : > { %v1676_v21 = vadd.f32 %v1675_v7, %v1587_v2  ;;  %v1764_v29 = vpop.f32.mrf.mxu3  ;;  %v1501_v34 = vadd.f32 %v1500_v33, %v4524_v37  ;;  %v1589_v44 = vpop.f32.mrf.mxu1  ;;  %v400_v7 = vld [vmem:[%s4242_s13 + $0x470] sm:$0xff] }
 0x19f   : > { %v5120_v23 = vadd.f32 %v1764_v29, %v1676_v21  ;;  %v1590_v45 = vadd.f32 %v1589_v44, %v1501_v34  ;;  %1815 = vmatmul.bf16.gmra.mxu0 %v5111_v32  ;;  %v393_v21 = vld [vmem:[%s4242_s13 + $0x438] sm:$0xff]  ;;  %v5139_v32 = vpack.c.bf16 %v399_v0, %v391_v35  ;;  %v3417_v35 = vld [vmem:[%s6124_s1 + $0x1a8] sm:$0xf0] }
 0x1a0   : > { %1904 = vmatmul.bf16.gmra.mxu1 %v5113_v4  ;;  %v401_v29 = vld [vmem:[%s4242_s13 + $0x478] sm:$0xff] }
 0x1a1   : > { %1993 = vmatmul.bf16.gmra.mxu2 %v5115_v3  ;;  %v5137_v3 = vpack.c.bf16 %v398_v5, %v390_v60  ;;  %6319 = vst [vmem:[#allocation88_spill] sm:$0xff] %v5139_v32  ;;  %v3225_v60 = vld [vmem:[%s6124_s1 + $0x28] sm:$0xf0]  ;;  %v3772_v5 = vld [vmem:[%s6124_s1 + $0x1a4] sm:$0xf] }
 0x1a2   : > { %2082 = vmatmul.bf16.gmra.mxu3 %v5118_v1 }
 0x1a3   : > { %6318 = vst [vmem:[#allocation87_spill] sm:$0xff] %v5137_v3 }
 0x1a4   : > { %v1678_v33 = vpop.f32.mrf.mxu2  ;;  %v1502_v20 = vpop.f32.mrf.mxu0 }
 0x1a5   : > { %v1679_v2 = vadd.f32 %v1678_v33, %v1590_v45  ;;  %v1767_v38 = vpop.f32.mrf.mxu3  ;;  %v1503_v12 = vadd.f32 %v1502_v20, %v4524_v37  ;;  %v1591_v44 = vpop.f32.mrf.mxu1  ;;  %v5141_v37 = vpack.c.bf16 %v400_v7, %v392_v43  ;;  %v5144_v20 = vpack.c.bf16 %v401_v29, %v393_v21 }
 0x1a6   : > { %v3420_v7 = vor.u32 %v3772_v5, %v3417_v35  ;;  %v415_v5 = vld [vmem:[%s4242_s13 + $0x4e8] sm:$0xff]  ;;  %v416_v35 = vld [vmem:[%s4242_s13 + $0x4f0] sm:$0xff] }
 0x1a7   : > { %v5127_v34 = vadd.f32 %v1767_v38, %v1679_v2  ;;  %v1592_v48 = vadd.f32 %v1591_v44, %v1503_v12  ;;  %6320 = vst [vmem:[#allocation89_spill] sm:$0xff] %v5141_v37 }
 0x1a8   : > { %6321 = vst [vmem:[#allocation90_spill] sm:$0xff] %v5144_v20  ;;  %2400 = vmatpush.bf16.msra.mxu3 %v3420_v7  ;;  %v417_v7 = vld [vmem:[%s4242_s13 + $0x4f8] sm:$0xff] }
 0x1ac   : > { %v1680_v1 = vpop.f32.mrf.mxu2  ;;  %v1781_v4 = vpop.f32.mrf.mxu0 }
 0x1ad   : > { %v1681_v45 = vadd.f32 %v1680_v1, %v1592_v48  ;;  %v1769_v33 = vpop.f32.mrf.mxu3  ;;  %v1782_v2 = vadd.f32 %v1781_v4, %v4563_v30  ;;  %v1870_v38 = vpop.f32.mrf.mxu1  ;;  %v3756_v1 = vld [vmem:[%s6124_s1 + $0x124] sm:$0xf]  ;;  %v3353_v30 = vld [vmem:[%s6124_s1 + $0x128] sm:$0xf0] }
 0x1ae   : > { %v3724_v4 = vld [vmem:[%s6124_s1 + $0x24] sm:$0xf]  ;;  %v3356_v48 = vor.u32 %v3756_v1, %v3353_v30 }
 0x1af   : > { %v5146_v12 = vadd.f32 %v1769_v33, %v1681_v45  ;;  %v1871_v44 = vadd.f32 %v1870_v38, %v1782_v2  ;;  %1820 = vmatmul.bf16.gmra.mxu0 %v5137_v3  ;;  %v3228_v43 = vor.u32 %v3724_v4, %v3225_v60  ;;  %v406_v30 = vld [vmem:[%s4242_s13 + $0x4a0] sm:$0xff]  ;;  %v407_v60 = vld [vmem:[%s4242_s13 + $0x4a8] sm:$0xff] }
 0x1b0   : > { %1909 = vmatmul.bf16.gmra.mxu1 %v5139_v32  ;;  %2311 = vmatpush.bf16.msra.mxu2 %v3356_v48  ;;  %v414_v4 = vld [vmem:[%s4242_s13 + $0x4e0] sm:$0xff]  ;;  %v3289_v48 = vld [vmem:[%s6124_s1 + $0xa8] sm:$0xf0] }
 0x1b1   : > { %1998 = vmatmul.bf16.gmra.mxu2 %v5141_v37  ;;  %2133 = vmatpush.bf16.msra.mxu0 %v3228_v43  ;;  %v409_v43 = vld [vmem:[%s4242_s13 + $0x4b8] sm:$0xff] }
 0x1b2   : > { %2087 = vmatmul.bf16.gmra.mxu3 %v5144_v20  ;;  %v5194_v3 = vpack.c.bf16 %v417_v7, %v409_v43  ;;  %v431_v43 = vld [vmem:[%s4242_s13 + $0x568] sm:$0xff]  ;;  %v424_v7 = vld [vmem:[%s4242_s13 + $0x530] sm:$0xff] }
 0x1b4   : > { %v1959_v0 = vpop.f32.mrf.mxu2  ;;  %v1783_v45 = vpop.f32.mrf.mxu0  ;;  %6325 = vst [vmem:[#allocation94_spill] sm:$0xff] %v5194_v3 }
 0x1b5   : > { %v1960_v21 = vadd.f32 %v1959_v0, %v1871_v44  ;;  %v2048_v29 = vpop.f32.mrf.mxu3  ;;  %v1784_v33 = vadd.f32 %v1783_v45, %v4588_v18  ;;  %v1872_v2 = vpop.f32.mrf.mxu1  ;;  %v3740_v44 = vld [vmem:[%s6124_s1 + $0xa4] sm:$0xf]  ;;  %v408_v18 = vld [vmem:[%s4242_s13 + $0x4b0] sm:$0xff] }
 0x1b6   : > { %v3292_v0 = vor.u32 %v3740_v44, %v3289_v48  ;;  %v5191_v20 = vpack.c.bf16 %v416_v35, %v408_v18  ;;  %v422_v18 = vld [vmem:[%s4242_s13 + $0x520] sm:$0xff] }
 0x1b7   : > { %v5171_v38 = vadd.f32 %v2048_v29, %v1960_v21  ;;  %v1873_v1 = vadd.f32 %v1872_v2, %v1784_v33  ;;  %v5187_v29 = vpack.c.bf16 %v414_v4, %v406_v30  ;;  %v430_v35 = vld [vmem:[%s4242_s13 + $0x560] sm:$0xff] }
 0x1b8   : > { %2222 = vmatpush.bf16.msra.mxu1 %v3292_v0  ;;  %6324 = vst [vmem:[#allocation93_spill] sm:$0xff] %v5191_v20  ;;  %v423_v0 = vld [vmem:[%s4242_s13 + $0x528] sm:$0xff] }
 0x1b9   : > { %6322 = vst [vmem:[#allocation91_spill] sm:$0xff] %v5171_v38  ;;  %v5189_v38 = vpack.c.bf16 %v415_v5, %v407_v60 }
 0x1bb   : > { %6323 = vst [vmem:[#allocation92_spill] sm:$0xff] %v5189_v38 }
 0x1bc   : > { %v1961_v21 = vpop.f32.mrf.mxu2  ;;  %v1786_v2 = vpop.f32.mrf.mxu0 }
 0x1bd   : > { %v1962_v45 = vadd.f32 %v1961_v21, %v1873_v1  ;;  %v2050_v33 = vpop.f32.mrf.mxu3  ;;  %v1787_v37 = vadd.f32 %v1786_v2, %v4595_v40  ;;  %v1875_v32 = vpop.f32.mrf.mxu1  ;;  %v432_v21 = vld [vmem:[%s4242_s13 + $0x570] sm:$0xff] }
 0x1bf   : > { %v5196_v44 = vadd.f32 %v2050_v33, %v1962_v45  ;;  %v1876_v30 = vadd.f32 %v1875_v32, %v1787_v37  ;;  %1825 = vmatmul.bf16.gmra.mxu0 %v5187_v29  ;;  %v425_v45 = vld [vmem:[%s4242_s13 + $0x538] sm:$0xff] }
 0x1c0   : > { %1914 = vmatmul.bf16.gmra.mxu1 %v5189_v38  ;;  %v433_v33 = vld [vmem:[%s4242_s13 + $0x578] sm:$0xff]  ;;  %v5215_v38 = vpack.c.bf16 %v431_v43, %v423_v0  ;;  %v3770_v0 = vld [vmem:[%s6124_s1 + $0x194] sm:$0xf] }
 0x1c1   : > { %2003 = vmatmul.bf16.gmra.mxu2 %v5191_v20  ;;  %v3409_v43 = vld [vmem:[%s6124_s1 + $0x198] sm:$0xf0] }
 0x1c2   : > { %2092 = vmatmul.bf16.gmra.mxu3 %v5194_v3  ;;  %v5213_v3 = vpack.c.bf16 %v430_v35, %v422_v18  ;;  %6327 = vst [vmem:[#allocation96_spill] sm:$0xff] %v5215_v38  ;;  %v3217_v35 = vld [vmem:[%s6124_s1 + $0x18] sm:$0xf0] }
 0x1c4   : > { %v1964_v40 = vpop.f32.mrf.mxu2  ;;  %v1788_v60 = vpop.f32.mrf.mxu0  ;;  %6326 = vst [vmem:[#allocation95_spill] sm:$0xff] %v5213_v3 }
 0x1c5   : > { %v1965_v1 = vadd.f32 %v1964_v40, %v1876_v30  ;;  %v2053_v4 = vpop.f32.mrf.mxu3  ;;  %v1789_v48 = vadd.f32 %v1788_v60, %v4614_v39  ;;  %v1877_v32 = vpop.f32.mrf.mxu1  ;;  %v5217_v39 = vpack.c.bf16 %v432_v21, %v424_v7  ;;  %v5220_v60 = vpack.c.bf16 %v433_v33, %v425_v45 }
 0x1c6   : > { %v3412_v45 = vor.u32 %v3770_v0, %v3409_v43  ;;  %v447_v0 = vld [vmem:[%s4242_s13 + $0x5e8] sm:$0xff]  ;;  %v448_v43 = vld [vmem:[%s4242_s13 + $0x5f0] sm:$0xff] }
 0x1c7   : > { %v5203_v37 = vadd.f32 %v2053_v4, %v1965_v1  ;;  %v1878_v5 = vadd.f32 %v1877_v32, %v1789_v48  ;;  %6328 = vst [vmem:[#allocation97_spill] sm:$0xff] %v5217_v39 }
 0x1c8   : > { %6329 = vst [vmem:[#allocation98_spill] sm:$0xff] %v5220_v60  ;;  %2401 = vmatpush.bf16.msra.mxu3 %v3412_v45  ;;  %v449_v45 = vld [vmem:[%s4242_s13 + $0x5f8] sm:$0xff] }
 0x1cc   : > { %v1966_v2 = vpop.f32.mrf.mxu2  ;;  %v1791_v20 = vpop.f32.mrf.mxu0 }
 0x1cd   : > { %v1967_v30 = vadd.f32 %v1966_v2, %v1878_v5  ;;  %v2055_v40 = vpop.f32.mrf.mxu3  ;;  %v1792_v1 = vadd.f32 %v1791_v20, %v4639_v41  ;;  %v1880_v4 = vpop.f32.mrf.mxu1  ;;  %v3754_v5 = vld [vmem:[%s6124_s1 + $0x114] sm:$0xf]  ;;  %v3345_v41 = vld [vmem:[%s6124_s1 + $0x118] sm:$0xf0] }
 0x1ce   : > { %v3722_v20 = vld [vmem:[%s6124_s1 + $0x14] sm:$0xf]  ;;  %v3348_v18 = vor.u32 %v3754_v5, %v3345_v41  ;;  %v438_v41 = vld [vmem:[%s4242_s13 + $0x5a0] sm:$0xff] }
 0x1cf   : > { %v5222_v48 = vadd.f32 %v2055_v40, %v1967_v30  ;;  %v1881_v32 = vadd.f32 %v1880_v4, %v1792_v1  ;;  %1830 = vmatmul.bf16.gmra.mxu0 %v5213_v3  ;;  %v3220_v21 = vor.u32 %v3722_v20, %v3217_v35  ;;  %v446_v20 = vld [vmem:[%s4242_s13 + $0x5e0] sm:$0xff]  ;;  %v439_v35 = vld [vmem:[%s4242_s13 + $0x5a8] sm:$0xff] }
 0x1d0   : > { %1919 = vmatmul.bf16.gmra.mxu1 %v5215_v38  ;;  %2312 = vmatpush.bf16.msra.mxu2 %v3348_v18  ;;  %v3281_v18 = vld [vmem:[%s6124_s1 + $0x98] sm:$0xf0] }
 0x1d1   : > { %2008 = vmatmul.bf16.gmra.mxu2 %v5217_v39  ;;  %2134 = vmatpush.bf16.msra.mxu0 %v3220_v21  ;;  %v441_v21 = vld [vmem:[%s4242_s13 + $0x5b8] sm:$0xff] }
 0x1d2   : > { %2097 = vmatmul.bf16.gmra.mxu3 %v5220_v60  ;;  %v5270_v3 = vpack.c.bf16 %v449_v45, %v441_v21  ;;  %v463_v21 = vld [vmem:[%s4242_s13 + $0x668] sm:$0xff]  ;;  %v456_v45 = vld [vmem:[%s4242_s13 + $0x630] sm:$0xff] }
 0x1d4   : > { %v1969_v7 = vpop.f32.mrf.mxu2  ;;  %v1793_v30 = vpop.f32.mrf.mxu0  ;;  %6333 = vst [vmem:[#allocation102_spill] sm:$0xff] %v5270_v3 }
 0x1d5   : > { %v1970_v33 = vadd.f32 %v1969_v7, %v1881_v32  ;;  %v2058_v2 = vpop.f32.mrf.mxu3  ;;  %v1794_v40 = vadd.f32 %v1793_v30, %v4664_v17  ;;  %v1882_v1 = vpop.f32.mrf.mxu1  ;;  %v3738_v32 = vld [vmem:[%s6124_s1 + $0x94] sm:$0xf] }
 0x1d6   : > { %v440_v17 = vld [vmem:[%s4242_s13 + $0x5b0] sm:$0xff]  ;;  %v3284_v7 = vor.u32 %v3738_v32, %v3281_v18 }
 0x1d7   : > { %v5247_v4 = vadd.f32 %v2058_v2, %v1970_v33  ;;  %v1883_v5 = vadd.f32 %v1882_v1, %v1794_v40  ;;  %v5263_v2 = vpack.c.bf16 %v446_v20, %v438_v41  ;;  %v5267_v60 = vpack.c.bf16 %v448_v43, %v440_v17  ;;  %v454_v17 = vld [vmem:[%s4242_s13 + $0x620] sm:$0xff] }
 0x1d8   : > { %2223 = vmatpush.bf16.msra.mxu1 %v3284_v7  ;;  %v462_v43 = vld [vmem:[%s4242_s13 + $0x660] sm:$0xff]  ;;  %v455_v7 = vld [vmem:[%s4242_s13 + $0x628] sm:$0xff] }
 0x1d9   : > { %6330 = vst [vmem:[#allocation99_spill] sm:$0xff] %v5247_v4  ;;  %v5265_v4 = vpack.c.bf16 %v447_v0, %v439_v35 }
 0x1da   : > { %6332 = vst [vmem:[#allocation101_spill] sm:$0xff] %v5267_v60 }
 0x1db   : > { %6331 = vst [vmem:[#allocation100_spill] sm:$0xff] %v5265_v4 }
 0x1dc   : > { %v1971_v33 = vpop.f32.mrf.mxu2  ;;  %v1796_v1 = vpop.f32.mrf.mxu0 }
 0x1dd   : > { %v1972_v30 = vadd.f32 %v1971_v33, %v1883_v5  ;;  %v2060_v40 = vpop.f32.mrf.mxu3  ;;  %v1797_v39 = vadd.f32 %v1796_v1, %v4671_v62  ;;  %v1885_v38 = vpop.f32.mrf.mxu1  ;;  %v464_v33 = vld [vmem:[%s4242_s13 + $0x670] sm:$0xff] }
 0x1df   : > { %v5272_v32 = vadd.f32 %v2060_v40, %v1972_v30  ;;  %v1886_v41 = vadd.f32 %v1885_v38, %v1797_v39  ;;  %1835 = vmatmul.bf16.gmra.mxu0 %v5263_v2  ;;  %v457_v30 = vld [vmem:[%s4242_s13 + $0x638] sm:$0xff] }
 0x1e0   : > { %1924 = vmatmul.bf16.gmra.mxu1 %v5265_v4  ;;  %v465_v40 = vld [vmem:[%s4242_s13 + $0x678] sm:$0xff]  ;;  %v5291_v4 = vpack.c.bf16 %v463_v21, %v455_v7  ;;  %v3768_v7 = vld [vmem:[%s6124_s1 + $0x184] sm:$0xf]  ;;  %v3401_v21 = vld [vmem:[%s6124_s1 + $0x188] sm:$0xf0] }
 0x1e1   : > { %2013 = vmatmul.bf16.gmra.mxu2 %v5267_v60 }
 0x1e2   : > { %2102 = vmatmul.bf16.gmra.mxu3 %v5270_v3  ;;  %v5289_v3 = vpack.c.bf16 %v462_v43, %v454_v17  ;;  %6335 = vst [vmem:[#allocation104_spill] sm:$0xff] %v5291_v4  ;;  %v3209_v43 = vld [vmem:[%s6124_s1 + $0x8] sm:$0xf0] }
 0x1e4   : > { %v1974_v62 = vpop.f32.mrf.mxu2  ;;  %v1798_v35 = vpop.f32.mrf.mxu0  ;;  %6334 = vst [vmem:[#allocation103_spill] sm:$0xff] %v5289_v3 }
 0x1e5   : > { %v1975_v5 = vadd.f32 %v1974_v62, %v1886_v41  ;;  %v2063_v20 = vpop.f32.mrf.mxu3  ;;  %v1799_v18 = vadd.f32 %v1798_v35, %v4690_v59  ;;  %v1887_v38 = vpop.f32.mrf.mxu1  ;;  %v5293_v59 = vpack.c.bf16 %v464_v33, %v456_v45  ;;  %v5296_v35 = vpack.c.bf16 %v465_v40, %v457_v30 }
 0x1e6   : > { %v3404_v30 = vor.u32 %v3768_v7, %v3401_v21  ;;  %v479_v7 = vld [vmem:[%s4242_s13 + $0x6e8] sm:$0xff]  ;;  %v480_v21 = vld [vmem:[%s4242_s13 + $0x6f0] sm:$0xff] }
 0x1e7   : > { %v5279_v39 = vadd.f32 %v2063_v20, %v1975_v5  ;;  %v1888_v0 = vadd.f32 %v1887_v38, %v1799_v18  ;;  %6336 = vst [vmem:[#allocation105_spill] sm:$0xff] %v5293_v59 }
 0x1e8   : > { %6337 = vst [vmem:[#allocation106_spill] sm:$0xff] %v5296_v35  ;;  %2402 = vmatpush.bf16.msra.mxu3 %v3404_v30  ;;  %v481_v30 = vld [vmem:[%s4242_s13 + $0x6f8] sm:$0xff] }
 0x1ec   : > { %v1976_v1 = vpop.f32.mrf.mxu2  ;;  %v1801_v60 = vpop.f32.mrf.mxu0 }
 0x1ed   : > { %v1977_v41 = vadd.f32 %v1976_v1, %v1888_v0  ;;  %v2065_v62 = vpop.f32.mrf.mxu3  ;;  %v1802_v5 = vadd.f32 %v1801_v60, %v4715_v42  ;;  %v1890_v20 = vpop.f32.mrf.mxu1  ;;  %v3752_v0 = vld [vmem:[%s6124_s1 + $0x104] sm:$0xf]  ;;  %v3337_v42 = vld [vmem:[%s6124_s1 + $0x108] sm:$0xf0] }
 0x1ee   : > { %v3720_v60 = vld [vmem:[%s6124_s1 + $0x4] sm:$0xf]  ;;  %v3340_v17 = vor.u32 %v3752_v0, %v3337_v42 }
 0x1ef   : > { %v5298_v18 = vadd.f32 %v2065_v62, %v1977_v41  ;;  %v1891_v38 = vadd.f32 %v1890_v20, %v1802_v5  ;;  %1840 = vmatmul.bf16.gmra.mxu0 %v5289_v3  ;;  %v3212_v33 = vor.u32 %v3720_v60, %v3209_v43  ;;  %v470_v42 = vld [vmem:[%s4242_s13 + $0x6a0] sm:$0xff]  ;;  %v471_v43 = vld [vmem:[%s4242_s13 + $0x6a8] sm:$0xff] }
 0x1f0   : > { %1929 = vmatmul.bf16.gmra.mxu1 %v5291_v4  ;;  %2313 = vmatpush.bf16.msra.mxu2 %v3340_v17  ;;  %v478_v60 = vld [vmem:[%s4242_s13 + $0x6e0] sm:$0xff]  ;;  %v3273_v17 = vld [vmem:[%s6124_s1 + $0x88] sm:$0xf0] }
 0x1f1   : > { %2018 = vmatmul.bf16.gmra.mxu2 %v5293_v59  ;;  %2135 = vmatpush.bf16.msra.mxu0 %v3212_v33  ;;  %v473_v33 = vld [vmem:[%s4242_s13 + $0x6b8] sm:$0xff] }
 0x1f2   : > { %2107 = vmatmul.bf16.gmra.mxu3 %v5296_v35  ;;  %v5346_v3 = vpack.c.bf16 %v481_v30, %v473_v33  ;;  %v495_v33 = vld [vmem:[%s4242_s13 + $0x768] sm:$0xff]  ;;  %v488_v30 = vld [vmem:[%s4242_s13 + $0x730] sm:$0xff] }
 0x1f4   : > { %v1979_v45 = vpop.f32.mrf.mxu2  ;;  %v1803_v41 = vpop.f32.mrf.mxu0  ;;  %6341 = vst [vmem:[#allocation110_spill] sm:$0xff] %v5346_v3 }
 0x1f5   : > { %v1980_v40 = vadd.f32 %v1979_v45, %v1891_v38  ;;  %v2068_v1 = vpop.f32.mrf.mxu3  ;;  %v1804_v62 = vadd.f32 %v1803_v41, %v4740_v61  ;;  %v1892_v5 = vpop.f32.mrf.mxu1  ;;  %v3736_v38 = vld [vmem:[%s6124_s1 + $0x84] sm:$0xf]  ;;  %v472_v61 = vld [vmem:[%s4242_s13 + $0x6b0] sm:$0xff] }
 0x1f6   : > { %v3276_v45 = vor.u32 %v3736_v38, %v3273_v17  ;;  %v5343_v35 = vpack.c.bf16 %v480_v21, %v472_v61  ;;  %v486_v61 = vld [vmem:[%s4242_s13 + $0x720] sm:$0xff] }
 0x1f7   : > { %v5323_v20 = vadd.f32 %v2068_v1, %v1980_v40  ;;  %v1893_v0 = vadd.f32 %v1892_v5, %v1804_v62  ;;  %v5339_v1 = vpack.c.bf16 %v478_v60, %v470_v42  ;;  %v494_v21 = vld [vmem:[%s4242_s13 + $0x760] sm:$0xff] }
 0x1f8   : > { %2224 = vmatpush.bf16.msra.mxu1 %v3276_v45  ;;  %6340 = vst [vmem:[#allocation109_spill] sm:$0xff] %v5343_v35  ;;  %v487_v45 = vld [vmem:[%s4242_s13 + $0x728] sm:$0xff] }
 0x1f9   : > { %6338 = vst [vmem:[#allocation107_spill] sm:$0xff] %v5323_v20  ;;  %v5341_v20 = vpack.c.bf16 %v479_v7, %v471_v43 }
 0x1fb   : > { %6339 = vst [vmem:[#allocation108_spill] sm:$0xff] %v5341_v20 }
 0x1fc   : > { %v1981_v40 = vpop.f32.mrf.mxu2  ;;  %v1806_v5 = vpop.f32.mrf.mxu0 }
 0x1fd   : > { %v1982_v41 = vadd.f32 %v1981_v40, %v1893_v0  ;;  %v2070_v62 = vpop.f32.mrf.mxu3  ;;  %v1807_v59 = vadd.f32 %v1806_v5, %v4747_v19  ;;  %v1895_v4 = vpop.f32.mrf.mxu1  ;;  %v496_v40 = vld [vmem:[%s4242_s13 + $0x770] sm:$0xff] }
 0x1ff   : > { %v5348_v38 = vadd.f32 %v2070_v62, %v1982_v41  ;;  %v1896_v42 = vadd.f32 %v1895_v4, %v1807_v59  ;;  %1845 = vmatmul.bf16.gmra.mxu0 %v5339_v1  ;;  %v489_v41 = vld [vmem:[%s4242_s13 + $0x738] sm:$0xff] }
 0x200   : > { %1934 = vmatmul.bf16.gmra.mxu1 %v5341_v20  ;;  %v497_v62 = vld [vmem:[%s4242_s13 + $0x778] sm:$0xff]  ;;  %v5367_v20 = vpack.c.bf16 %v495_v33, %v487_v45  ;;  %v3846_v45 = vld [vmem:[%s6124_s1 + $0x3f4] sm:$0xf] }
 0x201   : > { %2023 = vmatmul.bf16.gmra.mxu2 %v5343_v35  ;;  %v3713_v33 = vld [vmem:[%s6124_s1 + $0x3f8] sm:$0xf0] }
 0x202   : > { %2112 = vmatmul.bf16.gmra.mxu3 %v5346_v3  ;;  %v5365_v3 = vpack.c.bf16 %v494_v21, %v486_v61  ;;  %6343 = vst [vmem:[#allocation112_spill] sm:$0xff] %v5367_v20  ;;  %v3521_v21 = vld [vmem:[%s6124_s1 + $0x278] sm:$0xf0] }
 0x204   : > { %v1984_v19 = vpop.f32.mrf.mxu2  ;;  %v1808_v43 = vpop.f32.mrf.mxu0  ;;  %6342 = vst [vmem:[#allocation111_spill] sm:$0xff] %v5365_v3 }
 0x205   : > { %v1985_v0 = vadd.f32 %v1984_v19, %v1896_v42  ;;  %v2073_v60 = vpop.f32.mrf.mxu3  ;;  %v1809_v17 = vadd.f32 %v1808_v43, %v4766_v63  ;;  %v1897_v4 = vpop.f32.mrf.mxu1  ;;  %v5369_v63 = vpack.c.bf16 %v496_v40, %v488_v30  ;;  %v5372_v43 = vpack.c.bf16 %v497_v62, %v489_v41 }
 0x206   : > { %v3716_v41 = vor.u32 %v3846_v45, %v3713_v33  ;;  %v511_v45 = vld [vmem:[%s4242_s13 + $0x7e8] sm:$0xff]  ;;  %v512_v33 = vld [vmem:[%s4242_s13 + $0x7f0] sm:$0xff] }
 0x207   : > { %v5355_v59 = vadd.f32 %v2073_v60, %v1985_v0  ;;  %v1898_v7 = vadd.f32 %v1897_v4, %v1809_v17  ;;  %6344 = vst [vmem:[#allocation113_spill] sm:$0xff] %v5369_v63 }
 0x208   : > { %6345 = vst [vmem:[#allocation114_spill] sm:$0xff] %v5372_v43  ;;  %2751 = vmatpush.bf16.msrb.mxu3 %v3716_v41  ;;  %v513_v41 = vld [vmem:[%s4242_s13 + $0x7f8] sm:$0xff] }
 0x20c   : > { %v1986_v5 = vpop.f32.mrf.mxu2  ;;  %v1811_v35 = vpop.f32.mrf.mxu0 }
 0x20d   : > { %v1987_v42 = vadd.f32 %v1986_v5, %v1898_v7  ;;  %v2075_v19 = vpop.f32.mrf.mxu3  ;;  %v1812_v0 = vadd.f32 %v1811_v35, %v4791_v9  ;;  %v1900_v60 = vpop.f32.mrf.mxu1  ;;  %v3830_v7 = vld [vmem:[%s6124_s1 + $0x374] sm:$0xf]  ;;  %v3649_v9 = vld [vmem:[%s6124_s1 + $0x378] sm:$0xf0] }
 0x20e   : > { %v3798_v35 = vld [vmem:[%s6124_s1 + $0x274] sm:$0xf]  ;;  %v3652_v61 = vor.u32 %v3830_v7, %v3649_v9  ;;  %v502_v9 = vld [vmem:[%s4242_s13 + $0x7a0] sm:$0xff] }
 0x20f   : > { %v5374_v17 = vadd.f32 %v2075_v19, %v1987_v42  ;;  %v1901_v4 = vadd.f32 %v1900_v60, %v1812_v0  ;;  %1850 = vmatmul.bf16.gmra.mxu0 %v5365_v3  ;;  %v3524_v40 = vor.u32 %v3798_v35, %v3521_v21  ;;  %v510_v35 = vld [vmem:[%s4242_s13 + $0x7e0] sm:$0xff]  ;;  %v503_v21 = vld [vmem:[%s4242_s13 + $0x7a8] sm:$0xff] }
 0x210   : > { %1939 = vmatmul.bf16.gmra.mxu1 %v5367_v20  ;;  %2662 = vmatpush.bf16.msrb.mxu2 %v3652_v61  ;;  %v3585_v61 = vld [vmem:[%s6124_s1 + $0x2f8] sm:$0xf0] }
 0x211   : > { %6346 = vst [vmem:[#allocation115_spill] sm:$0xff] %v5374_v17  ;;  %2028 = vmatmul.bf16.gmra.mxu2 %v5369_v63  ;;  %2484 = vmatpush.bf16.msrb.mxu0 %v3524_v40  ;;  %v505_v40 = vld [vmem:[%s4242_s13 + $0x7b8] sm:$0xff] }
 0x212   : > { %2117 = vmatmul.bf16.gmra.mxu3 %v5372_v43  ;;  %v5422_v3 = vpack.c.bf16 %v513_v41, %v505_v40 }
 0x214   : > { %v1989_v30 = vpop.f32.mrf.mxu2  ;;  %v1813_v42 = vpop.f32.mrf.mxu0 }
 0x215   : > { %v1990_v62 = vadd.f32 %v1989_v30, %v1901_v4  ;;  %v2078_v5 = vpop.f32.mrf.mxu3  ;;  %v1814_v19 = vadd.f32 %v1813_v42, %v4816_v24  ;;  %v1902_v0 = vpop.f32.mrf.mxu1  ;;  %v3814_v4 = vld [vmem:[%s6124_s1 + $0x2f4] sm:$0xf] }
 0x216   : > { %v504_v24 = vld [vmem:[%s4242_s13 + $0x7b0] sm:$0xff]  ;;  %v3588_v30 = vor.u32 %v3814_v4, %v3585_v61 }
 0x217   : > { %v5399_v60 = vadd.f32 %v2078_v5, %v1990_v62  ;;  %v1903_v7 = vadd.f32 %v1902_v0, %v1814_v19  ;;  %v5415_v5 = vpack.c.bf16 %v510_v35, %v502_v9  ;;  %v5419_v43 = vpack.c.bf16 %v512_v33, %v504_v24 }
 0x218   : > { %2573 = vmatpush.bf16.msrb.mxu1 %v3588_v30 }
 0x219   : > { %6347 = vst [vmem:[#allocation116_spill] sm:$0xff] %v5399_v60  ;;  %v5417_v60 = vpack.c.bf16 %v511_v45, %v503_v21 }
 0x21c   : > { %v1991_v62 = vpop.f32.mrf.mxu2  ;;  %v1816_v0 = vpop.f32.mrf.mxu0 }
 0x21d   : > { %v1992_v42 = vadd.f32 %v1991_v62, %v1903_v7  ;;  %v2080_v19 = vpop.f32.mrf.mxu3  ;;  %v1817_v63 = vadd.f32 %v1816_v0, %v4823_v8  ;;  %v1905_v20 = vpop.f32.mrf.mxu1 }
 0x21f   : > { %v5424_v17 = vadd.f32 %v2080_v19, %v1992_v42  ;;  %v1906_v4 = vadd.f32 %v1905_v20, %v1817_v63  ;;  %1855 = vmatmul.bf16.gmra.mxu0 %v5415_v5  ;;  %v3796_v19 = vld [vmem:[%s6124_s1 + $0x264] sm:$0xf] }
 0x220   : > { %1944 = vmatmul.bf16.gmra.mxu1 %v5417_v60 }
 0x221   : > { %2033 = vmatmul.bf16.gmra.mxu2 %v5419_v43 }
 0x222   : > { %2122 = vmatmul.bf16.gmra.mxu3 %v5422_v3 }
 0x224   : > { %v1994_v7 = vpop.f32.mrf.mxu2  ;;  %v1818_v21 = vpop.f32.mrf.mxu0 }
 0x225   : > { %v1995_v9 = vadd.f32 %v1994_v7, %v1906_v4  ;;  %v2083_v35 = vpop.f32.mrf.mxu3  ;;  %v1819_v8 = vadd.f32 %v1818_v21, %v4842_v6  ;;  %v1907_v61 = vpop.f32.mrf.mxu1  ;;  %v3828_v6 = vld [vmem:[%s6124_s1 + $0x364] sm:$0xf] }
 0x227   : > { %v5431_v45 = vadd.f32 %v2083_v35, %v1995_v9  ;;  %v1908_v24 = vadd.f32 %v1907_v61, %v1819_v8 }
 0x22c   : > { %v1996_v33 = vpop.f32.mrf.mxu2  ;;  %v1821_v30 = vpop.f32.mrf.mxu0 }
 0x22d   : > { %v1997_v20 = vadd.f32 %v1996_v33, %v1908_v24  ;;  %v2085_v63 = vpop.f32.mrf.mxu3  ;;  %v1822_v40 = vadd.f32 %v1821_v30, %v4867_v57  ;;  %v1910_v41 = vpop.f32.mrf.mxu1  ;;  %v3641_v57 = vld [vmem:[%s6124_s1 + $0x368] sm:$0xf0] }
 0x22e   : > { %v3644_v0 = vor.u32 %v3828_v6, %v3641_v57 }
 0x22f   : > { %v5434_v62 = vadd.f32 %v2085_v63, %v1997_v20  ;;  %v1911_v42 = vadd.f32 %v1910_v41, %v1822_v40  ;;  %2136 = vmatmul.bf16.vlgmr.msra.gmra.mxu0 %v4265_v47  ;;  %v3513_v47 = vld [vmem:[%s6124_s1 + $0x268] sm:$0xf0]  ;;  %v3812_v20 = vld [vmem:[%s6124_s1 + $0x2e4] sm:$0xf] }
 0x230   : > { %2225 = vmatmul.bf16.vlgmr.msra.gmra.mxu1 %v4272_v52  ;;  %v3844_v52 = vld [vmem:[%s6124_s1 + $0x3e4] sm:$0xf]  ;;  %v3516_v4 = vor.u32 %v3796_v19, %v3513_v47  ;;  %2663 = vmatpush.bf16.msrb.mxu2 %v3644_v0  ;;  %v3577_v63 = vld [vmem:[%s6124_s1 + $0x2e8] sm:$0xf0] }
 0x231   : > { %2314 = vmatmul.bf16.vlgmr.msra.gmra.mxu2 %v4274_v53  ;;  %v3705_v53 = vld [vmem:[%s6124_s1 + $0x3e8] sm:$0xf0]  ;;  %v3580_v30 = vor.u32 %v3812_v20, %v3577_v63 }
 0x232   : > { %2403 = vmatmul.bf16.vlgmr.msra.gmra.mxu3 %v4276_v54  ;;  %v3708_v7 = vor.u32 %v3844_v52, %v3705_v53  ;;  %2485 = vmatpush.bf16.msrb.mxu0 %v3516_v4 }
 0x233   : > { %2574 = vmatpush.bf16.msrb.mxu1 %v3580_v30 }
 0x234   : > { %v1999_v54 = vpop.f32.mrf.mxu2  ;;  %v1823_v21 = vpop.f32.mrf.mxu0  ;;  %2752 = vmatpush.bf16.msrb.mxu3 %v3708_v7 }
 0x235   : > { %v2000_v9 = vadd.f32 %v1999_v54, %v1911_v42  ;;  %v2088_v35 = vpop.f32.mrf.mxu3  ;;  %v1824_v8 = vadd.f32 %v1823_v21, %v4892_v49  ;;  %v1912_v61 = vpop.f32.mrf.mxu1 }
 0x237   : > { %v5459_v24 = vadd.f32 %v2088_v35, %v2000_v9  ;;  %v1913_v33 = vadd.f32 %v1912_v61, %v1824_v8 }
 0x23c   : > { %v2001_v40 = vpop.f32.mrf.mxu2  ;;  %v1826_v49 = vpop.f32.mrf.mxu0 }
 0x23d   : > { %v2002_v41 = vadd.f32 %v2001_v40, %v1913_v33  ;;  %v2090_v42 = vpop.f32.mrf.mxu3  ;;  %v1827_v6 = vadd.f32 %v1826_v49, %v4899_v10  ;;  %v1915_v57 = vpop.f32.mrf.mxu1  ;;  %v3794_v33 = vld [vmem:[%s6124_s1 + $0x254] sm:$0xf] }
 0x23f   : > { %v5468_v19 = vadd.f32 %v2090_v42, %v2002_v41  ;;  %v1916_v0 = vadd.f32 %v1915_v57, %v1827_v6  ;;  %2141 = vmatmul.bf16.gmra.mxu0 %v4314_v13 }
 0x240   : > { %2230 = vmatmul.bf16.gmra.mxu1 %v4316_v14 }
 0x241   : > { %2319 = vmatmul.bf16.gmra.mxu2 %v4318_v15 }
 0x242   : > { %2408 = vmatmul.bf16.gmra.mxu3 %v4320_v16 }
 0x244   : > { %v2004_v47 = vpop.f32.mrf.mxu2  ;;  %v1828_v54 = vpop.f32.mrf.mxu0 }
 0x245   : > { %v2005_v52 = vadd.f32 %v2004_v47, %v1916_v0  ;;  %v2093_v53 = vpop.f32.mrf.mxu3  ;;  %v1829_v4 = vadd.f32 %v1828_v54, %v4918_v11  ;;  %v1917_v7 = vpop.f32.mrf.mxu1  ;;  %v3826_v11 = vld [vmem:[%s6124_s1 + $0x354] sm:$0xf] }
 0x246   : > { %v3810_v47 = vld [vmem:[%s6124_s1 + $0x2d4] sm:$0xf] }
 0x247   : > { %v5475_v10 = vadd.f32 %v2093_v53, %v2005_v52  ;;  %v1918_v9 = vadd.f32 %v1917_v7, %v1829_v4  ;;  %v3569_v52 = vld [vmem:[%s6124_s1 + $0x2d8] sm:$0xf0] }
 0x248   : > { %v3572_v53 = vor.u32 %v3810_v47, %v3569_v52 }
 0x24a   : > { %2575 = vmatpush.bf16.msrb.mxu1 %v3572_v53 }
 0x24c   : > { %v2006_v35 = vpop.f32.mrf.mxu2  ;;  %v1831_v13 = vpop.f32.mrf.mxu0 }
 0x24d   : > { %v2007_v21 = vadd.f32 %v2006_v35, %v1918_v9  ;;  %v2095_v8 = vpop.f32.mrf.mxu3  ;;  %v1832_v14 = vadd.f32 %v1831_v13, %v4943_v22  ;;  %v1920_v61 = vpop.f32.mrf.mxu1  ;;  %v3633_v22 = vld [vmem:[%s6124_s1 + $0x358] sm:$0xf0] }
 0x24e   : > { %v3636_v20 = vor.u32 %v3826_v11, %v3633_v22 }
 0x24f   : > { %v5478_v15 = vadd.f32 %v2095_v8, %v2007_v21  ;;  %v1921_v16 = vadd.f32 %v1920_v61, %v1832_v14  ;;  %2146 = vmatmul.bf16.gmra.mxu0 %v4334_v25  ;;  %v3505_v25 = vld [vmem:[%s6124_s1 + $0x258] sm:$0xf0] }
 0x250   : > { %2235 = vmatmul.bf16.gmra.mxu1 %v4336_v26  ;;  %v3842_v26 = vld [vmem:[%s6124_s1 + $0x3d4] sm:$0xf]  ;;  %v3508_v63 = vor.u32 %v3794_v33, %v3505_v25  ;;  %2664 = vmatpush.bf16.msrb.mxu2 %v3636_v20 }
 0x251   : > { %2324 = vmatmul.bf16.gmra.mxu2 %v4338_v27  ;;  %v3697_v27 = vld [vmem:[%s6124_s1 + $0x3d8] sm:$0xf0] }
 0x252   : > { %2413 = vmatmul.bf16.gmra.mxu3 %v4340_v28  ;;  %v3700_v30 = vor.u32 %v3842_v26, %v3697_v27  ;;  %2486 = vmatpush.bf16.msrb.mxu0 %v3508_v63  ;;  %v6352_v63 = vld [vmem:[#allocation4_spill] sm:$0xff] }
 0x254   : > { %v2009_v28 = vpop.f32.mrf.mxu2  ;;  %v1833_v42 = vpop.f32.mrf.mxu0  ;;  %2753 = vmatpush.bf16.msrb.mxu3 %v3700_v30  ;;  %v6353_v30 = vld [vmem:[#allocation5_spill] sm:$0xff] }
 0x255   : > { %v2010_v40 = vadd.f32 %v2009_v28, %v1921_v16  ;;  %v2098_v41 = vpop.f32.mrf.mxu3  ;;  %v1834_v49 = vadd.f32 %v1833_v42, %v4968_v36  ;;  %v1922_v6 = vpop.f32.mrf.mxu1  ;;  %v6351_v28 = vld [vmem:[#allocation3_spill] sm:$0xff] }
 0x257   : > { %v5503_v57 = vadd.f32 %v2098_v41, %v2010_v40  ;;  %v1923_v0 = vadd.f32 %v1922_v6, %v1834_v49  ;;  %v3824_v40 = vld [vmem:[%s6124_s1 + $0x344] sm:$0xf]  ;;  %v3497_v49 = vld [vmem:[%s6124_s1 + $0x248] sm:$0xf0] }
 0x258   : > { %v3792_v41 = vld [vmem:[%s6124_s1 + $0x244] sm:$0xf] }
 0x259   : > { %v3840_v6 = vld [vmem:[%s6124_s1 + $0x3c4] sm:$0xf]  ;;  %v3500_v52 = vor.u32 %v3792_v41, %v3497_v49 }
 0x25b   : > { %2487 = vmatpush.bf16.msrb.mxu0 %v3500_v52 }
 0x25c   : > { %v2011_v54 = vpop.f32.mrf.mxu2  ;;  %v1836_v36 = vpop.f32.mrf.mxu0 }
 0x25d   : > { %v2012_v4 = vadd.f32 %v2011_v54, %v1923_v0  ;;  %v2100_v7 = vpop.f32.mrf.mxu3  ;;  %v1837_v9 = vadd.f32 %v1836_v36, %v4975_v58  ;;  %v1925_v35 = vpop.f32.mrf.mxu1  ;;  %v3689_v0 = vld [vmem:[%s6124_s1 + $0x3c8] sm:$0xf0]  ;;  %v6355_v36 = vld [vmem:[#allocation75_spill] sm:$0xff] }
 0x25e   : > { %v3692_v53 = vor.u32 %v3840_v6, %v3689_v0 }
 0x25f   : > { %v5512_v21 = vadd.f32 %v2100_v7, %v2012_v4  ;;  %v1926_v8 = vadd.f32 %v1925_v35, %v1837_v9  ;;  %2151 = vmatmul.bf16.gmra.mxu0 %v4378_v50 }
 0x260   : > { %2240 = vmatmul.bf16.gmra.mxu1 %v4380_v51  ;;  %2754 = vmatpush.bf16.msrb.mxu3 %v3692_v53 }
 0x261   : > { %6348 = vst [vmem:[#allocation117_spill] sm:$0xff] %v5512_v21  ;;  %2329 = vmatmul.bf16.gmra.mxu2 %v4382_v55  ;;  %v6429_v21 = vld [vmem:[#allocation67_spill] sm:$0xff] }
 0x262   : > { %2418 = vmatmul.bf16.gmra.mxu3 %v4384_v56 }
 0x264   : > { %v2014_v13 = vpop.f32.mrf.mxu2  ;;  %v1838_v16 = vpop.f32.mrf.mxu0 }
 0x265   : > { %v2015_v14 = vadd.f32 %v2014_v13, %v1926_v8  ;;  %v2103_v61 = vpop.f32.mrf.mxu3  ;;  %v1839_v11 = vadd.f32 %v1838_v16, %v4994_v31  ;;  %v1927_v22 = vpop.f32.mrf.mxu1  ;;  %v6354_v31 = vld [vmem:[#allocation6_spill] sm:$0xff] }
 0x267   : > { %v5519_v58 = vadd.f32 %v2103_v61, %v2015_v14  ;;  %v1928_v33 = vadd.f32 %v1927_v22, %v1839_v11  ;;  %v3808_v14 = vld [vmem:[%s6124_s1 + $0x2c4] sm:$0xf]  ;;  %v3561_v61 = vld [vmem:[%s6124_s1 + $0x2c8] sm:$0xf0] }
 0x268   : > { %v3564_v16 = vor.u32 %v3808_v14, %v3561_v61  ;;  %v6367_v14 = vld [vmem:[#allocation11_spill] sm:$0xff]  ;;  %v6368_v61 = vld [vmem:[#allocation12_spill] sm:$0xff] }
 0x269   : > { %6349 = vst [vmem:[#allocation118_spill] sm:$0xff] %v5519_v58 }
 0x26a   : > { %2576 = vmatpush.bf16.msrb.mxu1 %v3564_v16  ;;  %v6369_v16 = vld [vmem:[#allocation13_spill] sm:$0xff] }
 0x26c   : > { %v2016_v20 = vpop.f32.mrf.mxu2  ;;  %v1841_v50 = vpop.f32.mrf.mxu0 }
 0x26d   : > { %v2017_v25 = vadd.f32 %v2016_v20, %v1928_v33  ;;  %v2105_v26 = vpop.f32.mrf.mxu3  ;;  %v1842_v51 = vadd.f32 %v1841_v50, %v5019_v46  ;;  %v1930_v27 = vpop.f32.mrf.mxu1  ;;  %v3625_v46 = vld [vmem:[%s6124_s1 + $0x348] sm:$0xf0] }
 0x26e   : > { %v3628_v42 = vor.u32 %v3824_v40, %v3625_v46 }
 0x26f   : > { %v5522_v55 = vadd.f32 %v2105_v26, %v2017_v25  ;;  %v1931_v56 = vadd.f32 %v1930_v27, %v1842_v51  ;;  %2156 = vmatmul.bf16.gmra.mxu0 %v6351_v28  ;;  %v6357_v25 = vld [vmem:[#allocation76_spill] sm:$0xff] }
 0x270   : > { %2245 = vmatmul.bf16.gmra.mxu1 %v6352_v63  ;;  %2665 = vmatpush.bf16.msrb.mxu2 %v3628_v42  ;;  %v6360_v28 = vld [vmem:[#allocation8_spill] sm:$0xff]  ;;  %v6361_v63 = vld [vmem:[#allocation9_spill] sm:$0xff] }
 0x271   : > { %6350 = vst [vmem:[#allocation119_spill] sm:$0xff] %v5522_v55  ;;  %2334 = vmatmul.bf16.gmra.mxu2 %v6353_v30  ;;  %v6362_v30 = vld [vmem:[#allocation10_spill] sm:$0xff]  ;;  %v6363_v42 = vld [vmem:[#allocation81_spill] sm:$0xff]  ;;  %v6423_v55 = vld [vmem:[#allocation63_spill] sm:$0xff] }
 0x272   : > { %2423 = vmatmul.bf16.gmra.mxu3 %v6354_v31 }
 0x274   : > { %v2019_v47 = vpop.f32.mrf.mxu2  ;;  %v1843_v7 = vpop.f32.mrf.mxu0 }
 0x275   : > { %v2020_v54 = vadd.f32 %v2019_v47, %v1931_v56  ;;  %v2108_v4 = vpop.f32.mrf.mxu3  ;;  %v1844_v9 = vadd.f32 %v1843_v7, %v6355_v36  ;;  %v1932_v35 = vpop.f32.mrf.mxu1  ;;  %v6359_v56 = vld [vmem:[#allocation7_spill] sm:$0xff]  ;;  %v6365_v7 = vld [vmem:[#allocation82_spill] sm:$0xff] }
 0x277   : > { %v5547_v8 = vadd.f32 %v2108_v4, %v2020_v54  ;;  %v1933_v13 = vadd.f32 %v1932_v35, %v1844_v9 }
 0x279   : > { %6356 = vst [vmem:[#allocation3_spill] sm:$0xff] %v5547_v8 }
 0x27c   : > { %v2021_v11 = vpop.f32.mrf.mxu2  ;;  %v1846_v20 = vpop.f32.mrf.mxu0 }
 0x27d   : > { %v2022_v22 = vadd.f32 %v2021_v11, %v1933_v13  ;;  %v2110_v33 = vpop.f32.mrf.mxu3  ;;  %v1847_v26 = vadd.f32 %v1846_v20, %v6357_v25  ;;  %v1935_v50 = vpop.f32.mrf.mxu1  ;;  %v6370_v11 = vld [vmem:[#allocation14_spill] sm:$0xff]  ;;  %v3790_v20 = vld [vmem:[%s6124_s1 + $0x234] sm:$0xf] }
 0x27f   : > { %v5556_v51 = vadd.f32 %v2110_v33, %v2022_v22  ;;  %v1936_v27 = vadd.f32 %v1935_v50, %v1847_v26  ;;  %2161 = vmatmul.bf16.gmra.mxu0 %v6359_v56  ;;  %v3822_v22 = vld [vmem:[%s6124_s1 + $0x334] sm:$0xf]  ;;  %v3617_v33 = vld [vmem:[%s6124_s1 + $0x338] sm:$0xf0] }
 0x280   : > { %2250 = vmatmul.bf16.gmra.mxu1 %v6360_v28  ;;  %v3620_v25 = vor.u32 %v3822_v22, %v3617_v33  ;;  %v3489_v26 = vld [vmem:[%s6124_s1 + $0x238] sm:$0xf0]  ;;  %v3838_v50 = vld [vmem:[%s6124_s1 + $0x3b4] sm:$0xf] }
 0x281   : > { %6358 = vst [vmem:[#allocation4_spill] sm:$0xff] %v5556_v51  ;;  %2339 = vmatmul.bf16.gmra.mxu2 %v6361_v63  ;;  %v3492_v28 = vor.u32 %v3790_v20, %v3489_v26  ;;  %v6419_v51 = vld [vmem:[#allocation59_spill] sm:$0xff] }
 0x282   : > { %2428 = vmatmul.bf16.gmra.mxu3 %v6362_v30  ;;  %2666 = vmatpush.bf16.msrb.mxu2 %v3620_v25 }
 0x283   : > { %2488 = vmatpush.bf16.msrb.mxu0 %v3492_v28 }
 0x284   : > { %v2024_v31 = vpop.f32.mrf.mxu2  ;;  %v1848_v41 = vpop.f32.mrf.mxu0 }
 0x285   : > { %v2025_v40 = vadd.f32 %v2024_v31, %v1936_v27  ;;  %v2113_v46 = vpop.f32.mrf.mxu3  ;;  %v1849_v49 = vadd.f32 %v1848_v41, %v6363_v42  ;;  %v1937_v6 = vpop.f32.mrf.mxu1  ;;  %v3681_v27 = vld [vmem:[%s6124_s1 + $0x3b8] sm:$0xf0] }
 0x286   : > { %v3684_v63 = vor.u32 %v3838_v50, %v3681_v27 }
 0x287   : > { %v5563_v0 = vadd.f32 %v2113_v46, %v2025_v40  ;;  %v1938_v47 = vadd.f32 %v1937_v6, %v1849_v49  ;;  %v3806_v49 = vld [vmem:[%s6124_s1 + $0x2b4] sm:$0xf]  ;;  %v3553_v6 = vld [vmem:[%s6124_s1 + $0x2b8] sm:$0xf0] }
 0x288   : > { %2755 = vmatpush.bf16.msrb.mxu3 %v3684_v63 }
 0x289   : > { %6364 = vst [vmem:[#allocation5_spill] sm:$0xff] %v5563_v0 }
 0x28c   : > { %v2026_v52 = vpop.f32.mrf.mxu2  ;;  %v1851_v4 = vpop.f32.mrf.mxu0 }
 0x28d   : > { %v2027_v53 = vadd.f32 %v2026_v52, %v1938_v47  ;;  %v2115_v54 = vpop.f32.mrf.mxu3  ;;  %v1852_v36 = vadd.f32 %v1851_v4, %v6365_v7  ;;  %v1940_v9 = vpop.f32.mrf.mxu1  ;;  %v3556_v52 = vor.u32 %v3806_v49, %v3553_v6  ;;  %v6379_v6 = vld [vmem:[#allocation19_spill] sm:$0xff] }
 0x28f   : > { %v5566_v35 = vadd.f32 %v2115_v54, %v2027_v53  ;;  %v1941_v13 = vadd.f32 %v1940_v9, %v1852_v36  ;;  %2166 = vmatmul.bf16.gmra.mxu0 %v6367_v14  ;;  %2577 = vmatpush.bf16.msrb.mxu1 %v3556_v52  ;;  %v6373_v14 = vld [vmem:[#allocation15_spill] sm:$0xff]  ;;  %v6381_v52 = vld [vmem:[#allocation21_spill] sm:$0xff] }
 0x290   : > { %2255 = vmatmul.bf16.gmra.mxu1 %v6368_v61  ;;  %v6374_v61 = vld [vmem:[#allocation16_spill] sm:$0xff] }
 0x291   : > { %6366 = vst [vmem:[#allocation6_spill] sm:$0xff] %v5566_v35  ;;  %2344 = vmatmul.bf16.gmra.mxu2 %v6369_v16  ;;  %v6375_v16 = vld [vmem:[#allocation17_spill] sm:$0xff]  ;;  %v6415_v35 = vld [vmem:[#allocation55_spill] sm:$0xff] }
 0x292   : > { %2433 = vmatmul.bf16.gmra.mxu3 %v6370_v11  ;;  %v6376_v11 = vld [vmem:[#allocation18_spill] sm:$0xff] }
 0x294   : > { %v2029_v56 = vpop.f32.mrf.mxu2  ;;  %v1853_v40 = vpop.f32.mrf.mxu0 }
 0x295   : > { %v2030_v30 = vadd.f32 %v2029_v56, %v1941_v13  ;;  %v2118_v31 = vpop.f32.mrf.mxu3  ;;  %v1854_v46 = vadd.f32 %v1853_v40, %v5120_v23  ;;  %v1942_v41 = vpop.f32.mrf.mxu1  ;;  %v3985_v56 = vld [vmem:[%s6125_s2] sm:$0x3] }
 0x296   : > { %v5612_v28 = vperm.slane %v3985_v56, 1  ;;  %v3545_v56 = vld [vmem:[%s6124_s1 + $0x2a8] sm:$0xf0] }
 0x297   : > { %v5591_v42 = vadd.f32 %v2118_v31, %v2030_v30  ;;  %v1943_v47 = vadd.f32 %v1942_v41, %v1854_v46 }
 0x299   : > { %6371 = vst [vmem:[#allocation75_spill] sm:$0xff] %v5591_v42 }
 0x29c   : > { %v2031_v53 = vpop.f32.mrf.mxu2  ;;  %v1856_v23 = vpop.f32.mrf.mxu0 }
 0x29d   : > { %v2032_v54 = vadd.f32 %v2031_v53, %v1943_v47  ;;  %v2120_v4 = vpop.f32.mrf.mxu3  ;;  %v1857_v7 = vadd.f32 %v1856_v23, %v5127_v34  ;;  %v1945_v36 = vpop.f32.mrf.mxu1  ;;  %v6380_v47 = vld [vmem:[#allocation20_spill] sm:$0xff]  ;;  %v6382_v53 = vld [vmem:[#allocation22_spill] sm:$0xff]  ;;  %v3788_v23 = vld [vmem:[%s6124_s1 + $0x224] sm:$0xf] }
 0x29f   : > { %v5600_v9 = vadd.f32 %v2120_v4, %v2032_v54  ;;  %v1946_v13 = vadd.f32 %v1945_v36, %v1857_v7  ;;  %2171 = vmatmul.bf16.gmra.mxu0 %v6373_v14  ;;  %v3820_v54 = vld [vmem:[%s6124_s1 + $0x324] sm:$0xf]  ;;  %v3609_v4 = vld [vmem:[%s6124_s1 + $0x328] sm:$0xf0] }
 0x2a0   : > { %2260 = vmatmul.bf16.gmra.mxu1 %v6374_v61  ;;  %v3612_v7 = vor.u32 %v3820_v54, %v3609_v4  ;;  %v3481_v36 = vld [vmem:[%s6124_s1 + $0x228] sm:$0xf0]  ;;  %v6385_v4 = vld [vmem:[#allocation25_spill] sm:$0xff] }
 0x2a1   : > { %6372 = vst [vmem:[#allocation76_spill] sm:$0xff] %v5600_v9  ;;  %2349 = vmatmul.bf16.gmra.mxu2 %v6375_v16  ;;  %v3673_v14 = vld [vmem:[%s6124_s1 + $0x3a8] sm:$0xf0]  ;;  %v3484_v16 = vor.u32 %v3788_v23, %v3481_v36  ;;  %v6386_v23 = vld [vmem:[#allocation26_spill] sm:$0xff]  ;;  %v6411_v9 = vld [vmem:[#allocation51_spill] sm:$0xff] }
 0x2a2   : > { %2438 = vmatmul.bf16.gmra.mxu3 %v6376_v11  ;;  %2667 = vmatpush.bf16.msrb.mxu2 %v3612_v7  ;;  %v6384_v54 = vld [vmem:[#allocation24_spill] sm:$0xff] }
 0x2a3   : > { %2489 = vmatpush.bf16.msrb.mxu0 %v3484_v16 }
 0x2a4   : > { %v2034_v22 = vpop.f32.mrf.mxu2  ;;  %v1858_v25 = vpop.f32.mrf.mxu0 }
 0x2a5   : > { %v2035_v33 = vadd.f32 %v2034_v22, %v1946_v13  ;;  %v2123_v20 = vpop.f32.mrf.mxu3  ;;  %v1859_v26 = vadd.f32 %v1858_v25, %v5146_v12  ;;  %v1947_v50 = vpop.f32.mrf.mxu1  ;;  %v3836_v13 = vld [vmem:[%s6124_s1 + $0x3a4] sm:$0xf] }
 0x2a6   : > { %v3676_v11 = vor.u32 %v3836_v13, %v3673_v14 }
 0x2a7   : > { %v5607_v34 = vadd.f32 %v2123_v20, %v2035_v33  ;;  %v1948_v27 = vadd.f32 %v1947_v50, %v1859_v26 }
 0x2a8   : > { %2756 = vmatpush.bf16.msrb.mxu3 %v3676_v11 }
 0x2a9   : > { %6377 = vst [vmem:[#allocation7_spill] sm:$0xff] %v5607_v34 }
 0x2ac   : > { %v2036_v63 = vpop.f32.mrf.mxu2  ;;  %v2137_v40 = vpop.f32.mrf.mxu0 }
 0x2ad   : > { %v2037_v30 = vadd.f32 %v2036_v63, %v1948_v27  ;;  %v2125_v31 = vpop.f32.mrf.mxu3  ;;  %v2138_v46 = vadd.f32 %v2137_v40, %v5612_v28  ;;  %v2226_v41 = vpop.f32.mrf.mxu1  ;;  %v3804_v27 = vld [vmem:[%s6124_s1 + $0x2a4] sm:$0xf] }
 0x2af   : > { %v5615_v49 = vadd.f32 %v2125_v31, %v2037_v30  ;;  %v2227_v12 = vadd.f32 %v2226_v41, %v2138_v46  ;;  %2176 = vmatmul.bf16.gmra.mxu0 %v6379_v6  ;;  %v3548_v30 = vor.u32 %v3804_v27, %v3545_v56 }
 0x2b0   : > { %2265 = vmatmul.bf16.gmra.mxu1 %v6380_v47 }
 0x2b1   : > { %6378 = vst [vmem:[#allocation8_spill] sm:$0xff] %v5615_v49  ;;  %2354 = vmatmul.bf16.gmra.mxu2 %v6381_v52  ;;  %2578 = vmatpush.bf16.msrb.mxu1 %v3548_v30  ;;  %v6407_v49 = vld [vmem:[#allocation47_spill] sm:$0xff] }
 0x2b2   : > { %2443 = vmatmul.bf16.gmra.mxu3 %v6382_v53  ;;  %v6383_v53 = vld [vmem:[#allocation23_spill] sm:$0xff] }
 0x2b4   : > { %v2315_v61 = vpop.f32.mrf.mxu2  ;;  %v2139_v20 = vpop.f32.mrf.mxu0 }
 0x2b5   : > { %v2316_v22 = vadd.f32 %v2315_v61, %v2227_v12  ;;  %v2404_v33 = vpop.f32.mrf.mxu3  ;;  %v2140_v25 = vadd.f32 %v2139_v20, %v5612_v28  ;;  %v2228_v26 = vpop.f32.mrf.mxu1 }
 0x2b7   : > { %v5640_v50 = vadd.f32 %v2404_v33, %v2316_v22  ;;  %v2229_v63 = vadd.f32 %v2228_v26, %v2140_v25 }
 0x2bc   : > { %v2317_v31 = vpop.f32.mrf.mxu2  ;;  %v2142_v41 = vpop.f32.mrf.mxu0 }
 0x2bd   : > { %v2318_v40 = vadd.f32 %v2317_v31, %v2229_v63  ;;  %v2406_v46 = vpop.f32.mrf.mxu3  ;;  %v2143_v12 = vadd.f32 %v2142_v41, %v5612_v28  ;;  %v2231_v6 = vpop.f32.mrf.mxu1  ;;  %v6387_v31 = vld [vmem:[#allocation27_spill] sm:$0xff]  ;;  %v6390_v41 = vld [vmem:[#allocation30_spill] sm:$0xff] }
 0x2bf   : > { %v5649_v47 = vadd.f32 %v2406_v46, %v2318_v40  ;;  %v2232_v52 = vadd.f32 %v2231_v6, %v2143_v12  ;;  %2181 = vmatmul.bf16.gmra.mxu0 %v6383_v53  ;;  %v6388_v40 = vld [vmem:[#allocation28_spill] sm:$0xff]  ;;  %v6389_v46 = vld [vmem:[#allocation29_spill] sm:$0xff]  ;;  %v3601_v6 = vld [vmem:[%s6124_s1 + $0x318] sm:$0xf0] }
 0x2c0   : > { %2270 = vmatmul.bf16.gmra.mxu1 %v6384_v54  ;;  %v3818_v12 = vld [vmem:[%s6124_s1 + $0x314] sm:$0xf]  ;;  %v3473_v54 = vld [vmem:[%s6124_s1 + $0x218] sm:$0xf0] }
 0x2c1   : > { %2359 = vmatmul.bf16.gmra.mxu2 %v6385_v4  ;;  %v3604_v53 = vor.u32 %v3818_v12, %v3601_v6  ;;  %v3834_v4 = vld [vmem:[%s6124_s1 + $0x394] sm:$0xf] }
 0x2c2   : > { %2448 = vmatmul.bf16.gmra.mxu3 %v6386_v23  ;;  %v3665_v23 = vld [vmem:[%s6124_s1 + $0x398] sm:$0xf0] }
 0x2c3   : > { %2668 = vmatpush.bf16.msrb.mxu2 %v3604_v53  ;;  %v6391_v53 = vld [vmem:[#allocation31_spill] sm:$0xff] }
 0x2c4   : > { %v2320_v7 = vpop.f32.mrf.mxu2  ;;  %v2144_v14 = vpop.f32.mrf.mxu0 }
 0x2c5   : > { %v2321_v36 = vadd.f32 %v2320_v7, %v2232_v52  ;;  %v2409_v13 = vpop.f32.mrf.mxu3  ;;  %v2145_v61 = vadd.f32 %v2144_v14, %v5612_v28  ;;  %v2233_v16 = vpop.f32.mrf.mxu1  ;;  %v3786_v52 = vld [vmem:[%s6124_s1 + $0x214] sm:$0xf] }
 0x2c7   : > { %v5656_v11 = vadd.f32 %v2409_v13, %v2321_v36  ;;  %v2234_v22 = vadd.f32 %v2233_v16, %v2145_v61  ;;  %v3476_v36 = vor.u32 %v3786_v52, %v3473_v54  ;;  %v3668_v13 = vor.u32 %v3834_v4, %v3665_v23  ;;  %v6392_v54 = vld [vmem:[#allocation32_spill] sm:$0xff]  ;;  %v6393_v4 = vld [vmem:[#allocation33_spill] sm:$0xff]  ;;  %v6394_v23 = vld [vmem:[#allocation34_spill] sm:$0xff] }
 0x2c9   : > { %2490 = vmatpush.bf16.msrb.mxu0 %v3476_v36  ;;  %2757 = vmatpush.bf16.msrb.mxu3 %v3668_v13 }
 0x2cc   : > { %v2322_v33 = vpop.f32.mrf.mxu2  ;;  %v2147_v26 = vpop.f32.mrf.mxu0 }
 0x2cd   : > { %v2323_v20 = vadd.f32 %v2322_v33, %v2234_v22  ;;  %v2411_v25 = vpop.f32.mrf.mxu3  ;;  %v2148_v27 = vadd.f32 %v2147_v26, %v5612_v28  ;;  %v2236_v56 = vpop.f32.mrf.mxu1  ;;  %v3537_v26 = vld [vmem:[%s6124_s1 + $0x298] sm:$0xf0] }
 0x2cf   : > { %v5659_v63 = vadd.f32 %v2411_v25, %v2323_v20  ;;  %v2237_v30 = vadd.f32 %v2236_v56, %v2148_v27  ;;  %2186 = vmatmul.bf16.gmra.mxu0 %v6387_v31  ;;  %v3802_v25 = vld [vmem:[%s6124_s1 + $0x294] sm:$0xf] }
 0x2d0   : > { %2275 = vmatmul.bf16.gmra.mxu1 %v6388_v40  ;;  %v3540_v56 = vor.u32 %v3802_v25, %v3537_v26 }
 0x2d1   : > { %2364 = vmatmul.bf16.gmra.mxu2 %v6389_v46 }
 0x2d2   : > { %2453 = vmatmul.bf16.gmra.mxu3 %v6390_v41  ;;  %2579 = vmatpush.bf16.msrb.mxu1 %v3540_v56 }
 0x2d4   : > { %v2325_v7 = vpop.f32.mrf.mxu2  ;;  %v2149_v16 = vpop.f32.mrf.mxu0 }
 0x2d5   : > { %v2326_v14 = vadd.f32 %v2325_v7, %v2237_v30  ;;  %v2414_v61 = vpop.f32.mrf.mxu3  ;;  %v2150_v22 = vadd.f32 %v2149_v16, %v5612_v28  ;;  %v2238_v33 = vpop.f32.mrf.mxu1 }
 0x2d7   : > { %v5684_v20 = vadd.f32 %v2414_v61, %v2326_v14  ;;  %v2239_v27 = vadd.f32 %v2238_v33, %v2150_v22 }
 0x2dc   : > { %v2327_v30 = vpop.f32.mrf.mxu2  ;;  %v2152_v46 = vpop.f32.mrf.mxu0 }
 0x2dd   : > { %v2328_v31 = vadd.f32 %v2327_v30, %v2239_v27  ;;  %v2416_v40 = vpop.f32.mrf.mxu3  ;;  %v2153_v41 = vadd.f32 %v2152_v46, %v5612_v28  ;;  %v2241_v12 = vpop.f32.mrf.mxu1 }
 0x2df   : > { %v5693_v6 = vadd.f32 %v2416_v40, %v2328_v31  ;;  %v2242_v52 = vadd.f32 %v2241_v12, %v2153_v41  ;;  %2191 = vmatmul.bf16.gmra.mxu0 %v6391_v53  ;;  %v6395_v41 = vld [vmem:[#allocation35_spill] sm:$0xff]  ;;  %v6396_v12 = vld [vmem:[#allocation36_spill] sm:$0xff]  ;;  %v6398_v53 = vld [vmem:[#allocation38_spill] sm:$0xff] }
 0x2e0   : > { %2280 = vmatmul.bf16.gmra.mxu1 %v6392_v54  ;;  %v3816_v54 = vld [vmem:[%s6124_s1 + $0x304] sm:$0xf] }
 0x2e1   : > { %2369 = vmatmul.bf16.gmra.mxu2 %v6393_v4  ;;  %v3593_v4 = vld [vmem:[%s6124_s1 + $0x308] sm:$0xf0] }
 0x2e2   : > { %2458 = vmatmul.bf16.gmra.mxu3 %v6394_v23  ;;  %v3784_v23 = vld [vmem:[%s6124_s1 + $0x204] sm:$0xf] }
 0x2e4   : > { %v2330_v7 = vpop.f32.mrf.mxu2  ;;  %v2154_v14 = vpop.f32.mrf.mxu0 }
 0x2e5   : > { %v2331_v36 = vadd.f32 %v2330_v7, %v2242_v52  ;;  %v2419_v13 = vpop.f32.mrf.mxu3  ;;  %v2155_v61 = vadd.f32 %v2154_v14, %v5612_v28  ;;  %v2243_v16 = vpop.f32.mrf.mxu1  ;;  %v6397_v52 = vld [vmem:[#allocation37_spill] sm:$0xff]  ;;  %v3596_v7 = vor.u32 %v3816_v54, %v3593_v4  ;;  %v3657_v14 = vld [vmem:[%s6124_s1 + $0x388] sm:$0xf0] }
 0x2e7   : > { %v5700_v22 = vadd.f32 %v2419_v13, %v2331_v36  ;;  %v2244_v33 = vadd.f32 %v2243_v16, %v2155_v61  ;;  %v3465_v36 = vld [vmem:[%s6124_s1 + $0x208] sm:$0xf0]  ;;  %v3832_v13 = vld [vmem:[%s6124_s1 + $0x384] sm:$0xf]  ;;  %2669 = vmatpush.bf16.msrb.mxu2 %v3596_v7 }
 0x2e8   : > { %v3468_v16 = vor.u32 %v3784_v23, %v3465_v36 }
 0x2ea   : > { %2491 = vmatpush.bf16.msrb.mxu0 %v3468_v16  ;;  %v6400_v16 = vld [vmem:[#allocation40_spill] sm:$0xff] }
 0x2ec   : > { %v2332_v25 = vpop.f32.mrf.mxu2  ;;  %v2157_v56 = vpop.f32.mrf.mxu0 }
 0x2ed   : > { %v2333_v26 = vadd.f32 %v2332_v25, %v2244_v33  ;;  %v2421_v27 = vpop.f32.mrf.mxu3  ;;  %v2158_v30 = vadd.f32 %v2157_v56, %v5612_v28  ;;  %v2246_v31 = vpop.f32.mrf.mxu1  ;;  %v3660_v33 = vor.u32 %v3832_v13, %v3657_v14 }
 0x2ef   : > { %v5703_v40 = vadd.f32 %v2421_v27, %v2333_v26  ;;  %v2247_v46 = vadd.f32 %v2246_v31, %v2158_v30  ;;  %2196 = vmatmul.bf16.gmra.mxu0 %v6395_v41  ;;  %2758 = vmatpush.bf16.msrb.mxu3 %v3660_v33  ;;  %v3800_v41 = vld [vmem:[%s6124_s1 + $0x284] sm:$0xf]  ;;  %v6401_v33 = vld [vmem:[#allocation41_spill] sm:$0xff] }
 0x2f0   : > { %2285 = vmatmul.bf16.gmra.mxu1 %v6396_v12  ;;  %v3529_v12 = vld [vmem:[%s6124_s1 + $0x288] sm:$0xf0] }
 0x2f1   : > { %2374 = vmatmul.bf16.gmra.mxu2 %v6397_v52 }
 0x2f2   : > { %2463 = vmatmul.bf16.gmra.mxu3 %v6398_v53 }
 0x2f4   : > { %v2335_v61 = vpop.f32.mrf.mxu2  ;;  %v2159_v27 = vpop.f32.mrf.mxu0 }
 0x2f5   : > { %v2336_v25 = vadd.f32 %v2335_v61, %v2247_v46  ;;  %v2424_v26 = vpop.f32.mrf.mxu3  ;;  %v2160_v56 = vadd.f32 %v2159_v27, %v5612_v28  ;;  %v2248_v30 = vpop.f32.mrf.mxu1  ;;  %v3532_v46 = vor.u32 %v3800_v41, %v3529_v12  ;;  %v6399_v61 = vld [vmem:[#allocation39_spill] sm:$0xff] }
 0x2f7   : > { %v5728_v31 = vadd.f32 %v2424_v26, %v2336_v25  ;;  %v2249_v52 = vadd.f32 %v2248_v30, %v2160_v56  ;;  %2580 = vmatpush.bf16.msrb.mxu1 %v3532_v46  ;;  %v6402_v25 = vld [vmem:[#allocation42_spill] sm:$0xff] }
 0x2fc   : > { %v2337_v53 = vpop.f32.mrf.mxu2  ;;  %v2162_v23 = vpop.f32.mrf.mxu0 }
 0x2fd   : > { %v2338_v54 = vadd.f32 %v2337_v53, %v2249_v52  ;;  %v2426_v4 = vpop.f32.mrf.mxu3  ;;  %v2163_v7 = vadd.f32 %v2162_v23, %v5612_v28  ;;  %v2251_v36 = vpop.f32.mrf.mxu1 }
 0x2ff   : > { %v5737_v13 = vadd.f32 %v2426_v4, %v2338_v54  ;;  %v2252_v14 = vadd.f32 %v2251_v36, %v2163_v7  ;;  %2201 = vmatmul.bf16.gmra.mxu0 %v6399_v61 }
 0x300   : > { %2290 = vmatmul.bf16.gmra.mxu1 %v6400_v16 }
 0x301   : > { %2379 = vmatmul.bf16.gmra.mxu2 %v6401_v33  ;;  %v6403_v33 = vld [vmem:[#allocation43_spill] sm:$0xff] }
 0x302   : > { %2468 = vmatmul.bf16.gmra.mxu3 %v6402_v25  ;;  %v6405_v25 = vld [vmem:[#allocation45_spill] sm:$0xff] }
 0x304   : > { %v2340_v26 = vpop.f32.mrf.mxu2  ;;  %v2164_v30 = vpop.f32.mrf.mxu0 }
 0x305   : > { %v2341_v27 = vadd.f32 %v2340_v26, %v2252_v14  ;;  %v2429_v56 = vpop.f32.mrf.mxu3  ;;  %v2165_v41 = vadd.f32 %v2164_v30, %v5612_v28  ;;  %v2253_v12 = vpop.f32.mrf.mxu1  ;;  %v6404_v14 = vld [vmem:[#allocation44_spill] sm:$0xff]  ;;  %v6406_v26 = vld [vmem:[#allocation46_spill] sm:$0xff] }
 0x307   : > { %v5744_v52 = vadd.f32 %v2429_v56, %v2341_v27  ;;  %v2254_v46 = vadd.f32 %v2253_v12, %v2165_v41 }
 0x30c   : > { %v2342_v53 = vpop.f32.mrf.mxu2  ;;  %v2167_v23 = vpop.f32.mrf.mxu0 }
 0x30d   : > { %v2343_v54 = vadd.f32 %v2342_v53, %v2254_v46  ;;  %v2431_v4 = vpop.f32.mrf.mxu3  ;;  %v2168_v7 = vadd.f32 %v2167_v23, %v5612_v28  ;;  %v2256_v36 = vpop.f32.mrf.mxu1 }
 0x30f   : > { %v5747_v61 = vadd.f32 %v2431_v4, %v2343_v54  ;;  %v2257_v16 = vadd.f32 %v2256_v36, %v2168_v7  ;;  %2206 = vmatmul.bf16.gmra.mxu0 %v6403_v33 }
 0x310   : > { %2295 = vmatmul.bf16.gmra.mxu1 %v6404_v14 }
 0x311   : > { %2384 = vmatmul.bf16.gmra.mxu2 %v6405_v25 }
 0x312   : > { %2473 = vmatmul.bf16.gmra.mxu3 %v6406_v26 }
 0x314   : > { %v2345_v27 = vpop.f32.mrf.mxu2  ;;  %v2169_v41 = vpop.f32.mrf.mxu0 }
 0x315   : > { %v2346_v56 = vadd.f32 %v2345_v27, %v2257_v16  ;;  %v2434_v30 = vpop.f32.mrf.mxu3  ;;  %v2170_v12 = vadd.f32 %v2169_v41, %v5612_v28  ;;  %v2258_v46 = vpop.f32.mrf.mxu1  ;;  %v6408_v16 = vld [vmem:[#allocation48_spill] sm:$0xff]  ;;  %v6409_v27 = vld [vmem:[#allocation49_spill] sm:$0xff]  ;;  %v6410_v41 = vld [vmem:[#allocation50_spill] sm:$0xff] }
 0x317   : > { %v5754_v53 = vadd.f32 %v2434_v30, %v2346_v56  ;;  %v2259_v54 = vadd.f32 %v2258_v46, %v2170_v12 }
 0x31c   : > { %v2347_v4 = vpop.f32.mrf.mxu2  ;;  %v2172_v36 = vpop.f32.mrf.mxu0 }
 0x31d   : > { %v2348_v23 = vadd.f32 %v2347_v4, %v2259_v54  ;;  %v2436_v7 = vpop.f32.mrf.mxu3  ;;  %v2173_v33 = vadd.f32 %v2172_v36, %v5612_v28  ;;  %v2261_v14 = vpop.f32.mrf.mxu1 }
 0x31f   : > { %v5757_v25 = vadd.f32 %v2436_v7, %v2348_v23  ;;  %v2262_v26 = vadd.f32 %v2261_v14, %v2173_v33  ;;  %2211 = vmatmul.bf16.gmra.mxu0 %v6407_v49 }
 0x320   : > { %2300 = vmatmul.bf16.gmra.mxu1 %v6408_v16 }
 0x321   : > { %2389 = vmatmul.bf16.gmra.mxu2 %v6409_v27 }
 0x322   : > { %2478 = vmatmul.bf16.gmra.mxu3 %v6410_v41 }
 0x324   : > { %v2350_v56 = vpop.f32.mrf.mxu2  ;;  %v2174_v46 = vpop.f32.mrf.mxu0 }
 0x325   : > { %v2351_v30 = vadd.f32 %v2350_v56, %v2262_v26  ;;  %v2439_v12 = vpop.f32.mrf.mxu3  ;;  %v2175_v54 = vadd.f32 %v2174_v46, %v5612_v28  ;;  %v2263_v4 = vpop.f32.mrf.mxu1  ;;  %v6412_v26 = vld [vmem:[#allocation52_spill] sm:$0xff]  ;;  %v6413_v56 = vld [vmem:[#allocation53_spill] sm:$0xff]  ;;  %v6414_v46 = vld [vmem:[#allocation54_spill] sm:$0xff] }
 0x327   : > { %v5764_v36 = vadd.f32 %v2439_v12, %v2351_v30  ;;  %v2264_v23 = vadd.f32 %v2263_v4, %v2175_v54 }
 0x32c   : > { %v2352_v7 = vpop.f32.mrf.mxu2  ;;  %v2177_v49 = vpop.f32.mrf.mxu0 }
 0x32d   : > { %v2353_v33 = vadd.f32 %v2352_v7, %v2264_v23  ;;  %v2441_v14 = vpop.f32.mrf.mxu3  ;;  %v2178_v16 = vadd.f32 %v2177_v49, %v5612_v28  ;;  %v2266_v34 = vpop.f32.mrf.mxu1 }
 0x32f   : > { %v5767_v27 = vadd.f32 %v2441_v14, %v2353_v33  ;;  %v2267_v41 = vadd.f32 %v2266_v34, %v2178_v16  ;;  %2492 = vmatmul.bf16.vlgmr.msrb.gmra.mxu0 %v6411_v9 }
 0x330   : > { %2581 = vmatmul.bf16.vlgmr.msrb.gmra.mxu1 %v6412_v26 }
 0x331   : > { %2670 = vmatmul.bf16.vlgmr.msrb.gmra.mxu2 %v6413_v56 }
 0x332   : > { %2759 = vmatmul.bf16.vlgmr.msrb.gmra.mxu3 %v6414_v46 }
 0x334   : > { %v2355_v30 = vpop.f32.mrf.mxu2  ;;  %v2179_v4 = vpop.f32.mrf.mxu0 }
 0x335   : > { %v2356_v12 = vadd.f32 %v2355_v30, %v2267_v41  ;;  %v2444_v54 = vpop.f32.mrf.mxu3  ;;  %v2180_v23 = vadd.f32 %v2179_v4, %v5612_v28  ;;  %v2268_v7 = vpop.f32.mrf.mxu1  ;;  %v6416_v41 = vld [vmem:[#allocation56_spill] sm:$0xff]  ;;  %v6417_v30 = vld [vmem:[#allocation57_spill] sm:$0xff]  ;;  %v6418_v4 = vld [vmem:[#allocation58_spill] sm:$0xff] }
 0x337   : > { %v5774_v49 = vadd.f32 %v2444_v54, %v2356_v12  ;;  %v2269_v33 = vadd.f32 %v2268_v7, %v2180_v23 }
 0x33c   : > { %v2357_v14 = vpop.f32.mrf.mxu2  ;;  %v2182_v9 = vpop.f32.mrf.mxu0 }
 0x33d   : > { %v2358_v34 = vadd.f32 %v2357_v14, %v2269_v33  ;;  %v2446_v16 = vpop.f32.mrf.mxu3  ;;  %v2183_v26 = vadd.f32 %v2182_v9, %v5612_v28  ;;  %v2271_v42 = vpop.f32.mrf.mxu1 }
 0x33f   : > { %v5777_v56 = vadd.f32 %v2446_v16, %v2358_v34  ;;  %v2272_v46 = vadd.f32 %v2271_v42, %v2183_v26  ;;  %2497 = vmatmul.bf16.gmra.mxu0 %v6415_v35 }
 0x340   : > { %2586 = vmatmul.bf16.gmra.mxu1 %v6416_v41 }
 0x341   : > { %2675 = vmatmul.bf16.gmra.mxu2 %v6417_v30 }
 0x342   : > { %2764 = vmatmul.bf16.gmra.mxu3 %v6418_v4 }
 0x344   : > { %v2360_v12 = vpop.f32.mrf.mxu2  ;;  %v2184_v7 = vpop.f32.mrf.mxu0 }
 0x345   : > { %v2361_v54 = vadd.f32 %v2360_v12, %v2272_v46  ;;  %v2449_v23 = vpop.f32.mrf.mxu3  ;;  %v2185_v33 = vadd.f32 %v2184_v7, %v5612_v28  ;;  %v2273_v14 = vpop.f32.mrf.mxu1  ;;  %v6420_v46 = vld [vmem:[#allocation60_spill] sm:$0xff]  ;;  %v6421_v12 = vld [vmem:[#allocation61_spill] sm:$0xff]  ;;  %v6422_v7 = vld [vmem:[#allocation62_spill] sm:$0xff] }
 0x347   : > { %v5784_v9 = vadd.f32 %v2449_v23, %v2361_v54  ;;  %v2274_v34 = vadd.f32 %v2273_v14, %v2185_v33 }
 0x34c   : > { %v2362_v16 = vpop.f32.mrf.mxu2  ;;  %v2187_v35 = vpop.f32.mrf.mxu0 }
 0x34d   : > { %v2363_v42 = vadd.f32 %v2362_v16, %v2274_v34  ;;  %v2451_v26 = vpop.f32.mrf.mxu3  ;;  %v2188_v41 = vadd.f32 %v2187_v35, %v5612_v28  ;;  %v2276_v0 = vpop.f32.mrf.mxu1 }
 0x34f   : > { %v5787_v30 = vadd.f32 %v2451_v26, %v2363_v42  ;;  %v2277_v4 = vadd.f32 %v2276_v0, %v2188_v41  ;;  %2502 = vmatmul.bf16.gmra.mxu0 %v6419_v51 }
 0x350   : > { %2591 = vmatmul.bf16.gmra.mxu1 %v6420_v46 }
 0x351   : > { %2680 = vmatmul.bf16.gmra.mxu2 %v6421_v12 }
 0x352   : > { %2769 = vmatmul.bf16.gmra.mxu3 %v6422_v7 }
 0x354   : > { %v2365_v54 = vpop.f32.mrf.mxu2  ;;  %v2189_v14 = vpop.f32.mrf.mxu0 }
 0x355   : > { %v2366_v23 = vadd.f32 %v2365_v54, %v2277_v4  ;;  %v2454_v33 = vpop.f32.mrf.mxu3  ;;  %v2190_v34 = vadd.f32 %v2189_v14, %v5612_v28  ;;  %v2278_v16 = vpop.f32.mrf.mxu1  ;;  %v6424_v4 = vld [vmem:[#allocation64_spill] sm:$0xff]  ;;  %v6425_v54 = vld [vmem:[#allocation65_spill] sm:$0xff]  ;;  %v6426_v14 = vld [vmem:[#allocation66_spill] sm:$0xff] }
 0x357   : > { %v5794_v35 = vadd.f32 %v2454_v33, %v2366_v23  ;;  %v2279_v42 = vadd.f32 %v2278_v16, %v2190_v34 }
 0x35c   : > { %v2367_v26 = vpop.f32.mrf.mxu2  ;;  %v2192_v51 = vpop.f32.mrf.mxu0 }
 0x35d   : > { %v2368_v0 = vadd.f32 %v2367_v26, %v2279_v42  ;;  %v2456_v41 = vpop.f32.mrf.mxu3  ;;  %v2193_v46 = vadd.f32 %v2192_v51, %v5612_v28  ;;  %v2281_v8 = vpop.f32.mrf.mxu1 }
 0x35f   : > { %v5797_v12 = vadd.f32 %v2456_v41, %v2368_v0  ;;  %v2282_v7 = vadd.f32 %v2281_v8, %v2193_v46  ;;  %2507 = vmatmul.bf16.gmra.mxu0 %v6423_v55 }
 0x360   : > { %2596 = vmatmul.bf16.gmra.mxu1 %v6424_v4 }
 0x361   : > { %2685 = vmatmul.bf16.gmra.mxu2 %v6425_v54 }
 0x362   : > { %2774 = vmatmul.bf16.gmra.mxu3 %v6426_v14 }
 0x364   : > { %v2370_v23 = vpop.f32.mrf.mxu2  ;;  %v2194_v16 = vpop.f32.mrf.mxu0 }
 0x365   : > { %v2371_v33 = vadd.f32 %v2370_v23, %v2282_v7  ;;  %v2459_v34 = vpop.f32.mrf.mxu3  ;;  %v2195_v42 = vadd.f32 %v2194_v16, %v5612_v28  ;;  %v2283_v26 = vpop.f32.mrf.mxu1  ;;  %v6430_v7 = vld [vmem:[#allocation68_spill] sm:$0xff]  ;;  %v6431_v23 = vld [vmem:[#allocation69_spill] sm:$0xff]  ;;  %v6432_v16 = vld [vmem:[#allocation70_spill] sm:$0xff] }
 0x367   : > { %v5804_v51 = vadd.f32 %v2459_v34, %v2371_v33  ;;  %v2284_v0 = vadd.f32 %v2283_v26, %v2195_v42 }
 0x369   : > { %6427 = vst [vmem:[#allocation9_spill] sm:$0xff] %v5804_v51  ;;  %v6435_v51 = vld [vmem:[#allocation71_spill] sm:$0xff] }
 0x36c   : > { %v2372_v41 = vpop.f32.mrf.mxu2  ;;  %v2197_v55 = vpop.f32.mrf.mxu0 }
 0x36d   : > { %v2373_v8 = vadd.f32 %v2372_v41, %v2284_v0  ;;  %v2461_v46 = vpop.f32.mrf.mxu3  ;;  %v2198_v4 = vadd.f32 %v2197_v55, %v5612_v28  ;;  %v2286_v58 = vpop.f32.mrf.mxu1 }
 0x36f   : > { %v5807_v54 = vadd.f32 %v2461_v46, %v2373_v8  ;;  %v2287_v14 = vadd.f32 %v2286_v58, %v2198_v4  ;;  %2512 = vmatmul.bf16.gmra.mxu0 %v6429_v21 }
 0x370   : > { %2601 = vmatmul.bf16.gmra.mxu1 %v6430_v7 }
 0x371   : > { %6428 = vst [vmem:[#allocation10_spill] sm:$0xff] %v5807_v54  ;;  %2690 = vmatmul.bf16.gmra.mxu2 %v6431_v23 }
 0x372   : > { %2779 = vmatmul.bf16.gmra.mxu3 %v6432_v16 }
 0x374   : > { %v2375_v33 = vpop.f32.mrf.mxu2  ;;  %v2199_v26 = vpop.f32.mrf.mxu0 }
 0x375   : > { %v2376_v34 = vadd.f32 %v2375_v33, %v2287_v14  ;;  %v2464_v42 = vpop.f32.mrf.mxu3  ;;  %v2200_v0 = vadd.f32 %v2199_v26, %v5612_v28  ;;  %v2288_v41 = vpop.f32.mrf.mxu1  ;;  %v6436_v14 = vld [vmem:[#allocation72_spill] sm:$0xff]  ;;  %v6437_v33 = vld [vmem:[#allocation73_spill] sm:$0xff]  ;;  %v6438_v26 = vld [vmem:[#allocation74_spill] sm:$0xff] }
 0x377   : > { %v5814_v55 = vadd.f32 %v2464_v42, %v2376_v34  ;;  %v2289_v8 = vadd.f32 %v2288_v41, %v2200_v0 }
 0x379   : > { %6433 = vst [vmem:[#allocation81_spill] sm:$0xff] %v5814_v55  ;;  %v6441_v55 = vld [vmem:[#allocation77_spill] sm:$0xff] }
 0x37c   : > { %v2377_v46 = vpop.f32.mrf.mxu2  ;;  %v2202_v21 = vpop.f32.mrf.mxu0 }
 0x37d   : > { %v2378_v58 = vadd.f32 %v2377_v46, %v2289_v8  ;;  %v2466_v4 = vpop.f32.mrf.mxu3  ;;  %v2203_v7 = vadd.f32 %v2202_v21, %v5612_v28  ;;  %v2291_v54 = vpop.f32.mrf.mxu1 }
 0x37f   : > { %v5817_v23 = vadd.f32 %v2466_v4, %v2378_v58  ;;  %v2292_v16 = vadd.f32 %v2291_v54, %v2203_v7  ;;  %2517 = vmatmul.bf16.gmra.mxu0 %v6435_v51 }
 0x380   : > { %2606 = vmatmul.bf16.gmra.mxu1 %v6436_v14 }
 0x381   : > { %6434 = vst [vmem:[#allocation82_spill] sm:$0xff] %v5817_v23  ;;  %2695 = vmatmul.bf16.gmra.mxu2 %v6437_v33 }
 0x382   : > { %2784 = vmatmul.bf16.gmra.mxu3 %v6438_v26 }
 0x384   : > { %v2380_v34 = vpop.f32.mrf.mxu2  ;;  %v2204_v41 = vpop.f32.mrf.mxu0 }
 0x385   : > { %v2381_v42 = vadd.f32 %v2380_v34, %v2292_v16  ;;  %v2469_v0 = vpop.f32.mrf.mxu3  ;;  %v2205_v8 = vadd.f32 %v2204_v41, %v5612_v28  ;;  %v2293_v46 = vpop.f32.mrf.mxu1  ;;  %v6442_v16 = vld [vmem:[#allocation78_spill] sm:$0xff]  ;;  %v6443_v34 = vld [vmem:[#allocation79_spill] sm:$0xff]  ;;  %v6444_v41 = vld [vmem:[#allocation80_spill] sm:$0xff] }
 0x387   : > { %v5824_v21 = vadd.f32 %v2469_v0, %v2381_v42  ;;  %v2294_v58 = vadd.f32 %v2293_v46, %v2205_v8 }
 0x389   : > { %6439 = vst [vmem:[#allocation11_spill] sm:$0xff] %v5824_v21  ;;  %v6446_v21 = vld [vmem:[#allocation83_spill] sm:$0xff] }
 0x38c   : > { %v2382_v4 = vpop.f32.mrf.mxu2  ;;  %v2207_v51 = vpop.f32.mrf.mxu0 }
 0x38d   : > { %v2383_v54 = vadd.f32 %v2382_v4, %v2294_v58  ;;  %v2471_v7 = vpop.f32.mrf.mxu3  ;;  %v2208_v14 = vadd.f32 %v2207_v51, %v5612_v28  ;;  %v2296_v23 = vpop.f32.mrf.mxu1 }
 0x38f   : > { %v5827_v33 = vadd.f32 %v2471_v7, %v2383_v54  ;;  %v2297_v26 = vadd.f32 %v2296_v23, %v2208_v14  ;;  %2522 = vmatmul.bf16.gmra.mxu0 %v6441_v55 }
 0x390   : > { %2611 = vmatmul.bf16.gmra.mxu1 %v6442_v16 }
 0x391   : > { %6440 = vst [vmem:[#allocation12_spill] sm:$0xff] %v5827_v33  ;;  %2700 = vmatmul.bf16.gmra.mxu2 %v6443_v34 }
 0x392   : > { %2789 = vmatmul.bf16.gmra.mxu3 %v6444_v41 }
 0x394   : > { %v2385_v42 = vpop.f32.mrf.mxu2  ;;  %v2209_v46 = vpop.f32.mrf.mxu0 }
 0x395   : > { %v2386_v0 = vadd.f32 %v2385_v42, %v2297_v26  ;;  %v2474_v8 = vpop.f32.mrf.mxu3  ;;  %v2210_v58 = vadd.f32 %v2209_v46, %v5612_v28  ;;  %v2298_v4 = vpop.f32.mrf.mxu1  ;;  %v6447_v26 = vld [vmem:[#allocation84_spill] sm:$0xff]  ;;  %v6448_v42 = vld [vmem:[#allocation85_spill] sm:$0xff]  ;;  %v6449_v46 = vld [vmem:[#allocation86_spill] sm:$0xff] }
 0x397   : > { %v5834_v51 = vadd.f32 %v2474_v8, %v2386_v0  ;;  %v2299_v54 = vadd.f32 %v2298_v4, %v2210_v58 }
 0x39c   : > { %v2387_v7 = vpop.f32.mrf.mxu2  ;;  %v2212_v55 = vpop.f32.mrf.mxu0 }
 0x39d   : > { %v2388_v23 = vadd.f32 %v2387_v7, %v2299_v54  ;;  %v2476_v14 = vpop.f32.mrf.mxu3  ;;  %v2213_v16 = vadd.f32 %v2212_v55, %v5612_v28  ;;  %v2301_v33 = vpop.f32.mrf.mxu1 }
 0x39f   : > { %v5837_v34 = vadd.f32 %v2476_v14, %v2388_v23  ;;  %v2302_v41 = vadd.f32 %v2301_v33, %v2213_v16  ;;  %2527 = vmatmul.bf16.gmra.mxu0 %v6446_v21 }
 0x3a0   : > { %2616 = vmatmul.bf16.gmra.mxu1 %v6447_v26 }
 0x3a1   : > { %6445 = vst [vmem:[#allocation13_spill] sm:$0xff] %v5837_v34  ;;  %2705 = vmatmul.bf16.gmra.mxu2 %v6448_v42 }
 0x3a2   : > { %2794 = vmatmul.bf16.gmra.mxu3 %v6449_v46  ;;  %v6450_v46 = vld [vmem:[#allocation87_spill] sm:$0xff] }
 0x3a4   : > { %v2390_v0 = vpop.f32.mrf.mxu2  ;;  %v2214_v4 = vpop.f32.mrf.mxu0 }
 0x3a5   : > { %v2391_v8 = vadd.f32 %v2390_v0, %v2302_v41  ;;  %v2479_v58 = vpop.f32.mrf.mxu3  ;;  %v2215_v54 = vadd.f32 %v2214_v4, %v5612_v28  ;;  %v2303_v7 = vpop.f32.mrf.mxu1  ;;  %v6451_v41 = vld [vmem:[#allocation88_spill] sm:$0xff]  ;;  %v6452_v0 = vld [vmem:[#allocation89_spill] sm:$0xff]  ;;  %v6453_v28 = vld [vmem:[#allocation90_spill] sm:$0xff] }
 0x3a7   : > { %v5844_v55 = vadd.f32 %v2479_v58, %v2391_v8  ;;  %v2304_v23 = vadd.f32 %v2303_v7, %v2215_v54 }
 0x3ac   : > { %v2392_v14 = vpop.f32.mrf.mxu2  ;;  %v2493_v21 = vpop.f32.mrf.mxu0 }
 0x3ad   : > { %v2393_v33 = vadd.f32 %v2392_v14, %v2304_v23  ;;  %v2481_v16 = vpop.f32.mrf.mxu3  ;;  %v2582_v34 = vpop.f32.mrf.mxu1  ;;  %v2494_v42 = vadd.f32 %v2493_v21, %v5640_v50  ;;  %v6454_v14 = vld [vmem:[#allocation91_spill] sm:$0xff] }
 0x3ae   : > { %3857 = vtanh.f32 %v6454_v14  ;;  %v2904_v50 = vld [vmem:[%s6126_s3] sm:$0x3] }
 0x3af   : > { %v5846_v26 = vadd.f32 %v2481_v16, %v2393_v33  ;;  %2532 = vmatmul.bf16.gmra.mxu0 %v6450_v46  ;;  %v2583_v8 = vadd.f32 %v2582_v34, %v2494_v42  ;;  %v5860_v34 = vperm.slane %v2904_v50, 1 }
 0x3b0   : > { %2621 = vmatmul.bf16.gmra.mxu1 %v6451_v41  ;;  %v5858_v41 = vperm.slane %v2904_v50, 0 }
 0x3b1   : > { %2710 = vmatmul.bf16.gmra.mxu2 %v6452_v0 }
 0x3b2   : > { %2799 = vmatmul.bf16.gmra.mxu3 %v6453_v28 }
 0x3b4   : > { %v2671_v58 = vpop.f32.mrf.mxu2  ;;  %v2495_v7 = vpop.f32.mrf.mxu0 }
 0x3b5   : > { %v2672_v4 = vadd.f32 %v2671_v58, %v2583_v8  ;;  %v2760_v54 = vpop.f32.mrf.mxu3  ;;  %v2584_v23 = vpop.f32.mrf.mxu1  ;;  %v2496_v16 = vadd.f32 %v2495_v7, %v5649_v47 }
 0x3b6   : > { %v3858_v42 = vpop.eup %3857 }
 0x3b7   : > { %v2761_v33 = vadd.f32 %v2760_v54, %v2672_v4  ;;  %v2585_v21 = vadd.f32 %v2584_v23, %v2496_v16  ;;  %v2910_v54 = vmul.f32 %v3858_v42, %v5858_v41  ;;  %v6455_v23 = vld [vmem:[#allocation92_spill] sm:$0xff]  ;;  %v6457_v16 = vld [vmem:[#allocation94_spill] sm:$0xff] }
 0x3b9   : > { %3859 = vtanh.f32 %v2761_v33  ;;  %v6456_v33 = vld [vmem:[#allocation93_spill] sm:$0xff] }
 0x3ba   : > { %3861 = vtanh.f32 %v5196_v44 }
 0x3bc   : > { %v2673_v46 = vpop.f32.mrf.mxu2  ;;  %v2498_v8 = vpop.f32.mrf.mxu0 }
 0x3bd   : > { %v2674_v0 = vadd.f32 %v2673_v46, %v2585_v21  ;;  %v2762_v28 = vpop.f32.mrf.mxu3  ;;  %v2587_v58 = vpop.f32.mrf.mxu1  ;;  %v2499_v4 = vadd.f32 %v2498_v8, %v5656_v11 }
 0x3bf   : > { %v3860_v14 = vpop.eup %3859  ;;  %v2763_v47 = vadd.f32 %v2762_v28, %v2674_v0  ;;  %2537 = vmatmul.bf16.gmra.mxu0 %v5187_v29  ;;  %v2588_v21 = vadd.f32 %v2587_v58, %v2499_v4 }
 0x3c0   : > { %v2911_v7 = vmul.f32 %v3860_v14, %v5860_v34  ;;  %2626 = vmatmul.bf16.gmra.mxu1 %v6455_v23  ;;  %v3862_v44 = vpop.eup %3861 }
 0x3c1   : > { %3863 = vtanh.f32 %v2763_v47  ;;  %2715 = vmatmul.bf16.gmra.mxu2 %v6456_v33  ;;  %v2912_v47 = vmul.f32 %v3862_v44, %v5858_v41 }
 0x3c2   : > { %2804 = vmatmul.bf16.gmra.mxu3 %v6457_v16  ;;  %v2974_v50 = vadd.f32 %v2911_v7, %v2910_v54  ;;  %3865 = vtanh.f32 %v5203_v37 }
 0x3c4   : > { %v2676_v46 = vpop.f32.mrf.mxu2  ;;  %2975 = vadd.xlane.f32.xlu0 %v2974_v50  ;;  %v2500_v28 = vpop.f32.mrf.mxu0 }
 0x3c5   : > { %v2677_v0 = vadd.f32 %v2676_v46, %v2588_v21  ;;  %v2765_v11 = vpop.f32.mrf.mxu3  ;;  %v2589_v29 = vpop.f32.mrf.mxu1  ;;  %v2501_v14 = vadd.f32 %v2500_v28, %v5659_v63  ;;  %v6459_v28 = vld [vmem:[#allocation96_spill] sm:$0xff] }
 0x3c7   : > { %v3864_v8 = vpop.eup %3863  ;;  %v2766_v42 = vadd.f32 %v2765_v11, %v2677_v0  ;;  %v2590_v58 = vadd.f32 %v2589_v29, %v2501_v14  ;;  %v6458_v0 = vld [vmem:[#allocation95_spill] sm:$0xff]  ;;  %v6460_v29 = vld [vmem:[#allocation97_spill] sm:$0xff] }
 0x3c8   : > { %v2913_v23 = vmul.f32 %v3864_v8, %v5860_v34  ;;  %v3866_v7 = vpop.eup %3865  ;;  %v6461_v8 = vld [vmem:[#allocation98_spill] sm:$0xff] }
 0x3c9   : > { %3867 = vtanh.f32 %v2766_v42  ;;  %v2914_v44 = vmul.f32 %v3866_v7, %v5858_v41  ;;  %v6462_v7 = vld [vmem:[#allocation99_spill] sm:$0xff] }
 0x3ca   : > { %v2977_v54 = vadd.f32 %v2913_v23, %v2912_v47  ;;  %3869 = vtanh.f32 %v5222_v48 }
 0x3cc   : > { %v2678_v4 = vpop.f32.mrf.mxu2  ;;  %2978 = vadd.xlane.f32.xlu0 %v2977_v54  ;;  %v2503_v50 = vpop.f32.mrf.mxu0 }
 0x3cd   : > { %v2679_v33 = vadd.f32 %v2678_v4, %v2590_v58  ;;  %v2767_v16 = vpop.f32.mrf.mxu3  ;;  %v2592_v21 = vpop.f32.mrf.mxu1  ;;  %v2504_v63 = vadd.f32 %v2503_v50, %v5684_v20 }
 0x3cf   : > { %v3868_v46 = vpop.eup %3867  ;;  %v2768_v37 = vadd.f32 %v2767_v16, %v2679_v33  ;;  %2542 = vmatmul.bf16.gmra.mxu0 %v6458_v0  ;;  %v2593_v14 = vadd.f32 %v2592_v21, %v2504_v63 }
 0x3d0   : > { %v2915_v11 = vmul.f32 %v3868_v46, %v5860_v34  ;;  %2631 = vmatmul.bf16.gmra.mxu1 %v6459_v28  ;;  %v3870_v48 = vpop.eup %3869 }
 0x3d1   : > { %3871 = vtanh.f32 %v2768_v37  ;;  %2720 = vmatmul.bf16.gmra.mxu2 %v6460_v29  ;;  %v2916_v50 = vmul.f32 %v3870_v48, %v5858_v41  ;;  %v6463_v48 = vld [vmem:[#allocation100_spill] sm:$0xff] }
 0x3d2   : > { %2809 = vmatmul.bf16.gmra.mxu3 %v6461_v8  ;;  %v2980_v42 = vadd.f32 %v2915_v11, %v2914_v44  ;;  %3873 = vtanh.f32 %v6462_v7 }
 0x3d4   : > { %v2681_v47 = vpop.f32.mrf.mxu2  ;;  %2981 = vadd.xlane.f32.xlu1 %v2980_v42  ;;  %v2505_v54 = vpop.f32.mrf.mxu0 }
 0x3d5   : > { %v2682_v23 = vadd.f32 %v2681_v47, %v2593_v14  ;;  %v2770_v20 = vpop.f32.mrf.mxu3  ;;  %v2594_v58 = vpop.f32.mrf.mxu1  ;;  %v2506_v16 = vadd.f32 %v2505_v54, %v5693_v6 }
 0x3d7   : > { %v3872_v4 = vpop.eup %3871  ;;  %v2771_v33 = vadd.f32 %v2770_v20, %v2682_v23  ;;  %v2595_v21 = vadd.f32 %v2594_v58, %v2506_v16  ;;  %v6464_v23 = vld [vmem:[#allocation101_spill] sm:$0xff]  ;;  %v6465_v20 = vld [vmem:[#allocation102_spill] sm:$0xff] }
 0x3d8   : > { %v2917_v46 = vmul.f32 %v3872_v4, %v5860_v34  ;;  %v3874_v0 = vpop.eup %3873 }
 0x3d9   : > { %3875 = vtanh.f32 %v2771_v33  ;;  %v2918_v14 = vmul.f32 %v3874_v0, %v5858_v41 }
 0x3da   : > { %v2983_v37 = vadd.f32 %v2917_v46, %v2916_v50  ;;  %3877 = vtanh.f32 %v5272_v32 }
 0x3dc   : > { %v2683_v63 = vpop.f32.mrf.mxu2  ;;  %2984 = vadd.xlane.f32.xlu1 %v2983_v37  ;;  %v2508_v28 = vpop.f32.mrf.mxu0 }
 0x3dd   : > { %v2684_v44 = vadd.f32 %v2683_v63, %v2595_v21  ;;  %v2772_v11 = vpop.f32.mrf.mxu3  ;;  %v2597_v29 = vpop.f32.mrf.mxu1  ;;  %v2509_v6 = vadd.f32 %v2508_v28, %v5700_v22 }
 0x3df   : > { %v3876_v8 = vpop.eup %3875  ;;  %v2773_v42 = vadd.f32 %v2772_v11, %v2684_v44  ;;  %2547 = vmatmul.bf16.gmra.mxu0 %v5263_v2  ;;  %v2598_v58 = vadd.f32 %v2597_v29, %v2509_v6 }
 0x3e0   : > { %v2919_v47 = vmul.f32 %v3876_v8, %v5860_v34  ;;  %2636 = vmatmul.bf16.gmra.mxu1 %v6463_v48  ;;  %v3878_v32 = vpop.eup %3877 }
 0x3e1   : > { %3879 = vtanh.f32 %v2773_v42  ;;  %2725 = vmatmul.bf16.gmra.mxu2 %v6464_v23  ;;  %v2920_v37 = vmul.f32 %v3878_v32, %v5858_v41  ;;  %v6467_v23 = vld [vmem:[#allocation104_spill] sm:$0xff] }
 0x3e2   : > { %2814 = vmatmul.bf16.gmra.mxu3 %v6465_v20  ;;  %v2986_v54 = vadd.f32 %v2919_v47, %v2918_v14  ;;  %3881 = vtanh.f32 %v5279_v39  ;;  %v6466_v14 = vld [vmem:[#allocation103_spill] sm:$0xff]  ;;  %v6468_v20 = vld [vmem:[#allocation105_spill] sm:$0xff] }
 0x3e4   : > { %v2686_v4 = vpop.f32.mrf.mxu2  ;;  %2987 = vadd.xlane.f32.xlu2 %v2986_v54  ;;  %v2510_v33 = vpop.f32.mrf.mxu0  ;;  %v6469_v54 = vld [vmem:[#allocation106_spill] sm:$0xff] }
 0x3e5   : > { %v2687_v7 = vadd.f32 %v2686_v4, %v2598_v58  ;;  %v2775_v22 = vpop.f32.mrf.mxu3  ;;  %v2599_v2 = vpop.f32.mrf.mxu1  ;;  %v2511_v46 = vadd.f32 %v2510_v33, %v5703_v40 }
 0x3e7   : > { %v3880_v16 = vpop.eup %3879  ;;  %v2776_v50 = vadd.f32 %v2775_v22, %v2687_v7  ;;  %v2600_v0 = vadd.f32 %v2599_v2, %v2511_v46 }
 0x3e8   : > { %v2921_v21 = vmul.f32 %v3880_v16, %v5860_v34  ;;  %v3882_v11 = vpop.eup %3881  ;;  %v6470_v16 = vld [vmem:[#allocation107_spill] sm:$0xff] }
 0x3e9   : > { %3883 = vtanh.f32 %v2776_v50  ;;  %v2922_v47 = vmul.f32 %v3882_v11, %v5858_v41 }
 0x3ea   : > { %v2989_v63 = vadd.f32 %v2921_v21, %v2920_v37  ;;  %3885 = vtanh.f32 %v5298_v18 }
 0x3ec   : > { %v2688_v44 = vpop.f32.mrf.mxu2  ;;  %2990 = vadd.xlane.f32.xlu2 %v2989_v63  ;;  %v2513_v8 = vpop.f32.mrf.mxu0 }
 0x3ed   : > { %v2689_v28 = vadd.f32 %v2688_v44, %v2600_v0  ;;  %v2777_v29 = vpop.f32.mrf.mxu3  ;;  %v2602_v42 = vpop.f32.mrf.mxu1  ;;  %v2514_v40 = vadd.f32 %v2513_v8, %v5728_v31 }
 0x3ef   : > { %v3884_v6 = vpop.eup %3883  ;;  %v2778_v39 = vadd.f32 %v2777_v29, %v2689_v28  ;;  %2552 = vmatmul.bf16.gmra.mxu0 %v6466_v14  ;;  %v2603_v4 = vadd.f32 %v2602_v42, %v2514_v40 }
 0x3f0   : > { %v2923_v48 = vmul.f32 %v3884_v6, %v5860_v34  ;;  %2641 = vmatmul.bf16.gmra.mxu1 %v6467_v23  ;;  %v3886_v18 = vpop.eup %3885  ;;  %v6473_v23 = vld [vmem:[#allocation110_spill] sm:$0xff] }
 0x3f1   : > { %3887 = vtanh.f32 %v2778_v39  ;;  %2730 = vmatmul.bf16.gmra.mxu2 %v6468_v20  ;;  %v2924_v37 = vmul.f32 %v3886_v18, %v5858_v41 }
 0x3f2   : > { %2819 = vmatmul.bf16.gmra.mxu3 %v6469_v54  ;;  %v2992_v58 = vadd.f32 %v2923_v48, %v2922_v47  ;;  %3889 = vtanh.f32 %v6470_v16  ;;  %v6471_v47 = vld [vmem:[#allocation108_spill] sm:$0xff]  ;;  %v6472_v48 = vld [vmem:[#allocation109_spill] sm:$0xff] }
 0x3f4   : > { %v2691_v32 = vpop.f32.mrf.mxu2  ;;  %2993 = vadd.xlane.f32.xlu0 %v2992_v58  ;;  %v2515_v22 = vpop.f32.mrf.mxu0 }
 0x3f5   : > { %v2692_v7 = vadd.f32 %v2691_v32, %v2603_v4  ;;  %v2780_v31 = vpop.f32.mrf.mxu3  ;;  %v2604_v33 = vpop.f32.mrf.mxu1  ;;  %v2516_v46 = vadd.f32 %v2515_v22, %v5737_v13 }
 0x3f7   : > { %v3888_v2 = vpop.eup %3887  ;;  %v2781_v50 = vadd.f32 %v2780_v31, %v2692_v7  ;;  %v2605_v0 = vadd.f32 %v2604_v33, %v2516_v46 }
 0x3f8   : > { %v2925_v21 = vmul.f32 %v3888_v2, %v5860_v34  ;;  %v3890_v11 = vpop.eup %3889 }
 0x3f9   : > { %3891 = vtanh.f32 %v2781_v50  ;;  %v2926_v40 = vmul.f32 %v3890_v11, %v5858_v41  ;;  %v6474_v11 = vld [vmem:[#allocation115_spill] sm:$0xff] }
 0x3fa   : > { %v2995_v63 = vadd.f32 %v2925_v21, %v2924_v37  ;;  %3893 = vtanh.f32 %v5348_v38 }
 0x3fc   : > { %v2693_v44 = vpop.f32.mrf.mxu2  ;;  %2996 = vadd.xlane.f32.xlu1 %v2995_v63  ;;  %v2518_v8 = vpop.f32.mrf.mxu0 }
 0x3fd   : > { %v2694_v28 = vadd.f32 %v2693_v44, %v2605_v0  ;;  %v2782_v29 = vpop.f32.mrf.mxu3  ;;  %v2607_v42 = vpop.f32.mrf.mxu1  ;;  %v2519_v13 = vadd.f32 %v2518_v8, %v5744_v52 }
 0x3ff   : > { %v3892_v6 = vpop.eup %3891  ;;  %v2783_v39 = vadd.f32 %v2782_v29, %v2694_v28  ;;  %2557 = vmatmul.bf16.gmra.mxu0 %v5339_v1  ;;  %v2608_v54 = vadd.f32 %v2607_v42, %v2519_v13  ;;  %v6475_v28 = vld [vmem:[#allocation111_spill] sm:$0xff]  ;;  %v6476_v42 = vld [vmem:[#allocation112_spill] sm:$0xff] }
 0x400   : > { %v2927_v14 = vmul.f32 %v3892_v6, %v5860_v34  ;;  %2646 = vmatmul.bf16.gmra.mxu1 %v6471_v47  ;;  %v3894_v38 = vpop.eup %3893  ;;  %v6477_v6 = vld [vmem:[#allocation113_spill] sm:$0xff] }
 0x401   : > { %3895 = vtanh.f32 %v2783_v39  ;;  %2735 = vmatmul.bf16.gmra.mxu2 %v6472_v48  ;;  %v2928_v22 = vmul.f32 %v3894_v38, %v5858_v41  ;;  %v6478_v39 = vld [vmem:[#allocation114_spill] sm:$0xff] }
 0x402   : > { %2824 = vmatmul.bf16.gmra.mxu3 %v6473_v23  ;;  %v2998_v20 = vadd.f32 %v2927_v14, %v2926_v40  ;;  %3897 = vtanh.f32 %v5355_v59 }
 0x404   : > { %v2696_v58 = vpop.f32.mrf.mxu2  ;;  %2999 = vadd.xlane.f32.xlu2 %v2998_v20  ;;  %v2520_v32 = vpop.f32.mrf.mxu0 }
 0x405   : > { %v2697_v4 = vadd.f32 %v2696_v58, %v2608_v54  ;;  %v2785_v52 = vpop.f32.mrf.mxu3  ;;  %v2609_v1 = vpop.f32.mrf.mxu1  ;;  %v2521_v31 = vadd.f32 %v2520_v32, %v5747_v61  ;;  %v6479_v58 = vld [vmem:[#allocation116_spill] sm:$0xff] }
 0x407   : > { %v3896_v18 = vpop.eup %3895  ;;  %v2786_v7 = vadd.f32 %v2785_v52, %v2697_v4  ;;  %v2610_v16 = vadd.f32 %v2609_v1, %v2521_v31 }
 0x408   : > { %v2929_v33 = vmul.f32 %v3896_v18, %v5860_v34  ;;  %v3898_v46 = vpop.eup %3897 }
 0x409   : > { %3899 = vtanh.f32 %v2786_v7  ;;  %v2930_v29 = vmul.f32 %v3898_v46, %v5858_v41 }
 0x40a   : > { %v3001_v2 = vadd.f32 %v2929_v33, %v2928_v22  ;;  %3901 = vtanh.f32 %v6474_v11 }
 0x40c   : > { %v2698_v50 = vpop.f32.mrf.mxu2  ;;  %3002 = vadd.xlane.f32.xlu0 %v3001_v2  ;;  %v2523_v63 = vpop.f32.mrf.mxu0 }
 0x40d   : > { %v2699_v37 = vadd.f32 %v2698_v50, %v2610_v16  ;;  %v2787_v21 = vpop.f32.mrf.mxu3  ;;  %v2612_v0 = vpop.f32.mrf.mxu1  ;;  %v2524_v61 = vadd.f32 %v2523_v63, %v5754_v53 }
 0x40f   : > { %v3900_v44 = vpop.eup %3899  ;;  %v2788_v59 = vadd.f32 %v2787_v21, %v2699_v37  ;;  %2562 = vmatmul.bf16.gmra.mxu0 %v6475_v28  ;;  %v2613_v40 = vadd.f32 %v2612_v0, %v2524_v61 }
 0x410   : > { %v2931_v8 = vmul.f32 %v3900_v44, %v5860_v34  ;;  %2651 = vmatmul.bf16.gmra.mxu1 %v6476_v42  ;;  %v3902_v47 = vpop.eup %3901 }
 0x411   : > { %3903 = vtanh.f32 %v2788_v59  ;;  %2740 = vmatmul.bf16.gmra.mxu2 %v6477_v6  ;;  %v2932_v52 = vmul.f32 %v3902_v47, %v5858_v41 }
 0x412   : > { %2829 = vmatmul.bf16.gmra.mxu3 %v6478_v39  ;;  %v3004_v13 = vadd.f32 %v2931_v8, %v2930_v29  ;;  %3905 = vtanh.f32 %v6479_v58  ;;  %v5952_v58 = vld [vmem:[#allocation2] ss:$0 sm:$0xff] }
 0x414   : > { %v2701_v14 = vpop.f32.mrf.mxu2  ;;  %3005 = vadd.xlane.f32.xlu1 %v3004_v13  ;;  %v2525_v23 = vpop.f32.mrf.mxu0 }
 0x415   : > { %v2702_v48 = vadd.f32 %v2701_v14, %v2613_v40  ;;  %v2790_v53 = vpop.f32.mrf.mxu3  ;;  %v2614_v20 = vpop.f32.mrf.mxu1  ;;  %v2526_v4 = vadd.f32 %v2525_v23, %v5757_v25 }
 0x417   : > { %v3904_v54 = vpop.eup %3903  ;;  %v2791_v38 = vadd.f32 %v2790_v53, %v2702_v48  ;;  %v2615_v18 = vadd.f32 %v2614_v20, %v2526_v4 }
 0x418   : > { %v2933_v32 = vmul.f32 %v3904_v54, %v5860_v34  ;;  %v3906_v31 = vpop.eup %3905 }
 0x419   : > { %3907 = vtanh.f32 %v2791_v38  ;;  %v2934_v37 = vmul.f32 %v3906_v31, %v5858_v41 }
 0x41a   : > { %v3007_v1 = vadd.f32 %v2933_v32, %v2932_v52  ;;  %3909 = vtanh.f32 %v5424_v17 }
 0x41c   : > { %v2703_v7 = vpop.f32.mrf.mxu2  ;;  %3008 = vadd.xlane.f32.xlu2 %v3007_v1  ;;  %v2528_v2 = vpop.f32.mrf.mxu0 }
 0x41d   : > { %v2704_v22 = vadd.f32 %v2703_v7, %v2615_v18  ;;  %v2792_v33 = vpop.f32.mrf.mxu3  ;;  %v2617_v16 = vpop.f32.mrf.mxu1  ;;  %v2529_v25 = vadd.f32 %v2528_v2, %v5764_v36 }
 0x41f   : > { %v3908_v50 = vpop.eup %3907  ;;  %v2793_v46 = vadd.f32 %v2792_v33, %v2704_v22  ;;  %2567 = vmatmul.bf16.gmra.mxu0 %v5415_v5  ;;  %v2618_v0 = vadd.f32 %v2617_v16, %v2529_v25 }
 0x420   : > { %v2935_v21 = vmul.f32 %v3908_v50, %v5860_v34  ;;  %2656 = vmatmul.bf16.gmra.mxu1 %v5417_v60  ;;  %v3910_v17 = vpop.eup %3909 }
 0x421   : > { %3911 = vtanh.f32 %v2793_v46  ;;  %2745 = vmatmul.bf16.gmra.mxu2 %v5419_v43  ;;  %v2936_v43 = vmul.f32 %v3910_v17, %v5858_v41 }
 0x422   : > { %2834 = vmatmul.bf16.gmra.mxu3 %v5422_v3  ;;  %v3010_v63 = vadd.f32 %v2935_v21, %v2934_v37  ;;  %3913 = vtanh.f32 %v5431_v45 }
 0x424   : > { %v2706_v44 = vpop.f32.mrf.mxu2  ;;  %3011 = vadd.xlane.f32.xlu0 %v3010_v63  ;;  %v2530_v5 = vpop.f32.mrf.mxu0 }
 0x425   : > { %v2707_v36 = vadd.f32 %v2706_v44, %v2618_v0  ;;  %v2795_v11 = vpop.f32.mrf.mxu3  ;;  %v2619_v59 = vpop.f32.mrf.mxu1  ;;  %v2531_v60 = vadd.f32 %v2530_v5, %v5767_v27 }
 0x427   : > { %v3912_v61 = vpop.eup %3911  ;;  %v2796_v28 = vadd.f32 %v2795_v11, %v2707_v36  ;;  %v2620_v8 = vadd.f32 %v2619_v59, %v2531_v60 }
 0x428   : > { %v2937_v3 = vmul.f32 %v3912_v61, %v5860_v34  ;;  %v3914_v6 = vpop.eup %3913 }
 0x429   : > { %3915 = vtanh.f32 %v2796_v28  ;;  %v2938_v48 = vmul.f32 %v3914_v6, %v5858_v41 }
 0x42a   : > { %v3013_v29 = vadd.f32 %v2937_v3, %v2936_v43  ;;  %3917 = vtanh.f32 %v5434_v62 }
 0x42c   : > { %v2708_v42 = vpop.f32.mrf.mxu2  ;;  %3014 = vadd.xlane.f32.xlu1 %v3013_v29  ;;  %v2533_v40 = vpop.f32.mrf.mxu0 }
 0x42d   : > { %v2709_v39 = vadd.f32 %v2708_v42, %v2620_v8  ;;  %v2797_v13 = vpop.f32.mrf.mxu3  ;;  %v2622_v14 = vpop.f32.mrf.mxu1  ;;  %v2534_v47 = vadd.f32 %v2533_v40, %v5774_v49 }
 0x42f   : > { %v3916_v45 = vpop.eup %3915  ;;  %v2798_v27 = vadd.f32 %v2797_v13, %v2709_v39  ;;  %v2623_v20 = vadd.f32 %v2622_v14, %v2534_v47 }
 0x430   : > { %v2939_v53 = vmul.f32 %v3916_v45, %v5860_v34  ;;  %v3918_v38 = vpop.eup %3917 }
 0x431   : > { %3919 = vtanh.f32 %v2798_v27  ;;  %v2940_v22 = vmul.f32 %v3918_v38, %v5858_v41 }
 0x432   : > { %v3016_v23 = vadd.f32 %v2939_v53, %v2938_v48  ;;  %3921 = vtanh.f32 %v5459_v24 }
 0x434   : > { %v2711_v54 = vpop.f32.mrf.mxu2  ;;  %3017 = vadd.xlane.f32.xlu2 %v3016_v23  ;;  %v2535_v62 = vpop.f32.mrf.mxu0 }
 0x435   : > { %v2712_v4 = vadd.f32 %v2711_v54, %v2623_v20  ;;  %v2800_v52 = vpop.f32.mrf.mxu3  ;;  %v2624_v32 = vpop.f32.mrf.mxu1  ;;  %v2536_v18 = vadd.f32 %v2535_v62, %v5777_v56 }
 0x437   : > { %v3920_v1 = vpop.eup %3919  ;;  %v2801_v49 = vadd.f32 %v2800_v52, %v2712_v4  ;;  %v2976_v7 = vpop.xlane.xlu0 %2975  ;;  %v2625_v2 = vadd.f32 %v2624_v32, %v2536_v18 }
 0x438   : > { %v3074_v31 = vadd.f32 %v5952_v58, %v2976_v7  ;;  %v2941_v33 = vmul.f32 %v3920_v1, %v5860_v34  ;;  %v3922_v16 = vpop.eup %3921 }
 0x439   : > { %3923 = vtanh.f32 %v2801_v49  ;;  %v2942_v36 = vmul.f32 %v3922_v16, %v5858_v41 }
 0x43a   : > { %3107 = vst.msk [vmem:[%s5959_s30] sm:$0xff] %vm3106_vm0, %v3074_v31  ;;  %v3019_v24 = vadd.f32 %v2941_v33, %v2940_v22  ;;  %3925 = vtanh.f32 %v5468_v19 }
 0x43c   : > { %v2713_v56 = vpop.f32.mrf.mxu2  ;;  %3020 = vadd.xlane.f32.xlu0 %v3019_v24  ;;  %v2538_v25 = vpop.f32.mrf.mxu0 }
 0x43d   : > { %v2714_v50 = vadd.f32 %v2713_v56, %v2625_v2  ;;  %v2802_v46 = vpop.f32.mrf.mxu3  ;;  %v2627_v37 = vpop.f32.mrf.mxu1  ;;  %v2539_v0 = vadd.f32 %v2538_v25, %v5784_v9 }
 0x43f   : > { %v3924_v21 = vpop.eup %3923  ;;  %v2803_v63 = vadd.f32 %v2802_v46, %v2714_v50  ;;  %v2979_v44 = vpop.xlane.xlu0 %2978  ;;  %v2628_v59 = vadd.f32 %v2627_v37, %v2539_v0 }
 0x440   : > { %v3075_v17 = vadd.f32 %v5952_v58, %v2979_v44  ;;  %v2943_v11 = vmul.f32 %v3924_v21, %v5860_v34  ;;  %v3926_v28 = vpop.eup %3925  ;;  %v6480_v44 = vld [vmem:[#allocation117_spill] sm:$0xff] }
 0x441   : > { %3927 = vtanh.f32 %v2803_v63  ;;  %v2944_v39 = vmul.f32 %v3926_v28, %v5858_v41 }
 0x442   : > { %3108 = vst.msk [vmem:[%s5959_s30 + $0x8] sm:$0xff] %vm3106_vm0, %v3075_v17  ;;  %v3022_v5 = vadd.f32 %v2943_v11, %v2942_v36  ;;  %3929 = vtanh.f32 %v5475_v10  ;;  %v6481_v36 = vld [vmem:[#allocation9_spill] sm:$0xff] }
 0x444   : > { %v2716_v61 = vpop.f32.mrf.mxu2  ;;  %3023 = vadd.xlane.f32.xlu1 %v3022_v5  ;;  %v2540_v43 = vpop.f32.mrf.mxu0 }
 0x445   : > { %v2717_v19 = vadd.f32 %v2716_v61, %v2628_v59  ;;  %v2805_v60 = vpop.f32.mrf.mxu3  ;;  %v2629_v9 = vpop.f32.mrf.mxu1  ;;  %v2541_v8 = vadd.f32 %v2540_v43, %v5787_v30 }
 0x447   : > { %v3928_v3 = vpop.eup %3927  ;;  %v2806_v29 = vadd.f32 %v2805_v60, %v2717_v19  ;;  %v2982_v42 = vpop.xlane.xlu1 %2981  ;;  %v2630_v14 = vadd.f32 %v2629_v9, %v2541_v8 }
 0x448   : > { %v3076_v6 = vadd.f32 %v5952_v58, %v2982_v42  ;;  %v2945_v13 = vmul.f32 %v3928_v3, %v5860_v34  ;;  %v3930_v27 = vpop.eup %3929 }
 0x449   : > { %3931 = vtanh.f32 %v2806_v29  ;;  %v2946_v4 = vmul.f32 %v3930_v27, %v5858_v41 }
 0x44a   : > { %3109 = vst.msk [vmem:[%s5959_s30 + $0x10] sm:$0xff] %vm3106_vm0, %v3076_v6  ;;  %v3025_v40 = vadd.f32 %v2945_v13, %v2944_v39  ;;  %3933 = vtanh.f32 %v5478_v15  ;;  %v6482_v39 = vld [vmem:[#allocation118_spill] sm:$0xff] }
 0x44c   : > { %v2718_v45 = vpop.f32.mrf.mxu2  ;;  %3026 = vadd.xlane.f32.xlu2 %v3025_v40  ;;  %v2543_v48 = vpop.f32.mrf.mxu0  ;;  %v6483_v40 = vld [vmem:[#allocation10_spill] sm:$0xff] }
 0x44d   : > { %v2719_v10 = vadd.f32 %v2718_v45, %v2630_v14  ;;  %v2807_v47 = vpop.f32.mrf.mxu3  ;;  %v2632_v30 = vpop.f32.mrf.mxu1  ;;  %v2544_v20 = vadd.f32 %v2543_v48, %v5794_v35 }
 0x44f   : > { %v3932_v53 = vpop.eup %3931  ;;  %v2808_v23 = vadd.f32 %v2807_v47, %v2719_v10  ;;  %v2985_v54 = vpop.xlane.xlu1 %2984  ;;  %v2633_v32 = vadd.f32 %v2632_v30, %v2544_v20 }
 0x450   : > { %v3077_v38 = vadd.f32 %v5952_v58, %v2985_v54  ;;  %v2947_v52 = vmul.f32 %v3932_v53, %v5860_v34  ;;  %v3934_v49 = vpop.eup %3933 }
 0x451   : > { %3935 = vtanh.f32 %v2808_v23  ;;  %v2948_v56 = vmul.f32 %v3934_v49, %v5858_v41 }
 0x452   : > { %3110 = vst.msk [vmem:[%s5959_s30 + $0x18] sm:$0xff] %vm3106_vm0, %v3077_v38  ;;  %v3028_v62 = vadd.f32 %v2947_v52, %v2946_v4  ;;  %3937 = vtanh.f32 %v5503_v57 }
 0x454   : > { %v2721_v1 = vpop.f32.mrf.mxu2  ;;  %3029 = vadd.xlane.f32.xlu0 %v3028_v62  ;;  %v2545_v7 = vpop.f32.mrf.mxu0  ;;  %v6484_v62 = vld [vmem:[#allocation119_spill] sm:$0xff] }
 0x455   : > { %v2722_v15 = vadd.f32 %v2721_v1, %v2633_v32  ;;  %v2810_v18 = vpop.f32.mrf.mxu3  ;;  %v2634_v35 = vpop.f32.mrf.mxu1  ;;  %v2546_v33 = vadd.f32 %v2545_v7, %v5797_v12  ;;  %v6485_v1 = vld [vmem:[#allocation81_spill] sm:$0xff] }
 0x457   : > { %v3936_v31 = vpop.eup %3935  ;;  %v2811_v22 = vadd.f32 %v2810_v18, %v2722_v15  ;;  %v2988_v24 = vpop.xlane.xlu2 %2987  ;;  %v2635_v46 = vadd.f32 %v2634_v35, %v2546_v33 }
 0x458   : > { %v3078_v2 = vadd.f32 %v5952_v58, %v2988_v24  ;;  %v2949_v16 = vmul.f32 %v3936_v31, %v5860_v34  ;;  %v3938_v37 = vpop.eup %3937 }
 0x459   : > { %3939 = vtanh.f32 %v2811_v22  ;;  %v2950_v61 = vmul.f32 %v3938_v37, %v5858_v41 }
 0x45a   : > { %3111 = vst.msk [vmem:[%s5959_s30 + $0x20] sm:$0xff] %vm3106_vm0, %v3078_v2  ;;  %v3031_v50 = vadd.f32 %v2949_v16, %v2948_v56  ;;  %3941 = vtanh.f32 %v6480_v44 }
 0x45c   : > { %v2723_v25 = vpop.f32.mrf.mxu2  ;;  %3032 = vadd.xlane.f32.xlu1 %v3031_v50  ;;  %v2548_v63 = vpop.f32.mrf.mxu0 }
 0x45d   : > { %v2724_v57 = vadd.f32 %v2723_v25, %v2635_v46  ;;  %v2812_v21 = vpop.f32.mrf.mxu3  ;;  %v2637_v12 = vpop.f32.mrf.mxu1  ;;  %v2549_v11 = vadd.f32 %v2548_v63, %v6481_v36  ;;  %v6486_v25 = vld [vmem:[#allocation3_spill] sm:$0xff] }
 0x45f   : > { %v3940_v0 = vpop.eup %3939  ;;  %v2813_v17 = vadd.f32 %v2812_v21, %v2724_v57  ;;  %v2991_v5 = vpop.xlane.xlu2 %2990  ;;  %v2638_v60 = vadd.f32 %v2637_v12, %v2549_v11  ;;  %v6487_v57 = vld [vmem:[#allocation82_spill] sm:$0xff] }
 0x460   : > { %v3079_v59 = vadd.f32 %v5952_v58, %v2991_v5  ;;  %v2951_v28 = vmul.f32 %v3940_v0, %v5860_v34  ;;  %v3942_v9 = vpop.eup %3941 }
 0x461   : > { %3943 = vtanh.f32 %v2813_v17  ;;  %v2952_v10 = vmul.f32 %v3942_v9, %v5858_v41 }
 0x462   : > { %3112 = vst.msk [vmem:[%s5959_s30 + $0x28] sm:$0xff] %vm3106_vm0, %v3079_v59  ;;  %v3034_v19 = vadd.f32 %v2951_v28, %v2950_v61  ;;  %3945 = vtanh.f32 %v6482_v39 }
 0x464   : > { %v2726_v43 = vpop.f32.mrf.mxu2  ;;  %3035 = vadd.xlane.f32.xlu2 %v3034_v19  ;;  %v2550_v8 = vpop.f32.mrf.mxu0 }
 0x465   : > { %v2727_v3 = vadd.f32 %v2726_v43, %v2638_v60  ;;  %v2815_v29 = vpop.f32.mrf.mxu3  ;;  %v2639_v42 = vpop.f32.mrf.mxu1  ;;  %v2551_v14 = vadd.f32 %v2550_v8, %v6483_v40  ;;  %v6488_v43 = vld [vmem:[#allocation4_spill] sm:$0xff] }
 0x467   : > { %v3944_v6 = vpop.eup %3943  ;;  %v2816_v13 = vadd.f32 %v2815_v29, %v2727_v3  ;;  %v2994_v45 = vpop.xlane.xlu0 %2993  ;;  %v2640_v30 = vadd.f32 %v2639_v42, %v2551_v14  ;;  %v6489_v3 = vld [vmem:[#allocation11_spill] sm:$0xff] }
 0x468   : > { %v3080_v27 = vadd.f32 %v5952_v58, %v2994_v45  ;;  %v2953_v47 = vmul.f32 %v3944_v6, %v5860_v34  ;;  %v3946_v23 = vpop.eup %3945 }
 0x469   : > { %3947 = vtanh.f32 %v2816_v13  ;;  %v2954_v7 = vmul.f32 %v3946_v23, %v5858_v41 }
 0x46a   : > { %3113 = vst.msk [vmem:[%s5959_s30 + $0x30] sm:$0xff] %vm3106_vm0, %v3080_v27  ;;  %v3037_v48 = vadd.f32 %v2953_v47, %v2952_v10  ;;  %3949 = vtanh.f32 %v6484_v62 }
 0x46c   : > { %v2728_v53 = vpop.f32.mrf.mxu2  ;;  %3038 = vadd.xlane.f32.xlu0 %v3037_v48  ;;  %v2553_v38 = vpop.f32.mrf.mxu0 }
 0x46d   : > { %v2729_v20 = vadd.f32 %v2728_v53, %v2640_v30  ;;  %v2817_v54 = vpop.f32.mrf.mxu3  ;;  %v2642_v4 = vpop.f32.mrf.mxu1  ;;  %v2554_v49 = vadd.f32 %v2553_v38, %v6485_v1  ;;  %v6490_v53 = vld [vmem:[#allocation5_spill] sm:$0xff] }
 0x46f   : > { %v3948_v52 = vpop.eup %3947  ;;  %v2818_v32 = vadd.f32 %v2817_v54, %v2729_v20  ;;  %v2997_v15 = vpop.xlane.xlu1 %2996  ;;  %v2643_v22 = vadd.f32 %v2642_v4, %v2554_v49  ;;  %v6491_v20 = vld [vmem:[#allocation12_spill] sm:$0xff] }
 0x470   : > { %v3081_v18 = vadd.f32 %v5952_v58, %v2997_v15  ;;  %v2955_v35 = vmul.f32 %v3948_v52, %v5860_v34  ;;  %v3950_v24 = vpop.eup %3949 }
 0x471   : > { %3951 = vtanh.f32 %v2818_v32  ;;  %v2956_v0 = vmul.f32 %v3950_v24, %v5858_v41 }
 0x472   : > { %3114 = vst.msk [vmem:[%s5959_s30 + $0x38] sm:$0xff] %vm3106_vm0, %v3081_v18  ;;  %v3040_v31 = vadd.f32 %v2955_v35, %v2954_v7  ;;  %3953 = vtanh.f32 %v6486_v25 }
 0x474   : > { %v2731_v33 = vpop.f32.mrf.mxu2  ;;  %3041 = vadd.xlane.f32.xlu1 %v3040_v31  ;;  %v2555_v16 = vpop.f32.mrf.mxu0 }
 0x475   : > { %v2732_v2 = vadd.f32 %v2731_v33, %v2643_v22  ;;  %v2820_v56 = vpop.f32.mrf.mxu3  ;;  %v2644_v50 = vpop.f32.mrf.mxu1  ;;  %v2556_v21 = vadd.f32 %v2555_v16, %v6487_v57  ;;  %v6492_v33 = vld [vmem:[#allocation6_spill] sm:$0xff] }
 0x477   : > { %v3952_v46 = vpop.eup %3951  ;;  %v2821_v37 = vadd.f32 %v2820_v56, %v2732_v2  ;;  %v3000_v63 = vpop.xlane.xlu2 %2999  ;;  %v2645_v36 = vadd.f32 %v2644_v50, %v2556_v21 }
 0x478   : > { %v3082_v12 = vadd.f32 %v5952_v58, %v3000_v63  ;;  %v2957_v44 = vmul.f32 %v3952_v46, %v5860_v34  ;;  %v3954_v5 = vpop.eup %3953 }
 0x479   : > { %3955 = vtanh.f32 %v2821_v37  ;;  %v2958_v6 = vmul.f32 %v3954_v5, %v5858_v41 }
 0x47a   : > { %3115 = vst.msk [vmem:[%s5959_s30 + $0x40] sm:$0xff] %vm3106_vm0, %v3082_v12  ;;  %v3043_v17 = vadd.f32 %v2957_v44, %v2956_v0  ;;  %3957 = vtanh.f32 %v6488_v43 }
 0x47c   : > { %v2733_v11 = vpop.f32.mrf.mxu2  ;;  %3044 = vadd.xlane.f32.xlu2 %v3043_v17  ;;  %v2558_v28 = vpop.f32.mrf.mxu0  ;;  %v6493_v17 = vld [vmem:[#allocation75_spill] sm:$0xff] }
 0x47d   : > { %v2734_v59 = vadd.f32 %v2733_v11, %v2645_v36  ;;  %v2822_v61 = vpop.f32.mrf.mxu3  ;;  %v2647_v19 = vpop.f32.mrf.mxu1  ;;  %v2559_v29 = vadd.f32 %v2558_v28, %v6489_v3  ;;  %v6494_v11 = vld [vmem:[#allocation13_spill] sm:$0xff] }
 0x47f   : > { %v3956_v60 = vpop.eup %3955  ;;  %v2823_v9 = vadd.f32 %v2822_v61, %v2734_v59  ;;  %v3003_v8 = vpop.xlane.xlu0 %3002  ;;  %v2648_v40 = vadd.f32 %v2647_v19, %v2559_v29 }
 0x480   : > { %v3083_v42 = vadd.f32 %v5952_v58, %v3003_v8  ;;  %v2959_v39 = vmul.f32 %v3956_v60, %v5860_v34  ;;  %v3958_v45 = vpop.eup %3957 }
 0x481   : > { %3959 = vtanh.f32 %v2823_v9  ;;  %v2960_v52 = vmul.f32 %v3958_v45, %v5858_v41 }
 0x482   : > { %3116 = vst.msk [vmem:[%s5959_s30 + $0x48] sm:$0xff] %vm3106_vm0, %v3083_v42  ;;  %v3046_v13 = vadd.f32 %v2959_v39, %v2958_v6  ;;  %3961 = vtanh.f32 %v6490_v53  ;;  %v6495_v39 = vld [vmem:[#allocation76_spill] sm:$0xff] }
 0x484   : > { %v2736_v14 = vpop.f32.mrf.mxu2  ;;  %3047 = vadd.xlane.f32.xlu0 %v3046_v13  ;;  %v2560_v47 = vpop.f32.mrf.mxu0 }
 0x485   : > { %v2737_v27 = vadd.f32 %v2736_v14, %v2648_v40  ;;  %v2825_v10 = vpop.f32.mrf.mxu3  ;;  %v2649_v48 = vpop.f32.mrf.mxu1  ;;  %v2561_v54 = vadd.f32 %v2560_v47, %v6491_v20 }
 0x487   : > { %v3960_v30 = vpop.eup %3959  ;;  %v2826_v23 = vadd.f32 %v2825_v10, %v2737_v27  ;;  %v3006_v38 = vpop.xlane.xlu1 %3005  ;;  %v2650_v1 = vadd.f32 %v2649_v48, %v2561_v54 }
 0x488   : > { %v3084_v4 = vadd.f32 %v5952_v58, %v3006_v38  ;;  %v2961_v62 = vmul.f32 %v3960_v30, %v5860_v34  ;;  %v3962_v15 = vpop.eup %3961 }
 0x489   : > { %3963 = vtanh.f32 %v2826_v23  ;;  %v2962_v50 = vmul.f32 %v3962_v15, %v5858_v41 }
 0x48a   : > { %3117 = vst.msk [vmem:[%s5959_s30 + $0x50] sm:$0xff] %vm3106_vm0, %v3084_v4  ;;  %v3049_v32 = vadd.f32 %v2961_v62, %v2960_v52  ;;  %3965 = vtanh.f32 %v6492_v33  ;;  %v6496_v4 = vld [vmem:[#allocation7_spill] sm:$0xff] }
 0x48c   : > { %v2738_v49 = vpop.f32.mrf.mxu2  ;;  %3050 = vadd.xlane.f32.xlu1 %v3049_v32  ;;  %v2563_v35 = vpop.f32.mrf.mxu0 }
 0x48d   : > { %v2739_v18 = vadd.f32 %v2738_v49, %v2650_v1  ;;  %v2827_v7 = vpop.f32.mrf.mxu3  ;;  %v2652_v31 = vpop.f32.mrf.mxu1  ;;  %v2564_v2 = vadd.f32 %v2563_v35, %v5834_v51 }
 0x48f   : > { %v3964_v22 = vpop.eup %3963  ;;  %v2828_v24 = vadd.f32 %v2827_v7, %v2739_v18  ;;  %v3009_v56 = vpop.xlane.xlu2 %3008  ;;  %v2653_v37 = vadd.f32 %v2652_v31, %v2564_v2  ;;  %v6497_v2 = vld [vmem:[#allocation8_spill] sm:$0xff] }
 0x490   : > { %v3085_v16 = vadd.f32 %v5952_v58, %v3009_v56  ;;  %v2963_v46 = vmul.f32 %v3964_v22, %v5860_v34  ;;  %v3966_v21 = vpop.eup %3965 }
 0x491   : > { %3967 = vtanh.f32 %v2828_v24  ;;  %v2964_v28 = vmul.f32 %v3966_v21, %v5858_v41 }
 0x492   : > { %3118 = vst.msk [vmem:[%s5959_s30 + $0x58] sm:$0xff] %vm3106_vm0, %v3085_v16  ;;  %v3052_v25 = vadd.f32 %v2963_v46, %v2962_v50  ;;  %3969 = vtanh.f32 %v6493_v17 }
 0x494   : > { %v2741_v57 = vpop.f32.mrf.mxu2  ;;  %3053 = vadd.xlane.f32.xlu2 %v3052_v25  ;;  %v2565_v0 = vpop.f32.mrf.mxu0 }
 0x495   : > { %v2742_v63 = vadd.f32 %v2741_v57, %v2653_v37  ;;  %v2830_v12 = vpop.f32.mrf.mxu3  ;;  %v2654_v51 = vpop.f32.mrf.mxu1  ;;  %v2566_v5 = vadd.f32 %v2565_v0, %v6494_v11 }
 0x497   : > { %v3968_v44 = vpop.eup %3967  ;;  %v2831_v36 = vadd.f32 %v2830_v12, %v2742_v63  ;;  %v3012_v59 = vpop.xlane.xlu0 %3011  ;;  %v2655_v43 = vadd.f32 %v2654_v51, %v2566_v5 }
 0x498   : > { %v3086_v61 = vadd.f32 %v5952_v58, %v3012_v59  ;;  %v2965_v19 = vmul.f32 %v3968_v44, %v5860_v34  ;;  %v3970_v3 = vpop.eup %3969 }
 0x499   : > { %3971 = vtanh.f32 %v2831_v36  ;;  %v2966_v10 = vmul.f32 %v3970_v3, %v5858_v41 }
 0x49a   : > { %3119 = vst.msk [vmem:[%s5959_s30 + $0x60] sm:$0xff] %vm3106_vm0, %v3086_v61  ;;  %v3055_v60 = vadd.f32 %v2965_v19, %v2964_v28  ;;  %3973 = vtanh.f32 %v6495_v39 }
 0x49c   : > { %v2743_v9 = vpop.f32.mrf.mxu2  ;;  %3056 = vadd.xlane.f32.xlu0 %v3055_v60  ;;  %v2568_v42 = vpop.f32.mrf.mxu0 }
 0x49d   : > { %v2744_v29 = vadd.f32 %v2743_v9, %v2655_v43  ;;  %v2832_v8 = vpop.f32.mrf.mxu3  ;;  %v2569_v40 = vadd.f32 %v2568_v42, %v5844_v55  ;;  %v2657_v45 = vpop.f32.mrf.mxu1 }
 0x49f   : > { %v3972_v6 = vpop.eup %3971  ;;  %v2833_v13 = vadd.f32 %v2832_v8, %v2744_v29  ;;  %v3015_v14 = vpop.xlane.xlu1 %3014  ;;  %v2658_v30 = vadd.f32 %v2657_v45, %v2569_v40 }
 0x4a0   : > { %v3087_v27 = vadd.f32 %v5952_v58, %v3015_v14  ;;  %v2967_v47 = vmul.f32 %v3972_v6, %v5860_v34  ;;  %v3974_v23 = vpop.eup %3973 }
 0x4a1   : > { %3975 = vtanh.f32 %v2833_v13  ;;  %v2968_v49 = vmul.f32 %v3974_v23, %v5858_v41 }
 0x4a2   : > { %3120 = vst.msk [vmem:[%s5959_s30 + $0x68] sm:$0xff] %vm3106_vm0, %v3087_v27  ;;  %v3058_v48 = vadd.f32 %v2967_v47, %v2966_v10  ;;  %3977 = vtanh.f32 %v6496_v4 }
 0x4a4   : > { %v2746_v53 = vpop.f32.mrf.mxu2  ;;  %3059 = vadd.xlane.f32.xlu1 %v3058_v48  ;;  %v2570_v55 = vpop.f32.mrf.mxu0 }
 0x4a5   : > { %v2747_v20 = vadd.f32 %v2746_v53, %v2658_v30  ;;  %v2835_v54 = vpop.f32.mrf.mxu3  ;;  %v2571_v62 = vadd.f32 %v2570_v55, %v5846_v26  ;;  %v2659_v18 = vpop.f32.mrf.mxu1 }
 0x4a7   : > { %v3976_v38 = vpop.eup %3975  ;;  %v2836_v52 = vadd.f32 %v2835_v54, %v2747_v20  ;;  %v3018_v32 = vpop.xlane.xlu2 %3017  ;;  %v2660_v35 = vadd.f32 %v2659_v18, %v2571_v62 }
 0x4a8   : > { %v3088_v1 = vadd.f32 %v5952_v58, %v3018_v32  ;;  %v2969_v15 = vmul.f32 %v3976_v38, %v5860_v34  ;;  %v3978_v22 = vpop.eup %3977 }
 0x4a9   : > { %3979 = vtanh.f32 %v2836_v52  ;;  %v2970_v46 = vmul.f32 %v3978_v22, %v5858_v41 }
 0x4aa   : > { %3121 = vst.msk [vmem:[%s5959_s30 + $0x70] sm:$0xff] %vm3106_vm0, %v3088_v1  ;;  %v3061_v7 = vadd.f32 %v2969_v15, %v2968_v49  ;;  %3981 = vtanh.f32 %v6497_v2 }
 0x4ac   : > { %v2748_v31 = vpop.f32.mrf.mxu2  ;;  %3062 = vadd.xlane.f32.xlu2 %v3061_v7 }
 0x4ad   : > { %v2749_v33 = vadd.f32 %v2748_v31, %v2660_v35  ;;  %v2837_v24 = vpop.f32.mrf.mxu3 }
 0x4af   : > { %v3980_v26 = vpop.eup %3979  ;;  %v2838_v56 = vadd.f32 %v2837_v24, %v2749_v33  ;;  %v3021_v16 = vpop.xlane.xlu0 %3020 }
 0x4b0   : > { %v3089_v50 = vadd.f32 %v5952_v58, %v3021_v16  ;;  %v2971_v25 = vmul.f32 %v3980_v26, %v5860_v34  ;;  %v3982_v57 = vpop.eup %3981 }
 0x4b1   : > { %3983 = vtanh.f32 %v2838_v56  ;;  %v2972_v0 = vmul.f32 %v3982_v57, %v5858_v41 }
 0x4b2   : > { %3122 = vst.msk [vmem:[%s5959_s30 + $0x78] sm:$0xff] %vm3106_vm0, %v3089_v50  ;;  %v3064_v37 = vadd.f32 %v2971_v25, %v2970_v46 }
 0x4b4   : > { %3065 = vadd.xlane.f32.xlu0 %v3064_v37 }
 0x4b7   : > { %v3984_v21 = vpop.eup %3983  ;;  %v3024_v63 = vpop.xlane.xlu1 %3023 }
 0x4b8   : > { %v3090_v12 = vadd.f32 %v5952_v58, %v3024_v63  ;;  %v2973_v51 = vmul.f32 %v3984_v21, %v5860_v34 }
 0x4ba   : > { %3123 = vst.msk [vmem:[%s5959_s30 + $0x80] sm:$0xff] %vm3106_vm0, %v3090_v12  ;;  %v3067_v44 = vadd.f32 %v2973_v51, %v2972_v0 }
 0x4bc   : > { %3068 = vadd.xlane.f32.xlu1 %v3067_v44 }
 0x4bf   : > { %v3027_v17 = vpop.xlane.xlu2 %3026 }
 0x4c0   : > { %v3091_v36 = vadd.f32 %v5952_v58, %v3027_v17 }
 0x4c2   : > { %3124 = vst.msk [vmem:[%s5959_s30 + $0x88] sm:$0xff] %vm3106_vm0, %v3091_v36 }
 0x4c7   : > { %v3030_v11 = vpop.xlane.xlu0 %3029 }
 0x4c8   : > { %v3092_v5 = vadd.f32 %v5952_v58, %v3030_v11 }
 0x4ca   : > { %3125 = vst.msk [vmem:[%s5959_s30 + $0x90] sm:$0xff] %vm3106_vm0, %v3092_v5 }
 0x4cf   : > { %v3033_v41 = vpop.xlane.xlu1 %3032 }
 0x4d0   : > { %v3093_v34 = vadd.f32 %v5952_v58, %v3033_v41 }
 0x4d2   : > { %3126 = vst.msk [vmem:[%s5959_s30 + $0x98] sm:$0xff] %vm3106_vm0, %v3093_v34 }
 0x4d7   : > { %v3036_v59 = vpop.xlane.xlu2 %3035 }
 0x4d8   : > { %v3094_v61 = vadd.f32 %v5952_v58, %v3036_v59 }
 0x4da   : > { %3127 = vst.msk [vmem:[%s5959_s30 + $0xa0] sm:$0xff] %vm3106_vm0, %v3094_v61 }
 0x4df   : > { %v3039_v28 = vpop.xlane.xlu0 %3038 }
 0x4e0   : > { %v3095_v19 = vadd.f32 %v5952_v58, %v3039_v28 }
 0x4e2   : > { %3128 = vst.msk [vmem:[%s5959_s30 + $0xa8] sm:$0xff] %vm3106_vm0, %v3095_v19 }
 0x4e7   : > { %v3042_v60 = vpop.xlane.xlu1 %3041 }
 0x4e8   : > { %v3096_v43 = vadd.f32 %v5952_v58, %v3042_v60 }
 0x4ea   : > { %3129 = vst.msk [vmem:[%s5959_s30 + $0xb0] sm:$0xff] %vm3106_vm0, %v3096_v43 }
 0x4ef   : > { %v3045_v9 = vpop.xlane.xlu2 %3044 }
 0x4f0   : > { %v3097_v3 = vadd.f32 %v5952_v58, %v3045_v9 }
 0x4f2   : > { %3130 = vst.msk [vmem:[%s5959_s30 + $0xb8] sm:$0xff] %vm3106_vm0, %v3097_v3 }
 0x4f7   : > { %v3048_v29 = vpop.xlane.xlu0 %3047 }
 0x4f8   : > { %v3098_v8 = vadd.f32 %v5952_v58, %v3048_v29 }
 0x4fa   : > { %3131 = vst.msk [vmem:[%s5959_s30 + $0xc0] sm:$0xff] %vm3106_vm0, %v3098_v8 }
 0x4ff   : > { %v3051_v42 = vpop.xlane.xlu1 %3050 }
 0x500   : > { %v3099_v6 = vadd.f32 %v5952_v58, %v3051_v42 }
 0x502   : > { %3132 = vst.msk [vmem:[%s5959_s30 + $0xc8] sm:$0xff] %vm3106_vm0, %v3099_v6 }
 0x507   : > { %v3054_v39 = vpop.xlane.xlu2 %3053 }
 0x508   : > { %v3100_v13 = vadd.f32 %v5952_v58, %v3054_v39 }
 0x50a   : > { %3133 = vst.msk [vmem:[%s5959_s30 + $0xd0] sm:$0xff] %vm3106_vm0, %v3100_v13 }
 0x50f   : > { %v3057_v40 = vpop.xlane.xlu0 %3056 }
 0x510   : > { %v3101_v14 = vadd.f32 %v5952_v58, %v3057_v40 }
 0x512   : > { %3134 = vst.msk [vmem:[%s5959_s30 + $0xd8] sm:$0xff] %vm3106_vm0, %v3101_v14 }
 0x517   : > { %v3060_v45 = vpop.xlane.xlu1 %3059 }
 0x518   : > { %v3102_v27 = vadd.f32 %v5952_v58, %v3060_v45 }
 0x51a   : > { %3135 = vst.msk [vmem:[%s5959_s30 + $0xe0] sm:$0xff] %vm3106_vm0, %v3102_v27 }
 0x51f   : > { %v3063_v10 = vpop.xlane.xlu2 %3062 }
 0x520   : > { %v3103_v47 = vadd.f32 %v5952_v58, %v3063_v10 }
 0x522   : > { %3136 = vst.msk [vmem:[%s5959_s30 + $0xe8] sm:$0xff] %vm3106_vm0, %v3103_v47 }
 0x527   : > { %v3066_v48 = vpop.xlane.xlu0 %3065 }
 0x528   : > { %v3104_v30 = vadd.f32 %v5952_v58, %v3066_v48 }
 0x52a   : > { %3137 = vst.msk [vmem:[%s5959_s30 + $0xf0] sm:$0xff] %vm3106_vm0, %v3104_v30 }
 0x52f   : > { %v3069_v53 = vpop.xlane.xlu1 %3068 }
 0x530   : > { %v3105_v23 = vadd.f32 %v5952_v58, %v3069_v53 }
 0x532   : > { %3138 = vst.msk [vmem:[%s5959_s30 + $0xf8] sm:$0xff] %vm3106_vm0, %v3105_v23 }
 0x533 PF: > { %s17_s20 = sadd.s32 1, %s3992_s20  }
 0x534   : > { %p14_p5 = scmp.ge.s32.totalorder %s17_s20, 4  }
 0x536   :  { %16 = sbr.rel (!%p14_p5) target bundleno = 3 (0x3), region = 70 }

</bundles_post_ra>
